<compile_context>
chip_gen: v5e
topology: v5e:2x2
jax: 0.10.0
libtpu: 0.0.40
codegen_flags: <defaults>
</compile_context>

<pallas_src>
import jax
import jax.numpy as jnp
from jax import lax
from jax.experimental import pallas as pl
from jax.experimental.pallas import tpu as pltpu


def _round_up(x, m):
    return ((x + m - 1) // m) * m


def _vmem_limit(est_bytes):
    """VMEM limit derived from the actual working set, with headroom; <64 MiB for v7x."""
    return int(min(48 * 1024 * 1024, max(8 * 1024 * 1024, 2 * est_bytes)))


def _make_conv_kernel(N, H, W, Wp, Cin, Cout, apply_act, compute_dtype):
    """3x3 conv (padding=1) over a flat zero-halo layout, one image per grid step.

    Layouts (flat row-major over a zero-padded spatial grid of width Wp >= W+2, with
    2 guard rows top/bottom):
      input : (N, Rpad, Cin)   Rpad = (H+4)*Wp
      output: apply_act=False -> (N, Rpad, Cout)  same zero-halo layout (guard rows and
              invalid columns written as exact zeros) so the next conv reads it directly.
              apply_act=True  -> (N, Rout, Cout)  interior rows only (Rout = H*Wp), invalid
              columns zeroed; reshapes for free to the lane-dense (N*H, Wp*Cout) view for
              the final BN+ReLU kernel.
    Also emits per-image (1, Cout) sum / sum-of-squares over valid pixels (f32) for the
    host-side two-pass BatchNorm statistics, keeping the image grid axis "parallel".
    If apply_act: the input (previous conv output, zero-halo layout) is first mapped
    through y*scale + shift -> ReLU, with the halo re-imposed by the valid mask.
    """
    GUARD = 2 * Wp
    Rpad = (H + 4) * Wp
    Rout = H * Wp
    offs = tuple((dy + 2) * Wp + dx for dy in (-1, 0, 1) for dx in (-1, 0, 1))
    y_dtype = jnp.float32 if apply_act else compute_dtype   # pass 2 output feeds BN2 stats

    # Row-chunk size for register-accumulated matmuls: largest multiple of 8 that divides
    # Rout and is <= 128 (keeps the (RCH, Cout) accumulator within the vreg budget).
    RCH = 8
    for cand in range(min(128, Rout), 7, -8):
        if Rout % cand == 0:
            RCH = cand
            break
    n_chunks = Rout // RCH

    def conv_core(src_ref, w_ref, valid_ref, y_ref, sum_ref, sq_ref, out_base):
        s_acc = jnp.zeros((1, Cout), jnp.float32)
        q_acc = jnp.zeros((1, Cout), jnp.float32)
        # TODO(synk): for production H*W, replace this static unroll with an intra-image
        # row-chunk grid axis (pl.ANY input + manual halo DMA) so the per-step working set
        # stays within VMEM and v7x's two TensorCores get many parallel steps.
        for s in range(n_chunks):
            r0 = s * RCH
            y = jnp.zeros((RCH, Cout), jnp.float32)
            for t, off in enumerate(offs):   # 9 accumulating MXU matmuls, no im2col staging
                y = y + jnp.dot(src_ref[pl.ds(off + r0, RCH), :],
                                w_ref[pl.ds(t * Cin, Cin), :],
                                preferred_element_type=jnp.float32)
            yv = y * valid_ref[pl.ds(r0, RCH), :]             # zero the padded columns
            y_ref[pl.ds(out_base + r0, RCH), :] = yv.astype(y_dtype)
            s_acc = s_acc + jnp.sum(yv, axis=0, keepdims=True)
            q_acc = q_acc + jnp.sum(yv * yv, axis=0, keepdims=True)
        # NOTE: one-pass E[x^2]-E[x]^2 in f32 is adequate at these magnitudes; for very
        # large/biased activations switch to a shifted two-pass accumulation.
        sum_ref[...] = s_acc
        sq_ref[...] = q_acc

    if apply_act:
        def kernel(x_ref, w_ref, scale_ref, shift_ref, valid_ref,
                   y_ref, sum_ref, sq_ref, act_ref):
            # Fused BN1-affine + ReLU of the previous conv. The valid mask re-imposes the
            # zero halo on the padded columns (relu(shift) would otherwise leak in); the
            # guard rows are zeroed explicitly. No separate `halo` input needed.
            zeros_g = jnp.zeros((GUARD, Cout), compute_dtype)
            act_ref[pl.ds(0, GUARD), :] = zeros_g
            act_ref[pl.ds(GUARD + Rout, GUARD), :] = zeros_g
            act = (jnp.maximum(x_ref[pl.ds(GUARD, Rout), :] * scale_ref[...]
                               + shift_ref[...], 0.0) * valid_ref[...])
            act_ref[pl.ds(GUARD, Rout), :] = act.astype(compute_dtype)
            conv_core(act_ref, w_ref, valid_ref, y_ref, sum_ref, sq_ref, out_base=0)

        extra_specs = [pl.BlockSpec((1, Cout), lambda i: (0, 0)),      # BN1 scale (f32)
                       pl.BlockSpec((1, Cout), lambda i: (0, 0))]      # BN1 shift (f32)
        scratch = [pltpu.VMEM((Rpad, Cout), compute_dtype)]            # activation buffer
        y_rows = Rout
    else:
        def kernel(x_ref, w_ref, valid_ref, y_ref, sum_ref, sq_ref):
            zeros_g = jnp.zeros((GUARD, Cout), compute_dtype)
            y_ref[pl.ds(0, GUARD), :] = zeros_g                        # zero halo rows so
            y_ref[pl.ds(GUARD + Rout, GUARD), :] = zeros_g             # conv2 reads directly
            conv_core(x_ref, w_ref, valid_ref, y_ref, sum_ref, sq_ref, out_base=GUARD)

        extra_specs = []
        scratch = []
        y_rows = Rpad

    in_specs = ([pl.BlockSpec((None, Rpad, Cin), lambda i: (i, 0, 0)),
                 pl.BlockSpec((9 * Cin, Cout), lambda i: (0, 0))]
                + extra_specs
                + [pl.BlockSpec((Rout, 1), lambda i: (0, 0))])         # valid-pixel mask

    out_shape = (jax.ShapeDtypeStruct((N, y_rows, Cout), y_dtype),
                 jax.ShapeDtypeStruct((N, 1, Cout), jnp.float32),
                 jax.ShapeDtypeStruct((N, 1, Cout), jnp.float32))
    out_specs = (pl.BlockSpec((None, y_rows, Cout), lambda i: (i, 0, 0)),
                 pl.BlockSpec((None, 1, Cout), lambda i: (i, 0, 0)),
                 pl.BlockSpec((None, 1, Cout), lambda i: (i, 0, 0)))

    isz = jnp.dtype(compute_dtype).itemsize
    osz = jnp.dtype(y_dtype).itemsize
    est = (2 * (Rpad * Cin * isz + 9 * Cin * Cout * isz + Rout * 4 + 2 * Cout * 4)
           + 2 * (y_rows * Cout * osz + 2 * Cout * 4)
           + (Rpad * Cout * isz if apply_act else 0))

    return pl.pallas_call(
        kernel,
        grid=(N,),
        in_specs=in_specs,
        out_specs=out_specs,
        out_shape=out_shape,
        scratch_shapes=scratch,
        compiler_params=pltpu.CompilerParams(
            dimension_semantics=("parallel",),           # one image per step
            vmem_limit_bytes=_vmem_limit(est)),
    )


def _make_bnrelu_kernel(rows, cols):
    """Lane-dense elementwise y*scale + shift -> ReLU on a (rows, cols) f32 view."""
    budget = 4 * 1024 * 1024                             # per-block byte budget
    tc = cols
    if cols % 128 == 0 and cols * 8 * 4 > budget:        # tile cols only at huge widths
        for cand in range(cols, 127, -128):
            if cols % cand == 0 and cand * 8 * 4 <= budget:
                tc = cand
                break
    tr = rows
    if rows % 8 == 0:
        for cand in range(rows, 7, -8):
            if rows % cand == 0 and cand * tc * 4 <= budget:
                tr = cand
                break

    def kernel(y_ref, sc_ref, sh_ref, o_ref):
        o_ref[...] = jnp.maximum(y_ref[...] * sc_ref[...] + sh_ref[...], 0.0)

    est = 2 * (2 * tr * tc * 4 + 2 * tc * 4)
    return pl.pallas_call(
        kernel,
        grid=(rows // tr, cols // tc),
        in_specs=[pl.BlockSpec((tr, tc), lambda i, j: (i, j)),
                  pl.BlockSpec((1, tc), lambda i, j: (0, j)),
                  pl.BlockSpec((1, tc), lambda i, j: (0, j))],
        out_specs=pl.BlockSpec((tr, tc), lambda i, j: (i, j)),
        out_shape=jax.ShapeDtypeStruct((rows, cols), jnp.float32),
        compiler_params=pltpu.CompilerParams(
            dimension_semantics=("parallel", "parallel"),
            vmem_limit_bytes=_vmem_limit(est)),
    )


def double_conv_forward(x_nchw, params, compute_dtype=jnp.float32):
    """Pallas implementation of double_conv(in_ch, out_ch).forward(x). NCHW in/out."""
    w1, b1, g1, bt1, w2, b2, g2, bt2 = params
    del b1, b2   # conv biases cancel exactly under training-mode BatchNorm (see header)
    N, Cin, H, W = x_nchw.shape
    Cout = w1.shape[0]
    Wp = _round_up(W + 2, 8)      # sublane-aligned padded row width (>= W + 2)
    Rpad = (H + 4) * Wp
    Rout = H * Wp
    eps = 1e-5
    cnt = float(N * H * W)

    # ---- layout glue (raw input only): NCHW -> NHWC -> flat zero-halo rows ----
    x = jnp.transpose(x_nchw, (0, 2, 3, 1)).astype(jnp.float32)
    xflat = jnp.pad(x, ((0, 0), (2, 2), (1, Wp - W - 1), (0, 0)))
    xflat = xflat.reshape(N, Rpad, Cin).astype(compute_dtype)

    # conv weights: (Cout, Cin, 3, 3) -> (ky, kx, Cin, Cout) -> (9*Cin, Cout)
    w1k = jnp.transpose(w1, (2, 3, 1, 0)).reshape(9 * Cin, Cout).astype(compute_dtype)
    w2k = jnp.transpose(w2, (2, 3, 1, 0)).reshape(9 * Cout, Cout).astype(compute_dtype)

    # valid-pixel mask over interior rows (flags the real W columns inside each Wp row)
    valid = jnp.zeros((H, Wp), jnp.float32).at[:, 1:W + 1].set(1.0).reshape(Rout, 1)

    # ---- pass 1: conv1 -> zero-halo layout (+ per-image BN1 partial stats) ----
    y1, s1, q1 = _make_conv_kernel(N, H, W, Wp, Cin, Cout, False, compute_dtype)(
        xflat, w1k, valid)
    mean1 = jnp.sum(s1, axis=(0, 1)) / cnt
    var1 = jnp.maximum(jnp.sum(q1, axis=(0, 1)) / cnt - mean1 * mean1, 0.0)
    scale1 = (g1 * lax.rsqrt(var1 + eps)).astype(jnp.float32)
    shift1 = (bt1 - mean1 * scale1).astype(jnp.float32)
    # TODO(synk): running_mean/running_var buffer updates (training-time side effect) are
    # not modeled; they do not affect the forward output.

    # ---- pass 2: fused BN1-affine + ReLU + conv2 (+ per-image BN2 partial stats) ----
    # consumes y1 directly in the zero-halo layout: no host-side reshape/slice/pad glue
    y2, s2, q2 = _make_conv_kernel(N, H, W, Wp, Cout, Cout, True, compute_dtype)(
        y1, w2k, scale1.reshape(1, Cout), shift1.reshape(1, Cout), valid)
    mean2 = jnp.sum(s2, axis=(0, 1)) / cnt
    var2 = jnp.maximum(jnp.sum(q2, axis=(0, 1)) / cnt - mean2 * mean2, 0.0)
    scale2 = g2 * lax.rsqrt(var2 + eps)
    shift2 = bt2 - mean2 * scale2

    # ---- pass 3: BN2-affine + ReLU on the lane-dense (N*H, Wp*Cout) view (free reshape) --
    y2flat = y2.reshape(N * H, Wp * Cout)
    sc2 = jnp.tile(scale2.reshape(1, Cout), (1, Wp)).astype(jnp.float32)
    sh2 = jnp.tile(shift2.reshape(1, Cout), (1, Wp)).astype(jnp.float32)
    outflat = _make_bnrelu_kernel(N * H, Wp * Cout)(y2flat, sc2, sh2)
    out = outflat.reshape(N, H, Wp, Cout)[:, :, 1:W + 1, :]
    return out.transpose(0, 3, 1, 2)


def reference_double_conv(x, params):
    """Pure-JAX reference (NCHW), mirroring the PyTorch training-mode forward."""
    w1, b1, g1, bt1, w2, b2, g2, bt2 = params

    def conv_bn_relu(z, w, b, g, bt):
        y = lax.conv_general_dilated(z, w, window_strides=(1, 1), padding="SAME",
                                     dimension_numbers=("NCHW", "OIHW", "NCHW"))
        y = y + b.reshape(1, -1, 1, 1)
        mean = jnp.mean(y, axis=(0, 2, 3), keepdims=True)
        var = jnp.mean((y - mean) ** 2, axis=(0, 2, 3), keepdims=True)
        y = (y - mean) * lax.rsqrt(var + 1e-5)
        y = y * g.reshape(1, -1, 1, 1) + bt.reshape(1, -1, 1, 1)
        return jnp.maximum(y, 0.0)

    z = conv_bn_relu(x, w1, b1, g1, bt1)
    z = conv_bn_relu(z, w2, b2, g2, bt2)
    return z


if __name__ == "__main__":
    N, Cin, H, W = 2, 4, 16, 16
    Cout = 8

    key = jax.random.PRNGKey(0)
    kx, kw1, kb1, kw2, kb2, kg1, kbt1, kg2, kbt2 = jax.random.split(key, 9)
    x = jax.random.normal(kx, (N, Cin, H, W), dtype=jnp.float32)

    bound1 = 1.0 / (Cin * 9) ** 0.5
    w1 = jax.random.uniform(kw1, (Cout, Cin, 3, 3), jnp.float32, -bound1, bound1)
    b1 = jax.random.uniform(kb1, (Cout,), jnp.float32, -bound1, bound1)
    bound2 = 1.0 / (Cout * 9) ** 0.5
    w2 = jax.random.uniform(kw2, (Cout, Cout, 3, 3), jnp.float32, -bound2, bound2)
    b2 = jax.random.uniform(kb2, (Cout,), jnp.float32, -bound2, bound2)
    g1 = 1.0 + 0.1 * jax.random.normal(kg1, (Cout,), jnp.float32)
    bt1 = 0.1 * jax.random.normal(kbt1, (Cout,), jnp.float32)
    g2 = 1.0 + 0.1 * jax.random.normal(kg2, (Cout,), jnp.float32)
    bt2 = 0.1 * jax.random.normal(kbt2, (Cout,), jnp.float32)
    params = (w1, b1, g1, bt1, w2, b2, g2, bt2)

    out = double_conv_forward(x, params)          # f32 path (exact vs. PyTorch semantics)
    out = jax.block_until_ready(out)
    assert out.shape == (N, Cout, H, W), out.shape

    ref = reference_double_conv(x, params)
    if not bool(jnp.allclose(out, ref, atol=1e-3, rtol=1e-3)):
        raise AssertionError(
            f"mismatch vs reference, max abs err = {float(jnp.max(jnp.abs(out - ref)))}")

    print("KERNEL_OK")
</pallas_src>

<mosaic_0001>
module attributes {stable_mosaic.version = 11 : i64} {
  func.func @kernel(%arg0: i32, %arg1: memref<1x480x4xf32, #tpu.memory_space<vmem>>, %arg2: memref<36x8xf32, #tpu.memory_space<vmem>>, %arg3: memref<384x1xf32, #tpu.memory_space<vmem>>, %arg4: memref<1x480x8xf32, #tpu.memory_space<vmem>>, %arg5: memref<1x1x8xf32, #tpu.memory_space<vmem>>, %arg6: memref<1x1x8xf32, #tpu.memory_space<vmem>>) attributes {dimension_semantics = [#tpu.dimension_semantics<parallel>], iteration_bounds = array<i64: 2>, scalar_prefetch = 0 : i64, scratch_operands = 0 : i64, tpu.core_type = #tpu.core_type<tc>, window_params = [{transform_indices = @transform_0, window_bounds = array<i64: 1, 480, 4>}, {pipeline_mode = #tpu.pipeline_mode<synchronous>, transform_indices = @transform_1, window_bounds = array<i64: 36, 8>}, {pipeline_mode = #tpu.pipeline_mode<synchronous>, transform_indices = @transform_2, window_bounds = array<i64: 384, 1>}, {transform_indices = @transform_3, window_bounds = array<i64: 1, 480, 8>}, {transform_indices = @transform_4, window_bounds = array<i64: 1, 1, 8>}, {transform_indices = @transform_5, window_bounds = array<i64: 1, 1, 8>}]} {
    %cst = arith.constant 0.000000e+00 : f32
    %0 = vector.broadcast %cst : f32 to vector<48x8xf32>
    %c0 = arith.constant 0 : index
    %c0_0 = arith.constant 0 : index
    %c0_1 = arith.constant 0 : index
    %1 = vector.load %arg4[%c0, %c0_0, %c0_1] : memref<1x480x8xf32, #tpu.memory_space<vmem>>, vector<1x48x8xf32>
    %2 = vector.shape_cast %1 : vector<1x48x8xf32> to vector<48x8xf32>
    %3 = vector.shape_cast %0 : vector<48x8xf32> to vector<1x48x8xf32>
    tpu.vector_store %arg4[%c0, %c0_0, %c0_1], %3 {strides = array<i32>} : memref<1x480x8xf32, #tpu.memory_space<vmem>>, vector<1x48x8xf32>,
    %c0_2 = arith.constant 0 : index
    %c432 = arith.constant 432 : index
    %c0_3 = arith.constant 0 : index
    %4 = vector.load %arg4[%c0_2, %c432, %c0_3] : memref<1x480x8xf32, #tpu.memory_space<vmem>>, vector<1x48x8xf32>
    %5 = vector.shape_cast %4 : vector<1x48x8xf32> to vector<48x8xf32>
    %6 = vector.shape_cast %0 : vector<48x8xf32> to vector<1x48x8xf32>
    tpu.vector_store %arg4[%c0_2, %c432, %c0_3], %6 {strides = array<i32>} : memref<1x480x8xf32, #tpu.memory_space<vmem>>, vector<1x48x8xf32>,
    %cst_4 = arith.constant 0.000000e+00 : f32
    %7 = vector.broadcast %cst_4 : f32 to vector<1x8xf32>
    %cst_5 = arith.constant 0.000000e+00 : f32
    %8 = vector.broadcast %cst_5 : f32 to vector<1x8xf32>
    %cst_6 = arith.constant 0.000000e+00 : f32
    %9 = vector.broadcast %cst_6 : f32 to vector<128x8xf32>
    %c0_7 = arith.constant 0 : index
    %c23 = arith.constant 23 : index
    %c0_8 = arith.constant 0 : index
    %10 = vector.load %arg1[%c0_7, %c23, %c0_8] : memref<1x480x4xf32, #tpu.memory_space<vmem>>, vector<1x128x4xf32>
    %11 = vector.shape_cast %10 : vector<1x128x4xf32> to vector<128x4xf32>
    %c0_9 = arith.constant 0 : index
    %c0_10 = arith.constant 0 : index
    %12 = vector.load %arg2[%c0_9, %c0_10] : memref<36x8xf32, #tpu.memory_space<vmem>>, vector<4x8xf32>
    %cst_11 = arith.constant dense<0.000000e+00> : vector<128x8xf32>
    %13 = tpu.matmul %11, %12, %cst_11 {dimension_numbers = #tpu.dot_dimension_numbers<[1], [0], [0], [1], [0, 0, 1, 1], [], []>} : vector<128x4xf32>, vector<4x8xf32>, vector<128x8xf32> -> vector<128x8xf32>
    %14 = arith.addf %9, %13 : vector<128x8xf32>
    %c0_12 = arith.constant 0 : index
    %c24 = arith.constant 24 : index
    %c0_13 = arith.constant 0 : index
    %15 = vector.load %arg1[%c0_12, %c24, %c0_13] : memref<1x480x4xf32, #tpu.memory_space<vmem>>, vector<1x128x4xf32>
    %16 = vector.shape_cast %15 : vector<1x128x4xf32> to vector<128x4xf32>
    %c4 = arith.constant 4 : index
    %c0_14 = arith.constant 0 : index
    %17 = vector.load %arg2[%c4, %c0_14] : memref<36x8xf32, #tpu.memory_space<vmem>>, vector<4x8xf32>
    %cst_15 = arith.constant dense<0.000000e+00> : vector<128x8xf32>
    %18 = tpu.matmul %16, %17, %cst_15 {dimension_numbers = #tpu.dot_dimension_numbers<[1], [0], [0], [1], [0, 0, 1, 1], [], []>} : vector<128x4xf32>, vector<4x8xf32>, vector<128x8xf32> -> vector<128x8xf32>
    %19 = arith.addf %14, %18 : vector<128x8xf32>
    %c0_16 = arith.constant 0 : index
    %c25 = arith.constant 25 : index
    %c0_17 = arith.constant 0 : index
    %20 = vector.load %arg1[%c0_16, %c25, %c0_17] : memref<1x480x4xf32, #tpu.memory_space<vmem>>, vector<1x128x4xf32>
    %21 = vector.shape_cast %20 : vector<1x128x4xf32> to vector<128x4xf32>
    %c8 = arith.constant 8 : index
    %c0_18 = arith.constant 0 : index
    %22 = vector.load %arg2[%c8, %c0_18] : memref<36x8xf32, #tpu.memory_space<vmem>>, vector<4x8xf32>
    %cst_19 = arith.constant dense<0.000000e+00> : vector<128x8xf32>
    %23 = tpu.matmul %21, %22, %cst_19 {dimension_numbers = #tpu.dot_dimension_numbers<[1], [0], [0], [1], [0, 0, 1, 1], [], []>} : vector<128x4xf32>, vector<4x8xf32>, vector<128x8xf32> -> vector<128x8xf32>
    %24 = arith.addf %19, %23 : vector<128x8xf32>
    %c0_20 = arith.constant 0 : index
    %c47 = arith.constant 47 : index
    %c0_21 = arith.constant 0 : index
    %25 = vector.load %arg1[%c0_20, %c47, %c0_21] : memref<1x480x4xf32, #tpu.memory_space<vmem>>, vector<1x128x4xf32>
    %26 = vector.shape_cast %25 : vector<1x128x4xf32> to vector<128x4xf32>
    %c12 = arith.constant 12 : index
    %c0_22 = arith.constant 0 : index
    %27 = vector.load %arg2[%c12, %c0_22] : memref<36x8xf32, #tpu.memory_space<vmem>>, vector<4x8xf32>
    %cst_23 = arith.constant dense<0.000000e+00> : vector<128x8xf32>
    %28 = tpu.matmul %26, %27, %cst_23 {dimension_numbers = #tpu.dot_dimension_numbers<[1], [0], [0], [1], [0, 0, 1, 1], [], []>} : vector<128x4xf32>, vector<4x8xf32>, vector<128x8xf32> -> vector<128x8xf32>
    %29 = arith.addf %24, %28 : vector<128x8xf32>
    %c0_24 = arith.constant 0 : index
    %c48 = arith.constant 48 : index
    %c0_25 = arith.constant 0 : index
    %30 = vector.load %arg1[%c0_24, %c48, %c0_25] : memref<1x480x4xf32, #tpu.memory_space<vmem>>, vector<1x128x4xf32>
    %31 = vector.shape_cast %30 : vector<1x128x4xf32> to vector<128x4xf32>
    %c16 = arith.constant 16 : index
    %c0_26 = arith.constant 0 : index
    %32 = vector.load %arg2[%c16, %c0_26] : memref<36x8xf32, #tpu.memory_space<vmem>>, vector<4x8xf32>
    %cst_27 = arith.constant dense<0.000000e+00> : vector<128x8xf32>
    %33 = tpu.matmul %31, %32, %cst_27 {dimension_numbers = #tpu.dot_dimension_numbers<[1], [0], [0], [1], [0, 0, 1, 1], [], []>} : vector<128x4xf32>, vector<4x8xf32>, vector<128x8xf32> -> vector<128x8xf32>
    %34 = arith.addf %29, %33 : vector<128x8xf32>
    %c0_28 = arith.constant 0 : index
    %c49 = arith.constant 49 : index
    %c0_29 = arith.constant 0 : index
    %35 = vector.load %arg1[%c0_28, %c49, %c0_29] : memref<1x480x4xf32, #tpu.memory_space<vmem>>, vector<1x128x4xf32>
    %36 = vector.shape_cast %35 : vector<1x128x4xf32> to vector<128x4xf32>
    %c20 = arith.constant 20 : index
    %c0_30 = arith.constant 0 : index
    %37 = vector.load %arg2[%c20, %c0_30] : memref<36x8xf32, #tpu.memory_space<vmem>>, vector<4x8xf32>
    %cst_31 = arith.constant dense<0.000000e+00> : vector<128x8xf32>
    %38 = tpu.matmul %36, %37, %cst_31 {dimension_numbers = #tpu.dot_dimension_numbers<[1], [0], [0], [1], [0, 0, 1, 1], [], []>} : vector<128x4xf32>, vector<4x8xf32>, vector<128x8xf32> -> vector<128x8xf32>
    %39 = arith.addf %34, %38 : vector<128x8xf32>
    %c0_32 = arith.constant 0 : index
    %c71 = arith.constant 71 : index
    %c0_33 = arith.constant 0 : index
    %40 = vector.load %arg1[%c0_32, %c71, %c0_33] : memref<1x480x4xf32, #tpu.memory_space<vmem>>, vector<1x128x4xf32>
    %41 = vector.shape_cast %40 : vector<1x128x4xf32> to vector<128x4xf32>
    %c24_34 = arith.constant 24 : index
    %c0_35 = arith.constant 0 : index
    %42 = vector.load %arg2[%c24_34, %c0_35] : memref<36x8xf32, #tpu.memory_space<vmem>>, vector<4x8xf32>
    %cst_36 = arith.constant dense<0.000000e+00> : vector<128x8xf32>
    %43 = tpu.matmul %41, %42, %cst_36 {dimension_numbers = #tpu.dot_dimension_numbers<[1], [0], [0], [1], [0, 0, 1, 1], [], []>} : vector<128x4xf32>, vector<4x8xf32>, vector<128x8xf32> -> vector<128x8xf32>
    %44 = arith.addf %39, %43 : vector<128x8xf32>
    %c0_37 = arith.constant 0 : index
    %c72 = arith.constant 72 : index
    %c0_38 = arith.constant 0 : index
    %45 = vector.load %arg1[%c0_37, %c72, %c0_38] : memref<1x480x4xf32, #tpu.memory_space<vmem>>, vector<1x128x4xf32>
    %46 = vector.shape_cast %45 : vector<1x128x4xf32> to vector<128x4xf32>
    %c28 = arith.constant 28 : index
    %c0_39 = arith.constant 0 : index
    %47 = vector.load %arg2[%c28, %c0_39] : memref<36x8xf32, #tpu.memory_space<vmem>>, vector<4x8xf32>
    %cst_40 = arith.constant dense<0.000000e+00> : vector<128x8xf32>
    %48 = tpu.matmul %46, %47, %cst_40 {dimension_numbers = #tpu.dot_dimension_numbers<[1], [0], [0], [1], [0, 0, 1, 1], [], []>} : vector<128x4xf32>, vector<4x8xf32>, vector<128x8xf32> -> vector<128x8xf32>
    %49 = arith.addf %44, %48 : vector<128x8xf32>
    %c0_41 = arith.constant 0 : index
    %c73 = arith.constant 73 : index
    %c0_42 = arith.constant 0 : index
    %50 = vector.load %arg1[%c0_41, %c73, %c0_42] : memref<1x480x4xf32, #tpu.memory_space<vmem>>, vector<1x128x4xf32>
    %51 = vector.shape_cast %50 : vector<1x128x4xf32> to vector<128x4xf32>
    %c32 = arith.constant 32 : index
    %c0_43 = arith.constant 0 : index
    %52 = vector.load %arg2[%c32, %c0_43] : memref<36x8xf32, #tpu.memory_space<vmem>>, vector<4x8xf32>
    %cst_44 = arith.constant dense<0.000000e+00> : vector<128x8xf32>
    %53 = tpu.matmul %51, %52, %cst_44 {dimension_numbers = #tpu.dot_dimension_numbers<[1], [0], [0], [1], [0, 0, 1, 1], [], []>} : vector<128x4xf32>, vector<4x8xf32>, vector<128x8xf32> -> vector<128x8xf32>
    %54 = arith.addf %49, %53 : vector<128x8xf32>
    %c0_45 = arith.constant 0 : index
    %c0_46 = arith.constant 0 : index
    %55 = vector.load %arg3[%c0_45, %c0_46] : memref<384x1xf32, #tpu.memory_space<vmem>>, vector<128x1xf32>
    %56 = vector.broadcast %55 : vector<128x1xf32> to vector<128x8xf32>
    %57 = arith.mulf %54, %56 : vector<128x8xf32>
    %c0_47 = arith.constant 0 : index
    %c48_48 = arith.constant 48 : index
    %c0_49 = arith.constant 0 : index
    %58 = vector.load %arg4[%c0_47, %c48_48, %c0_49] : memref<1x480x8xf32, #tpu.memory_space<vmem>>, vector<1x128x8xf32>
    %59 = vector.shape_cast %58 : vector<1x128x8xf32> to vector<128x8xf32>
    %60 = vector.shape_cast %57 : vector<128x8xf32> to vector<1x128x8xf32>
    tpu.vector_store %arg4[%c0_47, %c48_48, %c0_49], %60 {strides = array<i32>} : memref<1x480x8xf32, #tpu.memory_space<vmem>>, vector<1x128x8xf32>,
    %cst_50 = arith.constant dense<0.000000e+00> : vector<8xf32>
    %61 = vector.multi_reduction <add>, %57, %cst_50 [0] : vector<128x8xf32> to vector<8xf32>
    %62 = vector.shape_cast %61 : vector<8xf32> to vector<1x8xf32>
    %63 = arith.addf %7, %62 : vector<1x8xf32>
    %64 = arith.mulf %57, %57 : vector<128x8xf32>
    %cst_51 = arith.constant dense<0.000000e+00> : vector<8xf32>
    %65 = vector.multi_reduction <add>, %64, %cst_51 [0] : vector<128x8xf32> to vector<8xf32>
    %66 = vector.shape_cast %65 : vector<8xf32> to vector<1x8xf32>
    %67 = arith.addf %8, %66 : vector<1x8xf32>
    %cst_52 = arith.constant 0.000000e+00 : f32
    %68 = vector.broadcast %cst_52 : f32 to vector<128x8xf32>
    %c0_53 = arith.constant 0 : index
    %c151 = arith.constant 151 : index
    %c0_54 = arith.constant 0 : index
    %69 = vector.load %arg1[%c0_53, %c151, %c0_54] : memref<1x480x4xf32, #tpu.memory_space<vmem>>, vector<1x128x4xf32>
    %70 = vector.shape_cast %69 : vector<1x128x4xf32> to vector<128x4xf32>
    %c0_55 = arith.constant 0 : index
    %c0_56 = arith.constant 0 : index
    %71 = vector.load %arg2[%c0_55, %c0_56] : memref<36x8xf32, #tpu.memory_space<vmem>>, vector<4x8xf32>
    %cst_57 = arith.constant dense<0.000000e+00> : vector<128x8xf32>
    %72 = tpu.matmul %70, %71, %cst_57 {dimension_numbers = #tpu.dot_dimension_numbers<[1], [0], [0], [1], [0, 0, 1, 1], [], []>} : vector<128x4xf32>, vector<4x8xf32>, vector<128x8xf32> -> vector<128x8xf32>
    %73 = arith.addf %68, %72 : vector<128x8xf32>
    %c0_58 = arith.constant 0 : index
    %c152 = arith.constant 152 : index
    %c0_59 = arith.constant 0 : index
    %74 = vector.load %arg1[%c0_58, %c152, %c0_59] : memref<1x480x4xf32, #tpu.memory_space<vmem>>, vector<1x128x4xf32>
    %75 = vector.shape_cast %74 : vector<1x128x4xf32> to vector<128x4xf32>
    %c4_60 = arith.constant 4 : index
    %c0_61 = arith.constant 0 : index
    %76 = vector.load %arg2[%c4_60, %c0_61] : memref<36x8xf32, #tpu.memory_space<vmem>>, vector<4x8xf32>
    %cst_62 = arith.constant dense<0.000000e+00> : vector<128x8xf32>
    %77 = tpu.matmul %75, %76, %cst_62 {dimension_numbers = #tpu.dot_dimension_numbers<[1], [0], [0], [1], [0, 0, 1, 1], [], []>} : vector<128x4xf32>, vector<4x8xf32>, vector<128x8xf32> -> vector<128x8xf32>
    %78 = arith.addf %73, %77 : vector<128x8xf32>
    %c0_63 = arith.constant 0 : index
    %c153 = arith.constant 153 : index
    %c0_64 = arith.constant 0 : index
    %79 = vector.load %arg1[%c0_63, %c153, %c0_64] : memref<1x480x4xf32, #tpu.memory_space<vmem>>, vector<1x128x4xf32>
    %80 = vector.shape_cast %79 : vector<1x128x4xf32> to vector<128x4xf32>
    %c8_65 = arith.constant 8 : index
    %c0_66 = arith.constant 0 : index
    %81 = vector.load %arg2[%c8_65, %c0_66] : memref<36x8xf32, #tpu.memory_space<vmem>>, vector<4x8xf32>
    %cst_67 = arith.constant dense<0.000000e+00> : vector<128x8xf32>
    %82 = tpu.matmul %80, %81, %cst_67 {dimension_numbers = #tpu.dot_dimension_numbers<[1], [0], [0], [1], [0, 0, 1, 1], [], []>} : vector<128x4xf32>, vector<4x8xf32>, vector<128x8xf32> -> vector<128x8xf32>
    %83 = arith.addf %78, %82 : vector<128x8xf32>
    %c0_68 = arith.constant 0 : index
    %c175 = arith.constant 175 : index
    %c0_69 = arith.constant 0 : index
    %84 = vector.load %arg1[%c0_68, %c175, %c0_69] : memref<1x480x4xf32, #tpu.memory_space<vmem>>, vector<1x128x4xf32>
    %85 = vector.shape_cast %84 : vector<1x128x4xf32> to vector<128x4xf32>
    %c12_70 = arith.constant 12 : index
    %c0_71 = arith.constant 0 : index
    %86 = vector.load %arg2[%c12_70, %c0_71] : memref<36x8xf32, #tpu.memory_space<vmem>>, vector<4x8xf32>
    %cst_72 = arith.constant dense<0.000000e+00> : vector<128x8xf32>
    %87 = tpu.matmul %85, %86, %cst_72 {dimension_numbers = #tpu.dot_dimension_numbers<[1], [0], [0], [1], [0, 0, 1, 1], [], []>} : vector<128x4xf32>, vector<4x8xf32>, vector<128x8xf32> -> vector<128x8xf32>
    %88 = arith.addf %83, %87 : vector<128x8xf32>
    %c0_73 = arith.constant 0 : index
    %c176 = arith.constant 176 : index
    %c0_74 = arith.constant 0 : index
    %89 = vector.load %arg1[%c0_73, %c176, %c0_74] : memref<1x480x4xf32, #tpu.memory_space<vmem>>, vector<1x128x4xf32>
    %90 = vector.shape_cast %89 : vector<1x128x4xf32> to vector<128x4xf32>
    %c16_75 = arith.constant 16 : index
    %c0_76 = arith.constant 0 : index
    %91 = vector.load %arg2[%c16_75, %c0_76] : memref<36x8xf32, #tpu.memory_space<vmem>>, vector<4x8xf32>
    %cst_77 = arith.constant dense<0.000000e+00> : vector<128x8xf32>
    %92 = tpu.matmul %90, %91, %cst_77 {dimension_numbers = #tpu.dot_dimension_numbers<[1], [0], [0], [1], [0, 0, 1, 1], [], []>} : vector<128x4xf32>, vector<4x8xf32>, vector<128x8xf32> -> vector<128x8xf32>
    %93 = arith.addf %88, %92 : vector<128x8xf32>
    %c0_78 = arith.constant 0 : index
    %c177 = arith.constant 177 : index
    %c0_79 = arith.constant 0 : index
    %94 = vector.load %arg1[%c0_78, %c177, %c0_79] : memref<1x480x4xf32, #tpu.memory_space<vmem>>, vector<1x128x4xf32>
    %95 = vector.shape_cast %94 : vector<1x128x4xf32> to vector<128x4xf32>
    %c20_80 = arith.constant 20 : index
    %c0_81 = arith.constant 0 : index
    %96 = vector.load %arg2[%c20_80, %c0_81] : memref<36x8xf32, #tpu.memory_space<vmem>>, vector<4x8xf32>
    %cst_82 = arith.constant dense<0.000000e+00> : vector<128x8xf32>
    %97 = tpu.matmul %95, %96, %cst_82 {dimension_numbers = #tpu.dot_dimension_numbers<[1], [0], [0], [1], [0, 0, 1, 1], [], []>} : vector<128x4xf32>, vector<4x8xf32>, vector<128x8xf32> -> vector<128x8xf32>
    %98 = arith.addf %93, %97 : vector<128x8xf32>
    %c0_83 = arith.constant 0 : index
    %c199 = arith.constant 199 : index
    %c0_84 = arith.constant 0 : index
    %99 = vector.load %arg1[%c0_83, %c199, %c0_84] : memref<1x480x4xf32, #tpu.memory_space<vmem>>, vector<1x128x4xf32>
    %100 = vector.shape_cast %99 : vector<1x128x4xf32> to vector<128x4xf32>
    %c24_85 = arith.constant 24 : index
    %c0_86 = arith.constant 0 : index
    %101 = vector.load %arg2[%c24_85, %c0_86] : memref<36x8xf32, #tpu.memory_space<vmem>>, vector<4x8xf32>
    %cst_87 = arith.constant dense<0.000000e+00> : vector<128x8xf32>
    %102 = tpu.matmul %100, %101, %cst_87 {dimension_numbers = #tpu.dot_dimension_numbers<[1], [0], [0], [1], [0, 0, 1, 1], [], []>} : vector<128x4xf32>, vector<4x8xf32>, vector<128x8xf32> -> vector<128x8xf32>
    %103 = arith.addf %98, %102 : vector<128x8xf32>
    %c0_88 = arith.constant 0 : index
    %c200 = arith.constant 200 : index
    %c0_89 = arith.constant 0 : index
    %104 = vector.load %arg1[%c0_88, %c200, %c0_89] : memref<1x480x4xf32, #tpu.memory_space<vmem>>, vector<1x128x4xf32>
    %105 = vector.shape_cast %104 : vector<1x128x4xf32> to vector<128x4xf32>
    %c28_90 = arith.constant 28 : index
    %c0_91 = arith.constant 0 : index
    %106 = vector.load %arg2[%c28_90, %c0_91] : memref<36x8xf32, #tpu.memory_space<vmem>>, vector<4x8xf32>
    %cst_92 = arith.constant dense<0.000000e+00> : vector<128x8xf32>
    %107 = tpu.matmul %105, %106, %cst_92 {dimension_numbers = #tpu.dot_dimension_numbers<[1], [0], [0], [1], [0, 0, 1, 1], [], []>} : vector<128x4xf32>, vector<4x8xf32>, vector<128x8xf32> -> vector<128x8xf32>
    %108 = arith.addf %103, %107 : vector<128x8xf32>
    %c0_93 = arith.constant 0 : index
    %c201 = arith.constant 201 : index
    %c0_94 = arith.constant 0 : index
    %109 = vector.load %arg1[%c0_93, %c201, %c0_94] : memref<1x480x4xf32, #tpu.memory_space<vmem>>, vector<1x128x4xf32>
    %110 = vector.shape_cast %109 : vector<1x128x4xf32> to vector<128x4xf32>
    %c32_95 = arith.constant 32 : index
    %c0_96 = arith.constant 0 : index
    %111 = vector.load %arg2[%c32_95, %c0_96] : memref<36x8xf32, #tpu.memory_space<vmem>>, vector<4x8xf32>
    %cst_97 = arith.constant dense<0.000000e+00> : vector<128x8xf32>
    %112 = tpu.matmul %110, %111, %cst_97 {dimension_numbers = #tpu.dot_dimension_numbers<[1], [0], [0], [1], [0, 0, 1, 1], [], []>} : vector<128x4xf32>, vector<4x8xf32>, vector<128x8xf32> -> vector<128x8xf32>
    %113 = arith.addf %108, %112 : vector<128x8xf32>
    %c128 = arith.constant 128 : index
    %c0_98 = arith.constant 0 : index
    %114 = vector.load %arg3[%c128, %c0_98] : memref<384x1xf32, #tpu.memory_space<vmem>>, vector<128x1xf32>
    %115 = vector.broadcast %114 : vector<128x1xf32> to vector<128x8xf32>
    %116 = arith.mulf %113, %115 : vector<128x8xf32>
    %c0_99 = arith.constant 0 : index
    %c176_100 = arith.constant 176 : index
    %c0_101 = arith.constant 0 : index
    %117 = vector.load %arg4[%c0_99, %c176_100, %c0_101] : memref<1x480x8xf32, #tpu.memory_space<vmem>>, vector<1x128x8xf32>
    %118 = vector.shape_cast %117 : vector<1x128x8xf32> to vector<128x8xf32>
    %119 = vector.shape_cast %116 : vector<128x8xf32> to vector<1x128x8xf32>
    tpu.vector_store %arg4[%c0_99, %c176_100, %c0_101], %119 {strides = array<i32>} : memref<1x480x8xf32, #tpu.memory_space<vmem>>, vector<1x128x8xf32>,
    %cst_102 = arith.constant dense<0.000000e+00> : vector<8xf32>
    %120 = vector.multi_reduction <add>, %116, %cst_102 [0] : vector<128x8xf32> to vector<8xf32>
    %121 = vector.shape_cast %120 : vector<8xf32> to vector<1x8xf32>
    %122 = arith.addf %63, %121 : vector<1x8xf32>
    %123 = arith.mulf %116, %116 : vector<128x8xf32>
    %cst_103 = arith.constant dense<0.000000e+00> : vector<8xf32>
    %124 = vector.multi_reduction <add>, %123, %cst_103 [0] : vector<128x8xf32> to vector<8xf32>
    %125 = vector.shape_cast %124 : vector<8xf32> to vector<1x8xf32>
    %126 = arith.addf %67, %125 : vector<1x8xf32>
    %cst_104 = arith.constant 0.000000e+00 : f32
    %127 = vector.broadcast %cst_104 : f32 to vector<128x8xf32>
    %c0_105 = arith.constant 0 : index
    %c279 = arith.constant 279 : index
    %c0_106 = arith.constant 0 : index
    %128 = vector.load %arg1[%c0_105, %c279, %c0_106] : memref<1x480x4xf32, #tpu.memory_space<vmem>>, vector<1x128x4xf32>
    %129 = vector.shape_cast %128 : vector<1x128x4xf32> to vector<128x4xf32>
    %c0_107 = arith.constant 0 : index
    %c0_108 = arith.constant 0 : index
    %130 = vector.load %arg2[%c0_107, %c0_108] : memref<36x8xf32, #tpu.memory_space<vmem>>, vector<4x8xf32>
    %cst_109 = arith.constant dense<0.000000e+00> : vector<128x8xf32>
    %131 = tpu.matmul %129, %130, %cst_109 {dimension_numbers = #tpu.dot_dimension_numbers<[1], [0], [0], [1], [0, 0, 1, 1], [], []>} : vector<128x4xf32>, vector<4x8xf32>, vector<128x8xf32> -> vector<128x8xf32>
    %132 = arith.addf %127, %131 : vector<128x8xf32>
    %c0_110 = arith.constant 0 : index
    %c280 = arith.constant 280 : index
    %c0_111 = arith.constant 0 : index
    %133 = vector.load %arg1[%c0_110, %c280, %c0_111] : memref<1x480x4xf32, #tpu.memory_space<vmem>>, vector<1x128x4xf32>
    %134 = vector.shape_cast %133 : vector<1x128x4xf32> to vector<128x4xf32>
    %c4_112 = arith.constant 4 : index
    %c0_113 = arith.constant 0 : index
    %135 = vector.load %arg2[%c4_112, %c0_113] : memref<36x8xf32, #tpu.memory_space<vmem>>, vector<4x8xf32>
    %cst_114 = arith.constant dense<0.000000e+00> : vector<128x8xf32>
    %136 = tpu.matmul %134, %135, %cst_114 {dimension_numbers = #tpu.dot_dimension_numbers<[1], [0], [0], [1], [0, 0, 1, 1], [], []>} : vector<128x4xf32>, vector<4x8xf32>, vector<128x8xf32> -> vector<128x8xf32>
    %137 = arith.addf %132, %136 : vector<128x8xf32>
    %c0_115 = arith.constant 0 : index
    %c281 = arith.constant 281 : index
    %c0_116 = arith.constant 0 : index
    %138 = vector.load %arg1[%c0_115, %c281, %c0_116] : memref<1x480x4xf32, #tpu.memory_space<vmem>>, vector<1x128x4xf32>
    %139 = vector.shape_cast %138 : vector<1x128x4xf32> to vector<128x4xf32>
    %c8_117 = arith.constant 8 : index
    %c0_118 = arith.constant 0 : index
    %140 = vector.load %arg2[%c8_117, %c0_118] : memref<36x8xf32, #tpu.memory_space<vmem>>, vector<4x8xf32>
    %cst_119 = arith.constant dense<0.000000e+00> : vector<128x8xf32>
    %141 = tpu.matmul %139, %140, %cst_119 {dimension_numbers = #tpu.dot_dimension_numbers<[1], [0], [0], [1], [0, 0, 1, 1], [], []>} : vector<128x4xf32>, vector<4x8xf32>, vector<128x8xf32> -> vector<128x8xf32>
    %142 = arith.addf %137, %141 : vector<128x8xf32>
    %c0_120 = arith.constant 0 : index
    %c303 = arith.constant 303 : index
    %c0_121 = arith.constant 0 : index
    %143 = vector.load %arg1[%c0_120, %c303, %c0_121] : memref<1x480x4xf32, #tpu.memory_space<vmem>>, vector<1x128x4xf32>
    %144 = vector.shape_cast %143 : vector<1x128x4xf32> to vector<128x4xf32>
    %c12_122 = arith.constant 12 : index
    %c0_123 = arith.constant 0 : index
    %145 = vector.load %arg2[%c12_122, %c0_123] : memref<36x8xf32, #tpu.memory_space<vmem>>, vector<4x8xf32>
    %cst_124 = arith.constant dense<0.000000e+00> : vector<128x8xf32>
    %146 = tpu.matmul %144, %145, %cst_124 {dimension_numbers = #tpu.dot_dimension_numbers<[1], [0], [0], [1], [0, 0, 1, 1], [], []>} : vector<128x4xf32>, vector<4x8xf32>, vector<128x8xf32> -> vector<128x8xf32>
    %147 = arith.addf %142, %146 : vector<128x8xf32>
    %c0_125 = arith.constant 0 : index
    %c304 = arith.constant 304 : index
    %c0_126 = arith.constant 0 : index
    %148 = vector.load %arg1[%c0_125, %c304, %c0_126] : memref<1x480x4xf32, #tpu.memory_space<vmem>>, vector<1x128x4xf32>
    %149 = vector.shape_cast %148 : vector<1x128x4xf32> to vector<128x4xf32>
    %c16_127 = arith.constant 16 : index
    %c0_128 = arith.constant 0 : index
    %150 = vector.load %arg2[%c16_127, %c0_128] : memref<36x8xf32, #tpu.memory_space<vmem>>, vector<4x8xf32>
    %cst_129 = arith.constant dense<0.000000e+00> : vector<128x8xf32>
    %151 = tpu.matmul %149, %150, %cst_129 {dimension_numbers = #tpu.dot_dimension_numbers<[1], [0], [0], [1], [0, 0, 1, 1], [], []>} : vector<128x4xf32>, vector<4x8xf32>, vector<128x8xf32> -> vector<128x8xf32>
    %152 = arith.addf %147, %151 : vector<128x8xf32>
    %c0_130 = arith.constant 0 : index
    %c305 = arith.constant 305 : index
    %c0_131 = arith.constant 0 : index
    %153 = vector.load %arg1[%c0_130, %c305, %c0_131] : memref<1x480x4xf32, #tpu.memory_space<vmem>>, vector<1x128x4xf32>
    %154 = vector.shape_cast %153 : vector<1x128x4xf32> to vector<128x4xf32>
    %c20_132 = arith.constant 20 : index
    %c0_133 = arith.constant 0 : index
    %155 = vector.load %arg2[%c20_132, %c0_133] : memref<36x8xf32, #tpu.memory_space<vmem>>, vector<4x8xf32>
    %cst_134 = arith.constant dense<0.000000e+00> : vector<128x8xf32>
    %156 = tpu.matmul %154, %155, %cst_134 {dimension_numbers = #tpu.dot_dimension_numbers<[1], [0], [0], [1], [0, 0, 1, 1], [], []>} : vector<128x4xf32>, vector<4x8xf32>, vector<128x8xf32> -> vector<128x8xf32>
    %157 = arith.addf %152, %156 : vector<128x8xf32>
    %c0_135 = arith.constant 0 : index
    %c327 = arith.constant 327 : index
    %c0_136 = arith.constant 0 : index
    %158 = vector.load %arg1[%c0_135, %c327, %c0_136] : memref<1x480x4xf32, #tpu.memory_space<vmem>>, vector<1x128x4xf32>
    %159 = vector.shape_cast %158 : vector<1x128x4xf32> to vector<128x4xf32>
    %c24_137 = arith.constant 24 : index
    %c0_138 = arith.constant 0 : index
    %160 = vector.load %arg2[%c24_137, %c0_138] : memref<36x8xf32, #tpu.memory_space<vmem>>, vector<4x8xf32>
    %cst_139 = arith.constant dense<0.000000e+00> : vector<128x8xf32>
    %161 = tpu.matmul %159, %160, %cst_139 {dimension_numbers = #tpu.dot_dimension_numbers<[1], [0], [0], [1], [0, 0, 1, 1], [], []>} : vector<128x4xf32>, vector<4x8xf32>, vector<128x8xf32> -> vector<128x8xf32>
    %162 = arith.addf %157, %161 : vector<128x8xf32>
    %c0_140 = arith.constant 0 : index
    %c328 = arith.constant 328 : index
    %c0_141 = arith.constant 0 : index
    %163 = vector.load %arg1[%c0_140, %c328, %c0_141] : memref<1x480x4xf32, #tpu.memory_space<vmem>>, vector<1x128x4xf32>
    %164 = vector.shape_cast %163 : vector<1x128x4xf32> to vector<128x4xf32>
    %c28_142 = arith.constant 28 : index
    %c0_143 = arith.constant 0 : index
    %165 = vector.load %arg2[%c28_142, %c0_143] : memref<36x8xf32, #tpu.memory_space<vmem>>, vector<4x8xf32>
    %cst_144 = arith.constant dense<0.000000e+00> : vector<128x8xf32>
    %166 = tpu.matmul %164, %165, %cst_144 {dimension_numbers = #tpu.dot_dimension_numbers<[1], [0], [0], [1], [0, 0, 1, 1], [], []>} : vector<128x4xf32>, vector<4x8xf32>, vector<128x8xf32> -> vector<128x8xf32>
    %167 = arith.addf %162, %166 : vector<128x8xf32>
    %c0_145 = arith.constant 0 : index
    %c329 = arith.constant 329 : index
    %c0_146 = arith.constant 0 : index
    %168 = vector.load %arg1[%c0_145, %c329, %c0_146] : memref<1x480x4xf32, #tpu.memory_space<vmem>>, vector<1x128x4xf32>
    %169 = vector.shape_cast %168 : vector<1x128x4xf32> to vector<128x4xf32>
    %c32_147 = arith.constant 32 : index
    %c0_148 = arith.constant 0 : index
    %170 = vector.load %arg2[%c32_147, %c0_148] : memref<36x8xf32, #tpu.memory_space<vmem>>, vector<4x8xf32>
    %cst_149 = arith.constant dense<0.000000e+00> : vector<128x8xf32>
    %171 = tpu.matmul %169, %170, %cst_149 {dimension_numbers = #tpu.dot_dimension_numbers<[1], [0], [0], [1], [0, 0, 1, 1], [], []>} : vector<128x4xf32>, vector<4x8xf32>, vector<128x8xf32> -> vector<128x8xf32>
    %172 = arith.addf %167, %171 : vector<128x8xf32>
    %c256 = arith.constant 256 : index
    %c0_150 = arith.constant 0 : index
    %173 = vector.load %arg3[%c256, %c0_150] : memref<384x1xf32, #tpu.memory_space<vmem>>, vector<128x1xf32>
    %174 = vector.broadcast %173 : vector<128x1xf32> to vector<128x8xf32>
    %175 = arith.mulf %172, %174 : vector<128x8xf32>
    %c0_151 = arith.constant 0 : index
    %c304_152 = arith.constant 304 : index
    %c0_153 = arith.constant 0 : index
    %176 = vector.load %arg4[%c0_151, %c304_152, %c0_153] : memref<1x480x8xf32, #tpu.memory_space<vmem>>, vector<1x128x8xf32>
    %177 = vector.shape_cast %176 : vector<1x128x8xf32> to vector<128x8xf32>
    %178 = vector.shape_cast %175 : vector<128x8xf32> to vector<1x128x8xf32>
    tpu.vector_store %arg4[%c0_151, %c304_152, %c0_153], %178 {strides = array<i32>} : memref<1x480x8xf32, #tpu.memory_space<vmem>>, vector<1x128x8xf32>,
    %cst_154 = arith.constant dense<0.000000e+00> : vector<8xf32>
    %179 = vector.multi_reduction <add>, %175, %cst_154 [0] : vector<128x8xf32> to vector<8xf32>
    %180 = vector.shape_cast %179 : vector<8xf32> to vector<1x8xf32>
    %181 = arith.addf %122, %180 : vector<1x8xf32>
    %182 = arith.mulf %175, %175 : vector<128x8xf32>
    %cst_155 = arith.constant dense<0.000000e+00> : vector<8xf32>
    %183 = vector.multi_reduction <add>, %182, %cst_155 [0] : vector<128x8xf32> to vector<8xf32>
    %184 = vector.shape_cast %183 : vector<8xf32> to vector<1x8xf32>
    %185 = arith.addf %126, %184 : vector<1x8xf32>
    %c0_156 = arith.constant 0 : index
    %c0_157 = arith.constant 0 : index
    %c0_158 = arith.constant 0 : index
    %186 = vector.load %arg5[%c0_156, %c0_157, %c0_158] : memref<1x1x8xf32, #tpu.memory_space<vmem>>, vector<1x1x8xf32>
    %187 = vector.shape_cast %186 : vector<1x1x8xf32> to vector<1x8xf32>
    %188 = vector.shape_cast %181 : vector<1x8xf32> to vector<1x1x8xf32>
    tpu.vector_store %arg5[%c0_156, %c0_157, %c0_158], %188 {strides = array<i32>} : memref<1x1x8xf32, #tpu.memory_space<vmem>>, vector<1x1x8xf32>,
    %c0_159 = arith.constant 0 : index
    %c0_160 = arith.constant 0 : index
    %c0_161 = arith.constant 0 : index
    %189 = vector.load %arg6[%c0_159, %c0_160, %c0_161] : memref<1x1x8xf32, #tpu.memory_space<vmem>>, vector<1x1x8xf32>
    %190 = vector.shape_cast %189 : vector<1x1x8xf32> to vector<1x8xf32>
    %191 = vector.shape_cast %185 : vector<1x8xf32> to vector<1x1x8xf32>
    tpu.vector_store %arg6[%c0_159, %c0_160, %c0_161], %191 {strides = array<i32>} : memref<1x1x8xf32, #tpu.memory_space<vmem>>, vector<1x1x8xf32>,
    return
  }
  func.func @transform_0(%arg0: i32) -> (i32, i32, i32) {
    %c0_i32 = arith.constant 0 : i32
    %c0_i32_0 = arith.constant 0 : i32
    %c0_i32_1 = arith.constant 0 : i32
    return %arg0, %c0_i32, %c0_i32_0 : i32, i32, i32
  }
  func.func @transform_1(%arg0: i32) -> (i32, i32) {
    %c0_i32 = arith.constant 0 : i32
    %c0_i32_0 = arith.constant 0 : i32
    %c0_i32_1 = arith.constant 0 : i32
    return %c0_i32, %c0_i32_0 : i32, i32
  }
  func.func @transform_2(%arg0: i32) -> (i32, i32) {
    %c0_i32 = arith.constant 0 : i32
    %c0_i32_0 = arith.constant 0 : i32
    %c0_i32_1 = arith.constant 0 : i32
    return %c0_i32, %c0_i32_0 : i32, i32
  }
  func.func @transform_3(%arg0: i32) -> (i32, i32, i32) {
    %c0_i32 = arith.constant 0 : i32
    %c0_i32_0 = arith.constant 0 : i32
    %c0_i32_1 = arith.constant 0 : i32
    return %arg0, %c0_i32, %c0_i32_0 : i32, i32, i32
  }
  func.func @transform_4(%arg0: i32) -> (i32, i32, i32) {
    %c0_i32 = arith.constant 0 : i32
    %c0_i32_0 = arith.constant 0 : i32
    %c0_i32_1 = arith.constant 0 : i32
    return %arg0, %c0_i32, %c0_i32_0 : i32, i32, i32
  }
  func.func @transform_5(%arg0: i32) -> (i32, i32, i32) {
    %c0_i32 = arith.constant 0 : i32
    %c0_i32_0 = arith.constant 0 : i32
    %c0_i32_1 = arith.constant 0 : i32
    return %arg0, %c0_i32, %c0_i32_0 : i32, i32, i32
  }
}

</mosaic_0001>

<bundles_post_ra>
// kernel: tpu_custom_call.1
= control target key start
LH: loop header
LB: loop body
LE: loop exit
PB: predicated region body
PF: predicated region fallthrough
CT: control target
= control target key end

     0   :  { %11 = vsyncpa [#allocation3], 0  ;;  %s7896_s0 = inlined_call_operand.vmem [shape: f32[2,480,4], index: 0, kind: input, shape index: {}]   ;;  %s7897_s1 = inlined_call_operand.vmem [shape: f32[36,8], index: 1, kind: input, shape index: {}]   ;;  %s7898_s2 = inlined_call_operand.vmem [shape: f32[384,1], index: 2, kind: input, shape index: {}]   ;;  %s7899_s3 = inlined_call_operand.vmem [shape: f32[2,480,8], index: 3, kind: output, shape index: {0}]   ;;  %s7900_s4 = inlined_call_operand.hbm [shape: f32[2,1,8], index: 4, kind: output, shape index: {1}]   ;;  %s7901_s5 = inlined_call_operand.hbm [shape: f32[2,1,8], index: 5, kind: output, shape index: {2}]  }
   0x1   :  { %13 = vsyncpa [#allocation3 + $0x1], 0 }
   0x2   :  { %14 = vsyncpa [#allocation5], 0 }
   0x3   :  { %16 = vsyncpa [#allocation5 + $0x1], 0  ;;  %s5643_s18 = smov 0   ;;  %s5645_s19 = smov 0  }
   0x4   :  { %s5647_s20 = smov 0   ;;  %s5649_s21 = smov 0  }
   0x5 LB: > { %s5664_s22 = sadd.s32 4294967295, %s5609_s21   ;;  %s4995_s23 = sadd.s32 4294967294, %s5609_s21   ;;  %s5609_s21 = sphi %s5649_s21, %s7955_s21   ;;  %s5605_s20 = sphi %s5647_s20, %s7954_s20   ;;  %s5601_s19 = sphi %s5645_s19, %s7953_s19   ;;  %s5597_s18 = sphi %s5643_s18, %s7952_s18  }
   0x6   : > { %s5668_s24 = sadd.s32 1, %s5609_s21   ;;  %s123_s25 = sadd.s32 1, %s5605_s20 }
   0x7   : > { %s120_s26 = ssub.s32 %s5609_s21, %s5668_s24  ;;  %p133_p0 = scmp.ne.s32.totalorder %s5605_s20, %s5601_s19 }
   0x8   : > { %p121_p1 = scmp.eq.s32.totalorder %s120_s26, 0  ;;  %p134_p2 = scmp.eq.s32.totalorder %s5664_s22, 1 }
   0x9   : > { %p139_p3 = scmp.ne.s32.totalorder %s5601_s19, %s5597_s18  ;;  %p140_p4 = scmp.eq.s32.totalorder %s4995_s23, 1 }
   0xa   : > { %s5679_s27 = scalar_select %p121_p1, %s5605_s20, %s123_s25  }
   0xb   : > { %p5681_p5 = por %p134_p2, %p133_p0  ;;  %p5685_p6 = por %p140_p4, %p139_p3 }
   0xc   : > { %p4998_p7 = scmp.ge.s32.totalorder %s5609_s21, 1  ;;  %p198_p8 = scmp.lt.s32.totalorder %s5609_s21, 3 }
   0xe   : > { %p199_p9 = pnand %p4998_p7, %p198_p8 }
  0x10   : > { %202 = sbr.rel (%p199_p9) target bundleno = 1059 (0x423), region = 32 }
  0x15   : > { %v290_v0 = vld [vmem:[%s7897_s1 + $0x4] sm:$0xf]  ;;  %vm340_vm0 = vcmask 1043456   ;;  %p234_p10 = scmp.lt.s32.totalorder %s5664_s22, 1  ;;  %v273_v1 = vld [vmem:[%s7897_s1] sm:$0xf]  ;;  %s4870_s10 = scalar_lea.hbm %s7900_s4, %s5664_s22 }
  0x16   : > { %5462 = vmatpush.msk.msra.mxu3 %vm340_vm0, %v290_v0  ;;  %v541_v2 = vld [vmem:[%s7897_s1 + $0x8] sm:$0xf]  ;;  %v1137_v3 = vld [vmem:[%s7897_s1 + $0x18] sm:$0xf]  ;;  %5001 = vmatpush.msk.msra.mxu0 %vm340_vm0, %v290_v0  ;;  %v839_v4 = vld [vmem:[%s7897_s1 + $0x10] sm:$0xf]  ;;  %s4883_s14 = scalar_lea.hbm %s7901_s5, %s5664_s22 }
  0x17   : > { %s5707_s13 = scalar_select %p234_p10, %s5664_s22, 1  ;;  %5035 = vmatpush.msk.msra.mxu2 %vm340_vm0, %v541_v2  ;;  %v988_v5 = vld [vmem:[%s7897_s1 + $0x14] sm:$0xf]  ;;  %5018 = vmatpush.msk.msra.mxu1 %vm340_vm0, %v273_v1  ;;  %vm291_vm1 = vcmask 31744   ;;  %v690_v26 = vld [vmem:[%s7897_s1 + $0xc] sm:$0xf] }
  0x18   : > { %5463 = vmatpush.msk.msrb.mxu3 %vm340_vm0, %v273_v1  ;;  %5069 = vmatpush.msk.msrb.mxu0 %vm340_vm0, %v839_v4  ;;  %v1286_v43 = vld [vmem:[%s7897_s1 + $0x1c] sm:$0xf]  ;;  %v1804_v44 = vld [vmem:[%s7897_s1] sm:$0xf]  ;;  %v1821_v50 = vld [vmem:[%s7897_s1 + $0x4] sm:$0xf] }
  0x19   : > { %5103 = vmatpush.msk.msrb.mxu2 %vm340_vm0, %v1137_v3  ;;  %s5465_s23 = smul.u32 480, %s5707_s13  ;;  %5086 = vmatpush.msk.msrb.mxu1 %vm340_vm0, %v988_v5  ;;  %v1435_v49 = vld [vmem:[%s7897_s1 + $0x20] sm:$0xf]  ;;  %vm244_vm2 = vcmask 64512   ;;  %s7836_s17 = sshll.u32 %s4870_s10, 4  ;;  %vm4846_vm3 = vcmask 57344   ;;  %s4875_s17 = int_to_ptr.hbm [resolvable:$true] %s7836_s17 }
  0x1a   : > { %s7841_s13 = sshll.u32 %s4883_s14, 4  ;;  %s4888_s13 = int_to_ptr.hbm [resolvable:$true] %s7841_s13 }
  0x1b   : > { %s5727_s30 = scalar_lea.vmem %s7896_s0, %s5465_s23  ;;  %s6487_s6 = scalar_lea.vmem %s7899_s3, %s5465_s23 }
  0x1c   : > { %v5730_v6 = vld [vmem:[%s5727_s30 + $0x78] sm:$0xff]  ;;  %v5742_v10 = vld [vmem:[%s5727_s30 + $0x80] sm:$0xff]  ;;  %v5753_v14 = vld [vmem:[%s5727_s30 + $0x88] sm:$0xff]  ;;  %s5529_s23 = sshra.s32 %s4875_s17, 4  ;;  %s5530_s23 = int_to_ptr.hbm [resolvable:$true] %s5529_s23 }
  0x1d   : > { %v525_v7 = vld [vmem:[%s5727_s30 + $0x19] sm:$0xff]  ;;  %5014 = vmatmul.msk.f32.vlgmr.msra.gmra.mxu3 %vm291_vm1, %v5730_v6  ;;  %v526_v11 = vld [vmem:[%s5727_s30 + $0x21] sm:$0xff]  ;;  %v527_v15 = vld [vmem:[%s5727_s30 + $0x29] sm:$0xff]  ;;  %s5531_s7 = scalar_lea.hbm %s5530_s23, 1  ;;  %p5536_p0 = scmp.lt.s32.totalorder %s5530_s23, %s7900_s4 }
  0x1e   : > { %v274_v8 = vld [vmem:[%s5727_s30 + $0x18] sm:$0xff]  ;;  %5036 = vmatmul.msk.f32.vlgmr.msra.gmra.mxu2 %vm291_vm1, %v525_v7  ;;  %5464 = vmatpush.msk.msra.mxu3 %vm340_vm0, %v541_v2  ;;  %v275_v12 = vld [vmem:[%s5727_s30 + $0x20] sm:$0xff]  ;;  %v276_v16 = vld [vmem:[%s5727_s30 + $0x28] sm:$0xff]  ;;  %p5532_p11 = scmp.ne.s32.totalorder %s5530_s23, %s5531_s7 }
  0x1f   : > { %v257_v9 = vld [vmem:[%s5727_s30 + $0x17] sm:$0xff]  ;;  %5002 = vmatmul.msk.f32.vlgmr.msra.gmra.mxu0 %vm291_vm1, %v274_v8  ;;  %v258_v13 = vld [vmem:[%s5727_s30 + $0x1f] sm:$0xff]  ;;  %v259_v17 = vld [vmem:[%s5727_s30 + $0x27] sm:$0xff]  ;;  %5171 = vmatpush.msk.msra.mxu2 %vm340_vm0, %v1804_v44 }
  0x20   : > { %5019 = vmatmul.msk.f32.vlgmr.msra.gmra.mxu1 %vm291_vm1, %v257_v9  ;;  %v5764_v18 = vld [vmem:[%s5727_s30 + $0x90] sm:$0xff]  ;;  %v5787_v23 = vld [vmem:[%s5727_s30 + $0x39] sm:$0xff]  ;;  %v5811_v28 = vld [vmem:[%s5727_s30 + $0x41] sm:$0xff]  ;;  %5137 = vmatpush.msk.msra.mxu0 %vm340_vm0, %v1435_v49  ;;  %p5533_p12 = pnand %p5532_p11, %p5681_p5 }
  0x21   : > { %7912 = vst [vmem:[#allocation8_spill] sm:$0xff] %v5764_v18  ;;  %v5767_v19 = vld [vmem:[%s5727_s30 + $0x31] sm:$0xff]  ;;  %v5808_v27 = vld [vmem:[%s5727_s30 + $0x7f] sm:$0xff]  ;;  %v5828_v31 = vld [vmem:[%s5727_s30 + $0x87] sm:$0xff]  ;;  %5154 = vmatpush.msk.msra.mxu1 %vm340_vm0, %v1821_v50 }
  0x22   : > { %v5770_v20 = vld [vmem:[%s5727_s30 + $0x30] sm:$0xff]  ;;  %v5790_v24 = vld [vmem:[%s5727_s30 + $0x38] sm:$0xff]  ;;  %v5814_v29 = vld [vmem:[%s5727_s30 + $0x40] sm:$0xff]  ;;  %p5534_p13 = pneg %p5533_p12 }
  0x23   : > { %v5773_v21 = vld [vmem:[%s5727_s30 + $0x2f] sm:$0xff]  ;;  %v5784_v22 = vld [vmem:[%s5727_s30 + $0x77] sm:$0xff]  ;;  %v5817_v30 = vld [vmem:[%s5727_s30 + $0x3f] sm:$0xff] }
  0x24   : > { %v5793_v25 = vld [vmem:[%s5727_s30 + $0x37] sm:$0xff]  ;;  %v5831_v32 = vld [vmem:[%s5727_s30 + $0x49] sm:$0xff]  ;;  %v5896_v45 = vld [vmem:[%s5727_s30 + $0x81] sm:$0xff] }
  0x25   : > { %5015 = vmatmul.msk.f32.gmra.mxu3 %vm291_vm1, %v5742_v10  ;;  %v5834_v33 = vld [vmem:[%s5727_s30 + $0x48] sm:$0xff]  ;;  %v5851_v36 = vld [vmem:[%s5727_s30 + $0x51] sm:$0xff]  ;;  %v5868_v39 = vld [vmem:[%s5727_s30 + $0x79] sm:$0xff] }
  0x26   : > { %5037 = vmatmul.msk.f32.gmra.mxu2 %vm291_vm1, %v526_v11  ;;  %v5837_v34 = vld [vmem:[%s5727_s30 + $0x47] sm:$0xff]  ;;  %v5848_v35 = vld [vmem:[%s5727_s30 + $0x8f] sm:$0xff]  ;;  %v5871_v40 = vld [vmem:[%s5727_s30 + $0x59] sm:$0xff] }
  0x27   : > { %5003 = vmatmul.msk.f32.gmra.mxu0 %vm291_vm1, %v275_v12  ;;  %v5854_v37 = vld [vmem:[%s5727_s30 + $0x50] sm:$0xff]  ;;  %v5874_v41 = vld [vmem:[%s5727_s30 + $0x58] sm:$0xff]  ;;  %v5899_v46 = vld [vmem:[%s5727_s30 + $0x61] sm:$0xff] }
  0x28   : > { %5020 = vmatmul.msk.f32.gmra.mxu1 %vm291_vm1, %v258_v13  ;;  %v5857_v38 = vld [vmem:[%s5727_s30 + $0x4f] sm:$0xff]  ;;  %v5877_v42 = vld [vmem:[%s5727_s30 + $0x57] sm:$0xff]  ;;  %v5902_v47 = vld [vmem:[%s5727_s30 + $0x60] sm:$0xff] }
  0x29   : > { %v266_v48 = vld [vmem:[%s5727_s30 + $0x5f] sm:$0xff]  ;;  %v5921_v51 = vld [vmem:[%s5727_s30 + $0x89] sm:$0xff]  ;;  %v5938_v55 = vld [vmem:[%s5727_s30 + $0x91] sm:$0xff] }
  0x2a   : > { %v5924_v52 = vld [vmem:[%s5727_s30 + $0x69] sm:$0xff]  ;;  %7913 = vst [vmem:[#allocation9_spill] sm:$0xff] %v5938_v55  ;;  %v5941_v56 = vld [vmem:[%s5727_s30 + $0x71] sm:$0xff] }
  0x2b   : > { %v5927_v53 = vld [vmem:[%s5727_s30 + $0x68] sm:$0xff]  ;;  %v5944_v57 = vld [vmem:[%s5727_s30 + $0x70] sm:$0xff] }
  0x2c   : > { %v267_v54 = vld [vmem:[%s5727_s30 + $0x67] sm:$0xff]  ;;  %v268_v58 = vld [vmem:[%s5727_s30 + $0x6f] sm:$0xff] }
  0x2d   : > { %5016 = vmatmul.msk.f32.gmra.mxu3 %vm291_vm1, %v5753_v14  ;;  %v6099_v49 = vld [vmem:[%s5727_s30 + $0xa7] sm:$0xff] }
  0x2e   : > { %5038 = vmatmul.msk.f32.gmra.mxu2 %vm291_vm1, %v527_v15 }
  0x2f   : > { %5004 = vmatmul.msk.f32.gmra.mxu0 %vm291_vm1, %v276_v16 }
  0x30   : > { %5021 = vmatmul.msk.f32.gmra.mxu1 %vm291_vm1, %v259_v17 }
  0x35   : > { %5017 = vmatmul.msk.f32.gmra.mxu3 %vm291_vm1, %v5764_v18 }
  0x36   : > { %5039 = vmatmul.msk.f32.gmra.mxu2 %vm291_vm1, %v5767_v19 }
  0x37   : > { %5005 = vmatmul.msk.f32.gmra.mxu0 %vm291_vm1, %v5770_v20 }
  0x38   : > { %5022 = vmatmul.msk.f32.gmra.mxu1 %vm291_vm1, %v5773_v21 }
  0x3d   : > { %5031 = vmatmul.msk.f32.vlgmr.msrb.gmra.mxu3 %vm291_vm1, %v5784_v22 }
  0x3e   : > { %5040 = vmatmul.msk.f32.gmra.mxu2 %vm291_vm1, %v5787_v23  ;;  %5052 = vmatpush.msk.msrb.mxu3 %vm340_vm0, %v690_v26  ;;  %v6065_v26 = vld [vmem:[%s5727_s30 + $0x97] sm:$0xff] }
  0x3f   : > { %5006 = vmatmul.msk.f32.gmra.mxu0 %vm291_vm1, %v5790_v24 }
  0x40   : > { %5023 = vmatmul.msk.f32.gmra.mxu1 %vm291_vm1, %v5793_v25 }
  0x45   : > { %5032 = vmatmul.msk.f32.gmra.mxu3 %vm291_vm1, %v5808_v27 }
  0x46   : > { %5041 = vmatmul.msk.f32.gmra.mxu2 %vm291_vm1, %v5811_v28 }
  0x47   : > { %5007 = vmatmul.msk.f32.gmra.mxu0 %vm291_vm1, %v5814_v29 }
  0x48   : > { %5024 = vmatmul.msk.f32.gmra.mxu1 %vm291_vm1, %v5817_v30 }
  0x4d   : > { %5033 = vmatmul.msk.f32.gmra.mxu3 %vm291_vm1, %v5828_v31 }
  0x4e   : > { %5042 = vmatmul.msk.f32.gmra.mxu2 %vm291_vm1, %v5831_v32 }
  0x4f   : > { %5008 = vmatmul.msk.f32.gmra.mxu0 %vm291_vm1, %v5834_v33 }
  0x50   : > { %5025 = vmatmul.msk.f32.gmra.mxu1 %vm291_vm1, %v5837_v34 }
  0x55   : > { %5034 = vmatmul.msk.f32.gmra.mxu3 %vm291_vm1, %v5848_v35 }
  0x56   : > { %5043 = vmatmul.msk.f32.gmra.mxu2 %vm291_vm1, %v5851_v36 }
  0x57   : > { %5009 = vmatmul.msk.f32.gmra.mxu0 %vm291_vm1, %v5854_v37 }
  0x58   : > { %5026 = vmatmul.msk.f32.gmra.mxu1 %vm291_vm1, %v5857_v38 }
  0x5d   : > { %5048 = vmatmul.msk.f32.vlgmr.msra.gmra.mxu3 %vm291_vm1, %v5868_v39 }
  0x5e   : > { %5044 = vmatmul.msk.f32.gmra.mxu2 %vm291_vm1, %v5871_v40  ;;  %5120 = vmatpush.msk.msra.mxu3 %vm340_vm0, %v1286_v43 }
  0x5f   : > { %5010 = vmatmul.msk.f32.gmra.mxu0 %vm291_vm1, %v5874_v41 }
  0x60   : > { %5027 = vmatmul.msk.f32.gmra.mxu1 %vm291_vm1, %v5877_v42 }
  0x65   : > { %5049 = vmatmul.msk.f32.gmra.mxu3 %vm291_vm1, %v5896_v45 }
  0x66   : > { %5045 = vmatmul.msk.f32.gmra.mxu2 %vm291_vm1, %v5899_v46 }
  0x67   : > { %5011 = vmatmul.msk.f32.gmra.mxu0 %vm291_vm1, %v5902_v47 }
  0x68   : > { %5028 = vmatmul.msk.f32.gmra.mxu1 %vm291_vm1, %v266_v48 }
  0x6d   : > { %5050 = vmatmul.msk.f32.gmra.mxu3 %vm291_vm1, %v5921_v51 }
  0x6e   : > { %5046 = vmatmul.msk.f32.gmra.mxu2 %vm291_vm1, %v5924_v52 }
  0x6f   : > { %5012 = vmatmul.msk.f32.gmra.mxu0 %vm291_vm1, %v5927_v53 }
  0x70   : > { %5029 = vmatmul.msk.f32.gmra.mxu1 %vm291_vm1, %v267_v54 }
  0x75   : > { %5051 = vmatmul.msk.f32.gmra.mxu3 %vm291_vm1, %v5938_v55 }
  0x76   : > { %5047 = vmatmul.msk.f32.gmra.mxu2 %vm291_vm1, %v5941_v56 }
  0x77   : > { %5013 = vmatmul.msk.f32.gmra.mxu0 %vm291_vm1, %v5944_v57 }
  0x78   : > { %5030 = vmatmul.msk.f32.gmra.mxu1 %vm291_vm1, %v268_v58 }
  0x7d   : > { %5053 = vmatmul.msk.f32.vlgmr.msrb.gmra.mxu3 %vm291_vm1, %v5773_v21 }
  0x7e   : > { %5104 = vmatmul.msk.f32.vlgmr.msrb.gmra.mxu2 %vm291_vm1, %v5837_v34 }
  0x7f   : > { %5070 = vmatmul.msk.f32.vlgmr.msrb.gmra.mxu0 %vm291_vm1, %v5770_v20 }
  0x80   : > { %5087 = vmatmul.msk.f32.vlgmr.msrb.gmra.mxu1 %vm291_vm1, %v5767_v19 }
  0x85   : > { %5054 = vmatmul.msk.f32.gmra.mxu3 %vm291_vm1, %v5793_v25 }
  0x86   : > { %5105 = vmatmul.msk.f32.gmra.mxu2 %vm291_vm1, %v5857_v38 }
  0x87   : > { %5071 = vmatmul.msk.f32.gmra.mxu0 %vm291_vm1, %v5790_v24 }
  0x88   : > { %5088 = vmatmul.msk.f32.gmra.mxu1 %vm291_vm1, %v5787_v23 }
  0x8d   : > { %5055 = vmatmul.msk.f32.gmra.mxu3 %vm291_vm1, %v5817_v30 }
  0x8e   : > { %5106 = vmatmul.msk.f32.gmra.mxu2 %vm291_vm1, %v5877_v42 }
  0x8f   : > { %5072 = vmatmul.msk.f32.gmra.mxu0 %vm291_vm1, %v5814_v29 }
  0x90   : > { %5089 = vmatmul.msk.f32.gmra.mxu1 %vm291_vm1, %v5811_v28 }
  0x95   : > { %5056 = vmatmul.msk.f32.gmra.mxu3 %vm291_vm1, %v5837_v34 }
  0x96   : > { %5107 = vmatmul.msk.f32.gmra.mxu2 %vm291_vm1, %v266_v48 }
  0x97   : > { %5073 = vmatmul.msk.f32.gmra.mxu0 %vm291_vm1, %v5834_v33 }
  0x98   : > { %5090 = vmatmul.msk.f32.gmra.mxu1 %vm291_vm1, %v5831_v32 }
  0x9c   : > { %v5985_v59 = vpop.f32.mrf.mxu0 }
  0x9d   : > { %v5987_v60 = vpop.f32.mrf.mxu1  ;;  %5057 = vmatmul.msk.f32.gmra.mxu3 %vm291_vm1, %v5857_v38  ;;  %v6082_v38 = vld [vmem:[%s5727_s30 + $0x9f] sm:$0xff] }
  0x9e   : > { %5108 = vmatmul.msk.f32.gmra.mxu2 %vm291_vm1, %v267_v54 }
  0x9f   : > { %5074 = vmatmul.msk.f32.gmra.mxu0 %vm291_vm1, %v5854_v37 }
  0xa0   : > { %5091 = vmatmul.msk.f32.gmra.mxu1 %vm291_vm1, %v5851_v36  ;;  %v397_v61 = vpop.f32.mrf.mxu3 }
  0xa1   : > { %v5996_v62 = vpop.f32.mrf.mxu2 }
  0xa4   : > { %v5998_v63 = vpop.f32.mrf.mxu0 }
  0xa5   : > { %v6000_v0 = vpop.f32.mrf.mxu1  ;;  %5058 = vmatmul.msk.f32.gmra.mxu3 %vm291_vm1, %v5877_v42 }
  0xa6   : > { %5109 = vmatmul.msk.f32.gmra.mxu2 %vm291_vm1, %v268_v58 }
  0xa7   : > { %5075 = vmatmul.msk.f32.gmra.mxu0 %vm291_vm1, %v5874_v41 }
  0xa8   : > { %5092 = vmatmul.msk.f32.gmra.mxu1 %vm291_vm1, %v5871_v40  ;;  %v400_v1 = vpop.f32.mrf.mxu3 }
  0xa9   : > { %v6009_v2 = vpop.f32.mrf.mxu2 }
  0xac   : > { %v6011_v3 = vpop.f32.mrf.mxu0 }
  0xad   : > { %v6013_v4 = vpop.f32.mrf.mxu1  ;;  %5059 = vmatmul.msk.f32.gmra.mxu3 %vm291_vm1, %v266_v48 }
  0xae   : > { %5110 = vmatmul.msk.f32.gmra.mxu2 %vm291_vm1, %v5784_v22 }
  0xaf   : > { %5076 = vmatmul.msk.f32.gmra.mxu0 %vm291_vm1, %v5902_v47 }
  0xb0   : > { %5093 = vmatmul.msk.f32.gmra.mxu1 %vm291_vm1, %v5899_v46  ;;  %v403_v5 = vpop.f32.mrf.mxu3 }
  0xb1   : > { %v6022_v7 = vpop.f32.mrf.mxu2 }
  0xb4   : > { %v6024_v8 = vpop.f32.mrf.mxu0 }
  0xb5   : > { %v6026_v9 = vpop.f32.mrf.mxu1  ;;  %5060 = vmatmul.msk.f32.gmra.mxu3 %vm291_vm1, %v267_v54  ;;  %v2070_v54 = vld [vmem:[%s7897_s1 + $0x8] sm:$0xf] }
  0xb6   : > { %5111 = vmatmul.msk.f32.gmra.mxu2 %vm291_vm1, %v5808_v27  ;;  %5188 = vmatpush.msk.msrb.mxu3 %vm340_vm0, %v2070_v54 }
  0xb7   : > { %5077 = vmatmul.msk.f32.gmra.mxu0 %vm291_vm1, %v5927_v53 }
  0xb8   : > { %5094 = vmatmul.msk.f32.gmra.mxu1 %vm291_vm1, %v5924_v52  ;;  %v406_v11 = vpop.f32.mrf.mxu3 }
  0xb9   : > { %v6035_v12 = vpop.f32.mrf.mxu2 }
  0xbc   : > { %v6037_v13 = vpop.f32.mrf.mxu0 }
  0xbd   : > { %v6039_v15 = vpop.f32.mrf.mxu1  ;;  %5061 = vmatmul.msk.f32.gmra.mxu3 %vm291_vm1, %v268_v58 }
  0xbe   : > { %5112 = vmatmul.msk.f32.gmra.mxu2 %vm291_vm1, %v5828_v31 }
  0xbf   : > { %5078 = vmatmul.msk.f32.gmra.mxu0 %vm291_vm1, %v5944_v57 }
  0xc0   : > { %5095 = vmatmul.msk.f32.gmra.mxu1 %vm291_vm1, %v5941_v56  ;;  %v513_v16 = vpop.f32.mrf.mxu3 }
  0xc1   : > { %v6048_v17 = vpop.f32.mrf.mxu2  ;;  %v514_v19 = vadd.f32 %v513_v16, %v397_v61  ;;  %v6129_v16 = vld [vmem:[%s5727_s30 + $0x98] sm:$0xff] }
  0xc4   : > { %v6050_v20 = vpop.f32.mrf.mxu0 }
  0xc5   : > { %v6052_v21 = vpop.f32.mrf.mxu1  ;;  %5062 = vmatmul.msk.f32.gmra.mxu3 %vm291_vm1, %v5784_v22 }
  0xc6   : > { %5113 = vmatmul.msk.f32.gmra.mxu2 %vm291_vm1, %v5848_v35 }
  0xc7   : > { %5079 = vmatmul.msk.f32.gmra.mxu0 %vm291_vm1, %v5730_v6 }
  0xc8   : > { %5096 = vmatmul.msk.f32.gmra.mxu1 %vm291_vm1, %v5868_v39  ;;  %v516_v23 = vpop.f32.mrf.mxu3 }
  0xc9   : > { %v6062_v24 = vpop.f32.mrf.mxu2  ;;  %v517_v25 = vadd.f32 %v516_v23, %v400_v1  ;;  %v6132_v23 = vld [vmem:[%s5727_s30 + $0x99] sm:$0xff] }
  0xca   : > { %7916 = vst [vmem:[#allocation12_spill] sm:$0xff] %v6132_v23 }
  0xcc   : > { %v6067_v28 = vpop.f32.mrf.mxu0 }
  0xcd   : > { %v6069_v29 = vpop.f32.mrf.mxu1  ;;  %5063 = vmatmul.msk.f32.gmra.mxu3 %vm291_vm1, %v5808_v27 }
  0xce   : > { %5114 = vmatmul.msk.f32.gmra.mxu2 %vm291_vm1, %v6065_v26 }
  0xcf   : > { %5080 = vmatmul.msk.f32.gmra.mxu0 %vm291_vm1, %v5742_v10 }
  0xd0   : > { %5097 = vmatmul.msk.f32.gmra.mxu1 %vm291_vm1, %v5896_v45  ;;  %v519_v22 = vpop.f32.mrf.mxu3 }
  0xd1   : > { %v6079_v30 = vpop.f32.mrf.mxu2  ;;  %v520_v34 = vadd.f32 %v519_v22, %v403_v5  ;;  %v2517_v22 = vld [vmem:[%s7897_s1 + $0x14] sm:$0xf] }
  0xd2   : > { %5239 = vmatpush.msk.msrb.mxu2 %vm340_vm0, %v2517_v22 }
  0xd4   : > { %v6084_v42 = vpop.f32.mrf.mxu0 }
  0xd5   : > { %v6086_v43 = vpop.f32.mrf.mxu1  ;;  %5064 = vmatmul.msk.f32.gmra.mxu3 %vm291_vm1, %v5828_v31 }
  0xd6   : > { %5115 = vmatmul.msk.f32.gmra.mxu2 %vm291_vm1, %v6082_v38 }
  0xd7   : > { %5081 = vmatmul.msk.f32.gmra.mxu0 %vm291_vm1, %v5753_v14 }
  0xd8   : > { %5098 = vmatmul.msk.f32.gmra.mxu1 %vm291_vm1, %v5921_v51  ;;  %v522_v27 = vpop.f32.mrf.mxu3 }
  0xd9   : > { %v6096_v44 = vpop.f32.mrf.mxu2  ;;  %v523_v48 = vadd.f32 %v522_v27, %v406_v11  ;;  %v2368_v27 = vld [vmem:[%s7897_s1 + $0x10] sm:$0xf] }
  0xda   : > { %5222 = vmatpush.msk.msrb.mxu1 %vm340_vm0, %v2368_v27 }
  0xdc   : > { %v6101_v50 = vpop.f32.mrf.mxu0 }
  0xdd   : > { %v6103_v31 = vpop.f32.mrf.mxu1  ;;  %5065 = vmatmul.msk.f32.gmra.mxu3 %vm291_vm1, %v5848_v35  ;;  %v6122_v35 = vld [vmem:[%s5727_s30 + $0xaf] sm:$0xff] }
  0xde   : > { %5116 = vmatmul.msk.f32.gmra.mxu2 %vm291_vm1, %v6099_v49 }
  0xdf   : > { %5082 = vmatmul.msk.f32.gmra.mxu0 %vm291_vm1, %v5764_v18  ;;  %v6166_v18 = vld [vmem:[%s5727_s30 + $0xa0] sm:$0xff] }
  0xe0   : > { %5099 = vmatmul.msk.f32.gmra.mxu1 %vm291_vm1, %v5938_v55  ;;  %v646_v58 = vpop.f32.mrf.mxu3 }
  0xe1   : > { %v6117_v61 = vpop.f32.mrf.mxu2  ;;  %v6119_v1 = vadd.f32 %v646_v58, %v514_v19  ;;  %v2219_v19 = vld [vmem:[%s7897_s1 + $0xc] sm:$0xf] }
  0xe2   : > { %5205 = vmatpush.msk.msrb.mxu0 %vm340_vm0, %v2219_v19 }
  0xe3   : > { %7914 = vst [vmem:[#allocation10_spill] sm:$0xff] %v6119_v1  ;;  %v6159_v1 = vld [vmem:[%s5727_s30 + $0xb7] sm:$0xff] }
  0xe4   : > { %v6124_v5 = vpop.f32.mrf.mxu0 }
  0xe5   : > { %v6126_v11 = vpop.f32.mrf.mxu1  ;;  %5066 = vmatmul.msk.f32.gmra.mxu3 %vm291_vm1, %v6065_v26 }
  0xe6   : > { %7915 = vst [vmem:[#allocation11_spill] sm:$0xff] %v6126_v11  ;;  %5117 = vmatmul.msk.f32.gmra.mxu2 %vm291_vm1, %v6122_v35  ;;  %v6169_v11 = vld [vmem:[%s5727_s30 + $0xa1] sm:$0xff] }
  0xe7   : > { %5083 = vmatmul.msk.f32.gmra.mxu0 %vm291_vm1, %v6129_v16  ;;  %7921 = vst [vmem:[#allocation17_spill] sm:$0xff] %v6169_v11 }
  0xe8   : > { %5100 = vmatmul.msk.f32.gmra.mxu1 %vm291_vm1, %v6132_v23  ;;  %v649_v54 = vpop.f32.mrf.mxu3 }
  0xe9   : > { %v6152_v58 = vpop.f32.mrf.mxu2  ;;  %v6156_v22 = vadd.f32 %v649_v54, %v517_v25  ;;  %v5611_v54 = vmov 0  }
  0xea   : > { %7917 = vst [vmem:[#allocation13_spill] sm:$0xff] %v6152_v58  ;;  %5512 = vset.pattern.permute.xlu0 %v5611_v54  ;;  %5513 = vset.pattern.permute.xlu1 %v5611_v54 }
  0xeb   : > { %7918 = vst [vmem:[#allocation14_spill] sm:$0xff] %v6156_v22  ;;  %v1568_v22 = vld [vmem:[%s7898_s2] sm:$0xff]  ;;  %5514 = vset.pattern.permute.xlu2 %v5611_v54  ;;  %v1569_v54 = vld [vmem:[%s7898_s2 + $0x8] sm:$0xff] }
  0xec   : > { %v6161_v23 = vpop.f32.mrf.mxu0  ;;  %1586 = vperm.xlu0 %5512, %v1568_v22  }
  0xed   : > { %7919 = vst [vmem:[#allocation15_spill] sm:$0xff] %v6161_v23  ;;  %v6163_v55 = vpop.f32.mrf.mxu1  ;;  %5067 = vmatmul.msk.f32.gmra.mxu3 %vm291_vm1, %v6082_v38 }
  0xee   : > { %7920 = vst [vmem:[#allocation16_spill] sm:$0xff] %v6163_v55  ;;  %5118 = vmatmul.msk.f32.gmra.mxu2 %vm291_vm1, %v6159_v1  ;;  %v6187_v55 = vld [vmem:[%s5727_s30 + $0xbf] sm:$0xff] }
  0xef   : > { %5084 = vmatmul.msk.f32.gmra.mxu0 %vm291_vm1, %v6166_v18 }
  0xf0   : > { %5101 = vmatmul.msk.f32.gmra.mxu1 %vm291_vm1, %v6169_v11  ;;  %v652_v25 = vpop.f32.mrf.mxu3  ;;  %v6194_v11 = vld [vmem:[%s5727_s30 + $0xa8] sm:$0xff] }
  0xf1   : > { %v6179_v19 = vpop.f32.mrf.mxu2  ;;  %v6181_v27 = vadd.f32 %v652_v25, %v520_v34 }
  0xf2   : > { %7922 = vst [vmem:[#allocation18_spill] sm:$0xff] %v6179_v19  ;;  %v6197_v19 = vld [vmem:[%s5727_s30 + $0xa9] sm:$0xff] }
  0xf3   : > { %7923 = vst [vmem:[#allocation19_spill] sm:$0xff] %v6181_v27  ;;  %v478_v27 = vadd.f32 %v5987_v60, %v5985_v59  ;;  %v1570_v59 = vld [vmem:[%s7898_s2 + $0x10] sm:$0xff] }
  0xf4   : > { %v6189_v23 = vpop.f32.mrf.mxu0  ;;  %7926 = vst [vmem:[#allocation22_spill] sm:$0xff] %v6197_v19  ;;  %1591 = vperm.xlu0 %5512, %v1569_v54   ;;  %1596 = vperm.xlu1 %5513, %v1570_v59  }
  0xf5   : > { %7924 = vst [vmem:[#allocation20_spill] sm:$0xff] %v6189_v23  ;;  %v6191_v58 = vpop.f32.mrf.mxu1  ;;  %5068 = vmatmul.msk.f32.gmra.mxu3 %vm291_vm1, %v6099_v49 }
  0xf6   : > { %7925 = vst [vmem:[#allocation21_spill] sm:$0xff] %v6191_v58  ;;  %5119 = vmatmul.msk.f32.gmra.mxu2 %vm291_vm1, %v6187_v55 }
  0xf7   : > { %5085 = vmatmul.msk.f32.gmra.mxu0 %vm291_vm1, %v6194_v11 }
  0xf8   : > { %5102 = vmatmul.msk.f32.gmra.mxu1 %vm291_vm1, %v6197_v19  ;;  %v655_v34 = vpop.f32.mrf.mxu3 }
  0xf9   : > { %v6207_v22 = vpop.f32.mrf.mxu2  ;;  %v6209_v25 = vadd.f32 %v655_v34, %v523_v48  ;;  %v658_v48 = vadd.f32 %v5996_v62, %v478_v27 }
  0xfb   : > { %7927 = vst [vmem:[#allocation23_spill] sm:$0xff] %v6209_v25 }
  0xfc   : > { %v908_v58 = vpop.f32.mrf.mxu0 }
  0xfd   : > { %v1057_v23 = vpop.f32.mrf.mxu1  ;;  %5121 = vmatmul.msk.f32.vlgmr.msra.gmra.mxu3 %vm291_vm1, %v5834_v33  ;;  %v481_v33 = vadd.f32 %v6000_v0, %v5998_v63 }
  0xfe   : > { %5172 = vmatmul.msk.f32.vlgmr.msra.gmra.mxu2 %vm291_vm1, %v6065_v26 }
  0xff   : > { %5138 = vmatmul.msk.f32.vlgmr.msra.gmra.mxu0 %vm291_vm1, %v5831_v32  ;;  %v659_v62 = vadd.f32 %v6009_v2, %v481_v33 }
 0x100   : > { %5155 = vmatmul.msk.f32.vlgmr.msra.gmra.mxu1 %vm291_vm1, %v6129_v16  ;;  %v759_v34 = vpop.f32.mrf.mxu3 }
 0x101   : > { %v1206_v54 = vpop.f32.mrf.mxu2  ;;  %v807_v25 = vadd.f32 %v759_v34, %v658_v48 }
 0x103   : > { %v956_v60 = vadd.f32 %v908_v58, %v807_v25 }
 0x104   : > { %v911_v26 = vpop.f32.mrf.mxu0 }
 0x105   : > { %v1060_v19 = vpop.f32.mrf.mxu1  ;;  %v1105_v32 = vadd.f32 %v1057_v23, %v956_v60  ;;  %5122 = vmatmul.msk.f32.gmra.mxu3 %vm291_vm1, %v5854_v37  ;;  %v1571_v37 = vld [vmem:[%s7898_s2 + $0x18] sm:$0xff] }
 0x106   : > { %5173 = vmatmul.msk.f32.gmra.mxu2 %vm291_vm1, %v6082_v38  ;;  %1601 = vperm.xlu1 %5513, %v1571_v37   ;;  %v484_v38 = vadd.f32 %v6013_v4, %v6011_v3 }
 0x107   : > { %5139 = vmatmul.msk.f32.gmra.mxu0 %vm291_vm1, %v5851_v36  ;;  %v6239_v27 = vadd.f32 %v1206_v54, %v1105_v32  ;;  %v490_v32 = vadd.f32 %v6039_v15, %v6037_v13 }
 0x108   : > { %5156 = vmatmul.msk.f32.gmra.mxu1 %vm291_vm1, %v6166_v18  ;;  %v762_v63 = vpop.f32.mrf.mxu3  ;;  %v660_v2 = vadd.f32 %v6022_v7, %v484_v38  ;;  %v493_v38 = vadd.f32 %v6052_v21, %v6050_v20 }
 0x109   : > { %v1209_v0 = vpop.f32.mrf.mxu2  ;;  %v808_v58 = vadd.f32 %v762_v63, %v659_v62 }
 0x10a   : > { %v663_v20 = vadd.f32 %v6062_v24, %v493_v38  ;;  %v496_v24 = vadd.f32 %v6069_v29, %v6067_v28 }
 0x10b   : > { %v957_v23 = vadd.f32 %v911_v26, %v808_v58 }
 0x10c   : > { %v914_v36 = vpop.f32.mrf.mxu0  ;;  %v664_v28 = vadd.f32 %v6079_v30, %v496_v24  ;;  %v6342_v30 = vld [vmem:[%s5727_s30 + $0xd0] sm:$0xff] }
 0x10d   : > { %v1063_v25 = vpop.f32.mrf.mxu1  ;;  %v1106_v48 = vadd.f32 %v1060_v19, %v957_v23  ;;  %5123 = vmatmul.msk.f32.gmra.mxu3 %vm291_vm1, %v5874_v41  ;;  %v487_v19 = vadd.f32 %v6026_v9, %v6024_v8  ;;  %v7930_v24 = vld [vmem:[#allocation9_spill] sm:$0xff] }
 0x10e   : > { %5174 = vmatmul.msk.f32.gmra.mxu2 %vm291_vm1, %v6099_v49  ;;  %v6260_v49 = vld [vmem:[%s5727_s30 + $0xb0] sm:$0xff] }
 0x10f   : > { %5140 = vmatmul.msk.f32.gmra.mxu0 %vm291_vm1, %v5871_v40  ;;  %v6255_v3 = vadd.f32 %v1209_v0, %v1106_v48  ;;  %v661_v7 = vadd.f32 %v6035_v12, %v487_v19  ;;  %v6276_v0 = vld [vmem:[%s5727_s30 + $0xb8] sm:$0xff] }
 0x110   : > { %5157 = vmatmul.msk.f32.gmra.mxu1 %vm291_vm1, %v6194_v11  ;;  %v765_v4 = vpop.f32.mrf.mxu3 }
 0x111   : > { %v1212_v34 = vpop.f32.mrf.mxu2  ;;  %v809_v54 = vadd.f32 %v765_v4, %v660_v2 }
 0x113   : > { %v958_v41 = vadd.f32 %v914_v36, %v809_v54 }
 0x114   : > { %v917_v59 = vpop.f32.mrf.mxu0 }
 0x115   : > { %v1066_v33 = vpop.f32.mrf.mxu1  ;;  %v1107_v40 = vadd.f32 %v1063_v25, %v958_v41  ;;  %5124 = vmatmul.msk.f32.gmra.mxu3 %vm291_vm1, %v5902_v47  ;;  %v6295_v25 = vld [vmem:[%s5727_s30 + $0xc0] sm:$0xff] }
 0x116   : > { %5175 = vmatmul.msk.f32.gmra.mxu2 %vm291_vm1, %v6122_v35 }
 0x117   : > { %5141 = vmatmul.msk.f32.gmra.mxu0 %vm291_vm1, %v5899_v46  ;;  %v6271_v8 = vadd.f32 %v1212_v34, %v1107_v40  ;;  %v662_v46 = vadd.f32 %v6048_v17, %v490_v32  ;;  %v1575_v34 = vld [vmem:[%s7898_s2 + $0x38] sm:$0xff] }
 0x118   : > { %5158 = vmatmul.msk.f32.gmra.mxu1 %vm291_vm1, %v6260_v49  ;;  %v768_v9 = vpop.f32.mrf.mxu3  ;;  %1621 = vperm.xlu1 %5513, %v1575_v34   ;;  %v7929_v34 = vld [vmem:[#allocation8_spill] sm:$0xff] }
 0x119   : > { %v1215_v60 = vpop.f32.mrf.mxu2  ;;  %v810_v26 = vadd.f32 %v768_v9, %v661_v7 }
 0x11b   : > { %v959_v47 = vadd.f32 %v917_v59, %v810_v26  ;;  %v6320_v59 = vld [vmem:[%s5727_s30 + $0xc8] sm:$0xff] }
 0x11c   : > { %v920_v62 = vpop.f32.mrf.mxu0 }
 0x11d   : > { %v1069_v63 = vpop.f32.mrf.mxu1  ;;  %v1108_v58 = vadd.f32 %v1066_v33, %v959_v47  ;;  %5125 = vmatmul.msk.f32.gmra.mxu3 %vm291_vm1, %v5927_v53  ;;  %v1574_v53 = vld [vmem:[%s7898_s2 + $0x30] sm:$0xff] }
 0x11e   : > { %5176 = vmatmul.msk.f32.gmra.mxu2 %vm291_vm1, %v6159_v1  ;;  %1616 = vperm.xlu0 %5512, %v1574_v53  }
 0x11f   : > { %5142 = vmatmul.msk.f32.gmra.mxu0 %vm291_vm1, %v5924_v52  ;;  %v6287_v12 = vadd.f32 %v1215_v60, %v1108_v58  ;;  %v6337_v60 = vld [vmem:[%s5727_s30 + $0xcf] sm:$0xff] }
 0x120   : > { %5159 = vmatmul.msk.f32.gmra.mxu1 %vm291_vm1, %v6276_v0  ;;  %v771_v13 = vpop.f32.mrf.mxu3 }
 0x121   : > { %v1218_v15 = vpop.f32.mrf.mxu2  ;;  %v811_v37 = vadd.f32 %v771_v13, %v662_v46  ;;  %v6359_v13 = vld [vmem:[%s5727_s30 + $0xd7] sm:$0xff] }
 0x123   : > { %v960_v23 = vadd.f32 %v920_v62, %v811_v37 }
 0x124   : > { %v923_v52 = vpop.f32.mrf.mxu0 }
 0x125   : > { %v1072_v36 = vpop.f32.mrf.mxu1  ;;  %v1109_v17 = vadd.f32 %v1069_v63, %v960_v23  ;;  %5126 = vmatmul.msk.f32.gmra.mxu3 %vm291_vm1, %v5944_v57  ;;  %v1572_v57 = vld [vmem:[%s7898_s2 + $0x20] sm:$0xff] }
 0x126   : > { %5177 = vmatmul.msk.f32.gmra.mxu2 %vm291_vm1, %v6187_v55  ;;  %1606 = vperm.xlu2 %5514, %v1572_v57  }
 0x127   : > { %5143 = vmatmul.msk.f32.gmra.mxu0 %vm291_vm1, %v5941_v56  ;;  %v6306_v21 = vadd.f32 %v1218_v15, %v1109_v17  ;;  %v6315_v56 = vld [vmem:[%s5727_s30 + $0xc7] sm:$0xff]  ;;  %v6381_v17 = vld [vmem:[%s5727_s30 + $0xdf] sm:$0xff] }
 0x128   : > { %5160 = vmatmul.msk.f32.gmra.mxu1 %vm291_vm1, %v6295_v25  ;;  %v774_v48 = vpop.f32.mrf.mxu3 }
 0x129   : > { %v1221_v2 = vpop.f32.mrf.mxu2  ;;  %v812_v4 = vadd.f32 %v774_v48, %v663_v20  ;;  %v7928_v20 = vld [vmem:[#allocation11_spill] sm:$0xff] }
 0x12b   : > { %v961_v54 = vadd.f32 %v923_v52, %v812_v4 }
 0x12c   : > { %v926_v19 = vpop.f32.mrf.mxu0 }
 0x12d   : > { %v1075_v41 = vpop.f32.mrf.mxu1  ;;  %v1110_v33 = vadd.f32 %v1072_v36, %v961_v54  ;;  %5127 = vmatmul.msk.f32.gmra.mxu3 %vm291_vm1, %v5730_v6  ;;  %v1573_v6 = vld [vmem:[%s7898_s2 + $0x28] sm:$0xff] }
 0x12e   : > { %5178 = vmatmul.msk.f32.gmra.mxu2 %vm291_vm1, %v6315_v56  ;;  %1611 = vperm.xlu2 %5514, %v1573_v6   ;;  %v7933_v6 = vld [vmem:[#allocation16_spill] sm:$0xff] }
 0x12f   : > { %5144 = vmatmul.msk.f32.gmra.mxu0 %vm291_vm1, %v5868_v39  ;;  %v6331_v29 = vadd.f32 %v1221_v2, %v1110_v33  ;;  %v499_v39 = vadd.f32 %v6086_v43, %v6084_v42 }
 0x130   : > { %5161 = vmatmul.msk.f32.gmra.mxu1 %vm291_vm1, %v6320_v59  ;;  %v777_v40 = vpop.f32.mrf.mxu3 }
 0x131   : > { %v1224_v7 = vpop.f32.mrf.mxu2  ;;  %v813_v9 = vadd.f32 %v777_v40, %v664_v28  ;;  %v665_v42 = vadd.f32 %v6096_v44, %v499_v39  ;;  %v6364_v44 = vld [vmem:[%s5727_s30 + $0xd8] sm:$0xff]  ;;  %v1576_v40 = vld [vmem:[%s7898_s2 + $0x40] sm:$0xff] }
 0x133   : > { %v962_v26 = vadd.f32 %v926_v19, %v813_v9  ;;  %v7932_v9 = vld [vmem:[#allocation15_spill] sm:$0xff] }
 0x134   : > { %v929_v32 = vpop.f32.mrf.mxu0  ;;  %v508_v39 = vadd.f32 %v7933_v6, %v7932_v9  ;;  %v2666_v6 = vld [vmem:[%s7897_s1 + $0x18] sm:$0xf] }
 0x135   : > { %v1078_v47 = vpop.f32.mrf.mxu1  ;;  %v1111_v62 = vadd.f32 %v1075_v41, %v962_v26  ;;  %5128 = vmatmul.msk.f32.gmra.mxu3 %vm291_vm1, %v5742_v10  ;;  %v1577_v10 = vld [vmem:[%s7898_s2 + $0x48] sm:$0xff] }
 0x136   : > { %5179 = vmatmul.msk.f32.gmra.mxu2 %vm291_vm1, %v6337_v60  ;;  %1631 = vperm.xlu0 %5512, %v1577_v10  }
 0x137   : > { %5145 = vmatmul.msk.f32.gmra.mxu0 %vm291_vm1, %v5896_v45  ;;  %v6353_v43 = vadd.f32 %v1224_v7, %v1111_v62  ;;  %v502_v45 = vadd.f32 %v6103_v31, %v6101_v50  ;;  %v6403_v7 = vld [vmem:[%s5727_s30 + $0xe7] sm:$0xff]  ;;  %1626 = vperm.xlu2 %5514, %v1576_v40  }
 0x138   : > { %5162 = vmatmul.msk.f32.gmra.mxu1 %vm291_vm1, %v6342_v30  ;;  %v780_v63 = vpop.f32.mrf.mxu3  ;;  %v6408_v62 = vld [vmem:[%s5727_s30 + $0xe8] sm:$0xff]  ;;  %5256 = vmatpush.msk.msra.mxu3 %vm340_vm0, %v2666_v6 }
 0x139   : > { %v1227_v58 = vpop.f32.mrf.mxu2  ;;  %v814_v46 = vadd.f32 %v780_v63, %v665_v42  ;;  %v666_v50 = vadd.f32 %v6117_v61, %v502_v45  ;;  %v6386_v61 = vld [vmem:[%s5727_s30 + $0xe0] sm:$0xff] }
 0x13a   : > { %v7934_v63 = vld [vmem:[#allocation12_spill] sm:$0xff] }
 0x13b   : > { %v963_v15 = vadd.f32 %v929_v32, %v814_v46 }
 0x13c   : > { %v932_v37 = vpop.f32.mrf.mxu0 }
 0x13d   : > { %v1081_v53 = vpop.f32.mrf.mxu1  ;;  %v1112_v38 = vadd.f32 %v1078_v47, %v963_v15  ;;  %5129 = vmatmul.msk.f32.gmra.mxu3 %vm291_vm1, %v5753_v14  ;;  %v1578_v14 = vld [vmem:[%s7898_s2 + $0x50] sm:$0xff] }
 0x13e   : > { %5180 = vmatmul.msk.f32.gmra.mxu2 %vm291_vm1, %v6359_v13  ;;  %1636 = vperm.xlu1 %5513, %v1578_v14  }
 0x13f   : > { %5146 = vmatmul.msk.f32.gmra.mxu0 %vm291_vm1, %v5921_v51  ;;  %v6375_v31 = vadd.f32 %v1227_v58, %v1112_v38  ;;  %v505_v51 = vadd.f32 %v7928_v20, %v6124_v5  ;;  %v7931_v5 = vld [vmem:[#allocation13_spill] sm:$0xff]  ;;  %v7935_v58 = vld [vmem:[#allocation18_spill] sm:$0xff]  ;;  %v7936_v38 = vld [vmem:[#allocation20_spill] sm:$0xff] }
 0x140   : > { %5163 = vmatmul.msk.f32.gmra.mxu1 %vm291_vm1, %v6364_v44  ;;  %v783_v23 = vpop.f32.mrf.mxu3  ;;  %v668_v46 = vadd.f32 %v7935_v58, %v508_v39  ;;  %v6430_v20 = vld [vmem:[%s5727_s30 + $0xf0] sm:$0xff] }
 0x141   : > { %v1230_v52 = vpop.f32.mrf.mxu2  ;;  %v815_v36 = vadd.f32 %v783_v23, %v666_v50  ;;  %v667_v54 = vadd.f32 %v7931_v5, %v505_v51  ;;  %v7937_v50 = vld [vmem:[#allocation21_spill] sm:$0xff]  ;;  %v6447_v5 = vld [vmem:[%s5727_s30 + $0xf7] sm:$0xff] }
 0x142   : > { %v511_v23 = vadd.f32 %v7937_v50, %v7936_v38  ;;  %v5612_v38 = vmov 0.0  }
 0x143   : > { %v964_v48 = vadd.f32 %v932_v37, %v815_v36  ;;  %245 = vst.msk [vmem:[%s6487_s6] sm:$0xff] %vm244_vm2, %v5612_v38 }
 0x144   : > { %v935_v2 = vpop.f32.mrf.mxu0  ;;  %246 = vst.msk [vmem:[%s6487_s6 + $0x8] sm:$0xff] %vm244_vm2, %v5612_v38 }
 0x145   : > { %v1084_v4 = vpop.f32.mrf.mxu1  ;;  %v1113_v57 = vadd.f32 %v1081_v53, %v964_v48  ;;  %5130 = vmatmul.msk.f32.gmra.mxu3 %vm291_vm1, %v7929_v34  ;;  %v6425_v53 = vld [vmem:[%s5727_s30 + $0xef] sm:$0xff]  ;;  %247 = vst.msk [vmem:[%s6487_s6 + $0x10] sm:$0xff] %vm244_vm2, %v5612_v38 }
 0x146   : > { %5181 = vmatmul.msk.f32.gmra.mxu2 %vm291_vm1, %v6381_v17  ;;  %v7938_v48 = vld [vmem:[#allocation17_spill] sm:$0xff]  ;;  %248 = vst.msk [vmem:[%s6487_s6 + $0x18] sm:$0xff] %vm244_vm2, %v5612_v38 }
 0x147   : > { %5147 = vmatmul.msk.f32.gmra.mxu0 %vm291_vm1, %v7930_v24  ;;  %v6397_v19 = vadd.f32 %v1230_v52, %v1113_v57  ;;  %249 = vst.msk [vmem:[%s6487_s6 + $0x20] sm:$0xff] %vm244_vm2, %v5612_v38 }
 0x148   : > { %5164 = vmatmul.msk.f32.gmra.mxu1 %vm291_vm1, %v6386_v61  ;;  %v786_v41 = vpop.f32.mrf.mxu3  ;;  %250 = vst.msk [vmem:[%s6487_s6 + $0x28] sm:$0xff] %vm244_vm2, %v5612_v38 }
 0x149   : > { %v1233_v33 = vpop.f32.mrf.mxu2  ;;  %v816_v28 = vadd.f32 %v786_v41, %v667_v54  ;;  %251 = vst.msk [vmem:[%s6487_s6 + $0x1b0] sm:$0xff] %vm244_vm2, %v5612_v38 }
 0x14a   : > { %252 = vst.msk [vmem:[%s6487_s6 + $0x1b8] sm:$0xff] %vm244_vm2, %v5612_v38 }
 0x14b   : > { %v965_v26 = vadd.f32 %v935_v2, %v816_v28  ;;  %v669_v2 = vadd.f32 %v6207_v22, %v511_v23  ;;  %v6450_v28 = vld [vmem:[%s5727_s30 + $0xf8] sm:$0xff]  ;;  %253 = vst.msk [vmem:[%s6487_s6 + $0x1c0] sm:$0xff] %vm244_vm2, %v5612_v38 }
 0x14c   : > { %v938_v32 = vpop.f32.mrf.mxu0  ;;  %v7939_v22 = vld [vmem:[#allocation22_spill] sm:$0xff]  ;;  %254 = vst.msk [vmem:[%s6487_s6 + $0x1c8] sm:$0xff] %vm244_vm2, %v5612_v38 }
 0x14d   : > { %v1087_v47 = vpop.f32.mrf.mxu1  ;;  %v1114_v42 = vadd.f32 %v1084_v4, %v965_v26  ;;  %5131 = vmatmul.msk.f32.gmra.mxu3 %vm291_vm1, %v6129_v16  ;;  %v1580_v16 = vld [vmem:[%s7898_s2 + $0x60] sm:$0xff]  ;;  %v7940_v26 = vld [vmem:[#allocation10_spill] sm:$0xff]  ;;  %255 = vst.msk [vmem:[%s6487_s6 + $0x1d0] sm:$0xff] %vm244_vm2, %v5612_v38 }
 0x14e   : > { %5182 = vmatmul.msk.f32.gmra.mxu2 %vm291_vm1, %v6403_v7  ;;  %1646 = vperm.xlu0 %5512, %v1580_v16   ;;  %v3350_v16 = vld [vmem:[%s7897_s1 + $0x4] sm:$0xf]  ;;  %256 = vst.msk [vmem:[%s6487_s6 + $0x1d8] sm:$0xff] %vm244_vm2, %v5612_v38 }
 0x14f   : > { %5148 = vmatmul.msk.f32.gmra.mxu0 %vm291_vm1, %v7934_v63  ;;  %v6419_v10 = vadd.f32 %v1233_v33, %v1114_v42  ;;  %v6471_v42 = vld [vmem:[%s5727_s30 + $0xff] sm:$0xff]  ;;  %5307 = vmatpush.msk.msra.mxu2 %vm340_vm0, %v3350_v16 }
 0x150   : > { %5165 = vmatmul.msk.f32.gmra.mxu1 %vm291_vm1, %v6408_v62  ;;  %v789_v45 = vpop.f32.mrf.mxu3 }
 0x151   : > { %v1236_v15 = vpop.f32.mrf.mxu2  ;;  %v817_v37 = vadd.f32 %v789_v45, %v668_v46 }
 0x153   : > { %v966_v52 = vadd.f32 %v938_v32, %v817_v37  ;;  %v6477_v37 = vld [vmem:[%s5727_s30 + $0x100] sm:$0xff] }
 0x154   : > { %v941_v36 = vpop.f32.mrf.mxu0 }
 0x155   : > { %v1090_v14 = vpop.f32.mrf.mxu1  ;;  %v1115_v51 = vadd.f32 %v1087_v47, %v966_v52  ;;  %5132 = vmatmul.msk.f32.gmra.mxu3 %vm291_vm1, %v6166_v18  ;;  %v1581_v18 = vld [vmem:[%s7898_s2 + $0x68] sm:$0xff]  ;;  %v1579_v47 = vld [vmem:[%s7898_s2 + $0x58] sm:$0xff] }
 0x156   : > { %5183 = vmatmul.msk.f32.gmra.mxu2 %vm291_vm1, %v6425_v53  ;;  %1651 = vperm.xlu1 %5513, %v1581_v18  }
 0x157   : > { %5149 = vmatmul.msk.f32.gmra.mxu0 %vm291_vm1, %v7938_v48  ;;  %v6441_v4 = vadd.f32 %v1236_v15, %v1115_v51  ;;  %1641 = vperm.xlu2 %5514, %v1579_v47   ;;  %v6474_v15 = vld [vmem:[%s5727_s30 + $0xb1] sm:$0xff] }
 0x158   : > { %5166 = vmatmul.msk.f32.gmra.mxu1 %vm291_vm1, %v6430_v20  ;;  %v792_v57 = vpop.f32.mrf.mxu3 }
 0x159   : > { %v1239_v34 = vpop.f32.mrf.mxu2  ;;  %v818_v24 = vadd.f32 %v792_v57, %v669_v2  ;;  %v2815_v2 = vld [vmem:[%s7897_s1 + $0x1c] sm:$0xf]  ;;  %v2964_v57 = vld [vmem:[%s7897_s1 + $0x20] sm:$0xf] }
 0x15a   : > { %5273 = vmatpush.msk.msra.mxu0 %vm340_vm0, %v2815_v2  ;;  %5290 = vmatpush.msk.msra.mxu1 %vm340_vm0, %v2964_v57  ;;  %v7943_v2 = vld [vmem:[#allocation23_spill] sm:$0xff] }
 0x15b   : > { %v967_v54 = vadd.f32 %v941_v36, %v818_v24  ;;  %v6523_v24 = vld [vmem:[%s5727_s30 + $0x107] sm:$0xff] }
 0x15c   : > { %v944_v41 = vpop.f32.mrf.mxu0 }
 0x15d   : > { %v1093_v33 = vpop.f32.mrf.mxu1  ;;  %v1116_v40 = vadd.f32 %v1090_v14, %v967_v54  ;;  %5133 = vmatmul.msk.f32.gmra.mxu3 %vm291_vm1, %v6194_v11  ;;  %v7941_v14 = vld [vmem:[#allocation14_spill] sm:$0xff] }
 0x15e   : > { %5184 = vmatmul.msk.f32.gmra.mxu2 %vm291_vm1, %v6447_v5 }
 0x15f   : > { %5150 = vmatmul.msk.f32.gmra.mxu0 %vm291_vm1, %v7939_v22  ;;  %v6460_v9 = vadd.f32 %v1239_v34, %v1116_v40  ;;  %v1583_v34 = vld [vmem:[%s7898_s2 + $0x78] sm:$0xff]  ;;  %v6533_v40 = vld [vmem:[%s5727_s30 + $0x108] sm:$0xff] }
 0x160   : > { %5167 = vmatmul.msk.f32.gmra.mxu1 %vm291_vm1, %v6450_v28  ;;  %v795_v39 = vpop.f32.mrf.mxu3  ;;  %1661 = vperm.xlu0 %5512, %v1583_v34   ;;  %v1582_v34 = vld [vmem:[%s7898_s2 + $0x70] sm:$0xff] }
 0x161   : > { %v1242_v11 = vpop.f32.mrf.mxu2  ;;  %v819_v32 = vadd.f32 %v795_v39, %v7940_v26  ;;  %1656 = vperm.xlu2 %5514, %v1582_v34  }
 0x163   : > { %v968_v58 = vadd.f32 %v944_v41, %v819_v32  ;;  %v7942_v32 = vld [vmem:[#allocation19_spill] sm:$0xff] }
 0x164   : > { %v947_v46 = vpop.f32.mrf.mxu0 }
 0x165   : > { %v1096_v45 = vpop.f32.mrf.mxu1  ;;  %v1117_v50 = vadd.f32 %v1093_v33, %v968_v58  ;;  %5134 = vmatmul.msk.f32.gmra.mxu3 %vm291_vm1, %v6260_v49  ;;  %v6530_v33 = vld [vmem:[%s5727_s30 + $0xb9] sm:$0xff]  ;;  %v6557_v58 = vld [vmem:[%s5727_s30 + $0x10f] sm:$0xff] }
 0x166   : > { %5185 = vmatmul.msk.f32.gmra.mxu2 %vm291_vm1, %v6471_v42 }
 0x167   : > { %5151 = vmatmul.msk.f32.gmra.mxu0 %vm291_vm1, %v6474_v15  ;;  %v6504_v23 = vadd.f32 %v1242_v11, %v1117_v50  ;;  %v6560_v50 = vld [vmem:[%s5727_s30 + $0xc1] sm:$0xff] }
 0x168   : > { %5168 = vmatmul.msk.f32.gmra.mxu1 %vm291_vm1, %v6477_v37  ;;  %v798_v52 = vpop.f32.mrf.mxu3 }
 0x169   : > { %v1245_v36 = vpop.f32.mrf.mxu2  ;;  %v820_v51 = vadd.f32 %v798_v52, %v7941_v14  ;;  %v6563_v52 = vld [vmem:[%s5727_s30 + $0x110] sm:$0xff] }
 0x16b   : > { %v969_v18 = vadd.f32 %v947_v46, %v820_v51 }
 0x16c   : > { %v950_v54 = vpop.f32.mrf.mxu0 }
 0x16d   : > { %v1099_v41 = vpop.f32.mrf.mxu1  ;;  %v1118_v6 = vadd.f32 %v1096_v45, %v969_v18  ;;  %5135 = vmatmul.msk.f32.gmra.mxu3 %vm291_vm1, %v6276_v0 }
 0x16e   : > { %5186 = vmatmul.msk.f32.gmra.mxu2 %vm291_vm1, %v6523_v24 }
 0x16f   : > { %5152 = vmatmul.msk.f32.gmra.mxu0 %vm291_vm1, %v6530_v33  ;;  %v6551_v39 = vadd.f32 %v1245_v36, %v1118_v6 }
 0x170   : > { %5169 = vmatmul.msk.f32.gmra.mxu1 %vm291_vm1, %v6533_v40  ;;  %v801_v11 = vpop.f32.mrf.mxu3 }
 0x171   : > { %v1248_v26 = vpop.f32.mrf.mxu2  ;;  %v821_v47 = vadd.f32 %v801_v11, %v7942_v32 }
 0x173   : > { %v970_v46 = vadd.f32 %v950_v54, %v821_v47 }
 0x174   : > { %v953_v45 = vpop.f32.mrf.mxu0 }
 0x175   : > { %v1102_v16 = vpop.f32.mrf.mxu1  ;;  %v1119_v14 = vadd.f32 %v1099_v41, %v970_v46  ;;  %5136 = vmatmul.msk.f32.gmra.mxu3 %vm291_vm1, %v6295_v25 }
 0x176   : > { %5187 = vmatmul.msk.f32.gmra.mxu2 %vm291_vm1, %v6557_v58 }
 0x177   : > { %5153 = vmatmul.msk.f32.gmra.mxu0 %vm291_vm1, %v6560_v50  ;;  %v6573_v38 = vadd.f32 %v1248_v26, %v1119_v14  ;;  %v1587_v26 = vpop.permute.xlu0 %1586 }
 0x178   : > { %5170 = vmatmul.msk.f32.gmra.mxu1 %vm291_vm1, %v6563_v52  ;;  %v804_v36 = vpop.f32.mrf.mxu3 }
 0x179   : > { %v1251_v51 = vpop.f32.mrf.mxu2  ;;  %v822_v57 = vadd.f32 %v804_v36, %v7943_v2 }
 0x17b   : > { %v971_v18 = vadd.f32 %v953_v45, %v822_v57 }
 0x17c   : > { %v1504_v54 = vpop.f32.mrf.mxu0 }
 0x17d   : > { %v1890_v41 = vpop.f32.mrf.mxu1  ;;  %v1120_v6 = vadd.f32 %v1102_v16, %v971_v18  ;;  %5189 = vmatmul.msk.f32.vlgmr.msrb.gmra.mxu3 %vm291_vm1, %v7934_v63 }
 0x17e   : > { %5240 = vmatmul.msk.f32.vlgmr.msrb.gmra.mxu2 %vm291_vm1, %v6474_v15 }
 0x17f   : > { %5206 = vmatmul.msk.f32.vlgmr.msrb.gmra.mxu0 %vm291_vm1, %v6122_v35  ;;  %v6587_v11 = vadd.f32 %v1251_v51, %v1120_v6  ;;  %v1592_v2 = vpop.permute.xlu0 %1591 }
 0x180   : > { %5223 = vmatmul.msk.f32.vlgmr.msrb.gmra.mxu1 %vm291_vm1, %v6260_v49  ;;  %v1355_v32 = vpop.f32.mrf.mxu3 }
 0x181   : > { %v2006_v47 = vpop.f32.mrf.mxu2  ;;  %v1403_v46 = vadd.f32 %v1355_v32, %v6239_v27 }
 0x182   : > { %v6590_v45 = vadd.f32 %v2006_v47, %v1890_v41  ;;  %v1597_v41 = vpop.permute.xlu1 %1596 }
 0x183   : > { %v1552_v63 = vadd.f32 %v1504_v54, %v1403_v46 }
 0x184   : > { %v1507_v16 = vpop.f32.mrf.mxu0 }
 0x185   : > { %v1893_v14 = vpop.f32.mrf.mxu1  ;;  %v1664_v36 = vmul.f32 %v1587_v26, %v1552_v63  ;;  %5190 = vmatmul.msk.f32.gmra.mxu3 %vm291_vm1, %v7938_v48  ;;  %v6623_v63 = vld [vmem:[%s5727_s30 + $0xc9] sm:$0xff] }
 0x186   : > { %5241 = vmatmul.msk.f32.gmra.mxu2 %vm291_vm1, %v6530_v33 }
 0x187   : > { %5207 = vmatmul.msk.f32.gmra.mxu0 %vm291_vm1, %v6159_v1  ;;  %1680 = vst.msk [vmem:[%s6487_s6 + $0x30] sm:$0xff] %vm244_vm2, %v1664_v36  ;;  %v1734_v18 = vmul.f32 %v1664_v36, %v1664_v36  ;;  %v1696_v1 = vsel %vm244_vm2, %v1664_v36, 0.0 }
 0x188   : > { %5224 = vmatmul.msk.f32.gmra.mxu1 %vm291_vm1, %v6276_v0  ;;  %v1358_v35 = vpop.f32.mrf.mxu3 }
 0x189   : > { %v2009_v27 = vpop.f32.mrf.mxu2  ;;  %v1404_v49 = vadd.f32 %v1358_v35, %v6255_v3  ;;  %v1750_v32 = vsel %vm244_vm2, %v1734_v18, 0.0 }
 0x18a   : > { %v6603_v51 = vadd.f32 %v2009_v27, %v1893_v14 }
 0x18b   : > { %v1553_v48 = vadd.f32 %v1507_v16, %v1404_v49 }
 0x18c   : > { %v1510_v57 = vpop.f32.mrf.mxu0 }
 0x18d   : > { %v1896_v34 = vpop.f32.mrf.mxu1  ;;  %v1665_v54 = vmul.f32 %v1592_v2, %v1553_v48  ;;  %5191 = vmatmul.msk.f32.gmra.mxu3 %vm291_vm1, %v7939_v22 }
 0x18e   : > { %5242 = vmatmul.msk.f32.gmra.mxu2 %vm291_vm1, %v6560_v50 }
 0x18f   : > { %5208 = vmatmul.msk.f32.gmra.mxu0 %vm291_vm1, %v6187_v55  ;;  %1681 = vst.msk [vmem:[%s6487_s6 + $0x38] sm:$0xff] %vm244_vm2, %v1665_v54  ;;  %v1697_v3 = vsel %vm244_vm2, %v1665_v54, 0.0  ;;  %v1735_v0 = vmul.f32 %v1665_v54, %v1665_v54  ;;  %v6641_v54 = vld [vmem:[%s5727_s30 + $0xd1] sm:$0xff] }
 0x190   : > { %5225 = vmatmul.msk.f32.gmra.mxu1 %vm291_vm1, %v6295_v25  ;;  %v1698_v6 = vadd.f32 %v1697_v3, %v1696_v1  ;;  %v1361_v22 = vpop.f32.mrf.mxu3 }
 0x191   : > { %v2012_v26 = vpop.f32.mrf.mxu2  ;;  %v1751_v47 = vsel %vm244_vm2, %v1735_v0, 0.0  ;;  %v1405_v55 = vadd.f32 %v1361_v22, %v6271_v8 }
 0x192   : > { %v6620_v46 = vadd.f32 %v2012_v26, %v1896_v34  ;;  %v1752_v25 = vadd.f32 %v1751_v47, %v1750_v32 }
 0x193   : > { %v1554_v16 = vadd.f32 %v1510_v57, %v1405_v55 }
 0x194   : > { %v1513_v14 = vpop.f32.mrf.mxu0 }
 0x195   : > { %v1899_v36 = vpop.f32.mrf.mxu1  ;;  %v1666_v35 = vmul.f32 %v1597_v41, %v1554_v16  ;;  %5192 = vmatmul.msk.f32.gmra.mxu3 %vm291_vm1, %v6474_v15 }
 0x196   : > { %5243 = vmatmul.msk.f32.gmra.mxu2 %vm291_vm1, %v6623_v63 }
 0x197   : > { %5209 = vmatmul.msk.f32.gmra.mxu0 %vm291_vm1, %v6315_v56  ;;  %1682 = vst.msk [vmem:[%s6487_s6 + $0x40] sm:$0xff] %vm244_vm2, %v1666_v35  ;;  %v1699_v8 = vsel %vm244_vm2, %v1666_v35, 0.0  ;;  %v1736_v27 = vmul.f32 %v1666_v35, %v1666_v35  ;;  %v1602_v56 = vpop.permute.xlu1 %1601 }
 0x198   : > { %5226 = vmatmul.msk.f32.gmra.mxu1 %vm291_vm1, %v6320_v59  ;;  %v1700_v49 = vadd.f32 %v1699_v8, %v1698_v6  ;;  %v1364_v2 = vpop.f32.mrf.mxu3  ;;  %v1607_v6 = vpop.permute.xlu2 %1606 }
 0x199   : > { %v2015_v48 = vpop.f32.mrf.mxu2  ;;  %v1753_v15 = vsel %vm244_vm2, %v1736_v27, 0.0  ;;  %v1406_v57 = vadd.f32 %v1364_v2, %v6287_v12 }
 0x19a   : > { %v6638_v34 = vadd.f32 %v2015_v48, %v1899_v36  ;;  %v1754_v18 = vadd.f32 %v1753_v15, %v1752_v25  ;;  %v6659_v25 = vld [vmem:[%s5727_s30 + $0xd9] sm:$0xff] }
 0x19b   : > { %v1555_v59 = vadd.f32 %v1513_v14, %v1406_v57  ;;  %v6677_v57 = vld [vmem:[%s5727_s30 + $0xe1] sm:$0xff] }
 0x19c   : > { %v1516_v1 = vpop.f32.mrf.mxu0 }
 0x19d   : > { %v1902_v3 = vpop.f32.mrf.mxu1  ;;  %v1667_v0 = vmul.f32 %v1602_v56, %v1555_v59  ;;  %5193 = vmatmul.msk.f32.gmra.mxu3 %vm291_vm1, %v6530_v33 }
 0x19e   : > { %5244 = vmatmul.msk.f32.gmra.mxu2 %vm291_vm1, %v6641_v54 }
 0x19f   : > { %5210 = vmatmul.msk.f32.gmra.mxu0 %vm291_vm1, %v6337_v60  ;;  %1683 = vst.msk [vmem:[%s6487_s6 + $0x48] sm:$0xff] %vm244_vm2, %v1667_v0  ;;  %v1701_v12 = vsel %vm244_vm2, %v1667_v0, 0.0  ;;  %v1737_v41 = vmul.f32 %v1667_v0, %v1667_v0 }
 0x1a0   : > { %5227 = vmatmul.msk.f32.gmra.mxu1 %vm291_vm1, %v6342_v30  ;;  %v1702_v22 = vadd.f32 %v1701_v12, %v1700_v49  ;;  %v1367_v26 = vpop.f32.mrf.mxu3 }
 0x1a1   : > { %v2018_v32 = vpop.f32.mrf.mxu2  ;;  %v1755_v33 = vsel %vm244_vm2, %v1737_v41, 0.0  ;;  %v1407_v47 = vadd.f32 %v1367_v26, %v6306_v21 }
 0x1a2   : > { %v6656_v55 = vadd.f32 %v2018_v32, %v1902_v3  ;;  %v1756_v60 = vadd.f32 %v1755_v33, %v1754_v18  ;;  %v6695_v32 = vld [vmem:[%s5727_s30 + $0xe9] sm:$0xff] }
 0x1a3   : > { %v1556_v30 = vadd.f32 %v1516_v1, %v1407_v47 }
 0x1a4   : > { %v1519_v16 = vpop.f32.mrf.mxu0 }
 0x1a5   : > { %v1905_v14 = vpop.f32.mrf.mxu1  ;;  %v1668_v36 = vmul.f32 %v1607_v6, %v1556_v30  ;;  %5194 = vmatmul.msk.f32.gmra.mxu3 %vm291_vm1, %v6560_v50 }
 0x1a6   : > { %5245 = vmatmul.msk.f32.gmra.mxu2 %vm291_vm1, %v6659_v25 }
 0x1a7   : > { %5211 = vmatmul.msk.f32.gmra.mxu0 %vm291_vm1, %v6359_v13  ;;  %1684 = vst.msk [vmem:[%s6487_s6 + $0x50] sm:$0xff] %vm244_vm2, %v1668_v36  ;;  %v1703_v21 = vsel %vm244_vm2, %v1668_v36, 0.0  ;;  %v1738_v35 = vmul.f32 %v1668_v36, %v1668_v36  ;;  %v1612_v13 = vpop.permute.xlu2 %1611 }
 0x1a8   : > { %5228 = vmatmul.msk.f32.gmra.mxu1 %vm291_vm1, %v6364_v44  ;;  %v1704_v8 = vadd.f32 %v1703_v21, %v1702_v22  ;;  %v1370_v27 = vpop.f32.mrf.mxu3 }
 0x1a9   : > { %v2021_v49 = vpop.f32.mrf.mxu2  ;;  %v1757_v50 = vsel %vm244_vm2, %v1738_v35, 0.0  ;;  %v1408_v2 = vadd.f32 %v1370_v27, %v6331_v29 }
 0x1aa   : > { %v6674_v48 = vadd.f32 %v2021_v49, %v1905_v14  ;;  %v1758_v15 = vadd.f32 %v1757_v50, %v1756_v60  ;;  %v6713_v49 = vld [vmem:[%s5727_s30 + $0xf1] sm:$0xff] }
 0x1ab   : > { %v1557_v44 = vadd.f32 %v1519_v16, %v1408_v2 }
 0x1ac   : > { %v1522_v18 = vpop.f32.mrf.mxu0 }
 0x1ad   : > { %v1908_v56 = vpop.f32.mrf.mxu1  ;;  %v1669_v59 = vmul.f32 %v1612_v13, %v1557_v44  ;;  %5195 = vmatmul.msk.f32.gmra.mxu3 %vm291_vm1, %v6623_v63 }
 0x1ae   : > { %5246 = vmatmul.msk.f32.gmra.mxu2 %vm291_vm1, %v6677_v57 }
 0x1af   : > { %5212 = vmatmul.msk.f32.gmra.mxu0 %vm291_vm1, %v6381_v17  ;;  %1685 = vst.msk [vmem:[%s6487_s6 + $0x58] sm:$0xff] %vm244_vm2, %v1669_v59  ;;  %v1705_v29 = vsel %vm244_vm2, %v1669_v59, 0.0  ;;  %v1739_v1 = vmul.f32 %v1669_v59, %v1669_v59  ;;  %v1617_v17 = vpop.permute.xlu0 %1616 }
 0x1b0   : > { %5229 = vmatmul.msk.f32.gmra.mxu1 %vm291_vm1, %v6386_v61  ;;  %v1706_v3 = vadd.f32 %v1705_v29, %v1704_v8  ;;  %v1373_v0 = vpop.f32.mrf.mxu3 }
 0x1b1   : > { %v2024_v12 = vpop.f32.mrf.mxu2  ;;  %v1759_v41 = vsel %vm244_vm2, %v1739_v1, 0.0  ;;  %v1409_v6 = vadd.f32 %v1373_v0, %v6353_v43  ;;  %v6731_v0 = vld [vmem:[%s5727_s30 + $0xf9] sm:$0xff] }
 0x1b2   : > { %v6692_v22 = vadd.f32 %v2024_v12, %v1908_v56  ;;  %v1760_v26 = vadd.f32 %v1759_v41, %v1758_v15 }
 0x1b3   : > { %v1558_v61 = vadd.f32 %v1522_v18, %v1409_v6 }
 0x1b4   : > { %v1525_v33 = vpop.f32.mrf.mxu0 }
 0x1b5   : > { %v1911_v47 = vpop.f32.mrf.mxu1  ;;  %v1670_v60 = vmul.f32 %v1617_v17, %v1558_v61  ;;  %5196 = vmatmul.msk.f32.gmra.mxu3 %vm291_vm1, %v6641_v54 }
 0x1b6   : > { %5247 = vmatmul.msk.f32.gmra.mxu2 %vm291_vm1, %v6695_v32 }
 0x1b7   : > { %5213 = vmatmul.msk.f32.gmra.mxu0 %vm291_vm1, %v6403_v7  ;;  %1686 = vst.msk [vmem:[%s6487_s6 + $0x60] sm:$0xff] %vm244_vm2, %v1670_v60  ;;  %v1707_v43 = vsel %vm244_vm2, %v1670_v60, 0.0  ;;  %v1740_v30 = vmul.f32 %v1670_v60, %v1670_v60  ;;  %v1622_v7 = vpop.permute.xlu1 %1621 }
 0x1b8   : > { %5230 = vmatmul.msk.f32.gmra.mxu1 %vm291_vm1, %v6408_v62  ;;  %v1708_v16 = vadd.f32 %v1707_v43, %v1706_v3  ;;  %v1376_v14 = vpop.f32.mrf.mxu3 }
 0x1b9   : > { %v2027_v36 = vpop.f32.mrf.mxu2  ;;  %v1761_v21 = vsel %vm244_vm2, %v1740_v30, 0.0  ;;  %v1410_v35 = vadd.f32 %v1376_v14, %v6375_v31 }
 0x1ba   : > { %v6710_v8 = vadd.f32 %v2027_v36, %v1911_v47  ;;  %v1762_v27 = vadd.f32 %v1761_v21, %v1760_v26 }
 0x1bb   : > { %v1559_v62 = vadd.f32 %v1525_v33, %v1410_v35 }
 0x1bc   : > { %v1528_v50 = vpop.f32.mrf.mxu0 }
 0x1bd   : > { %v1914_v2 = vpop.f32.mrf.mxu1  ;;  %v1671_v15 = vmul.f32 %v1622_v7, %v1559_v62  ;;  %5197 = vmatmul.msk.f32.gmra.mxu3 %vm291_vm1, %v6659_v25 }
 0x1be   : > { %5248 = vmatmul.msk.f32.gmra.mxu2 %vm291_vm1, %v6713_v49 }
 0x1bf   : > { %5214 = vmatmul.msk.f32.gmra.mxu0 %vm291_vm1, %v6425_v53  ;;  %1687 = vst.msk [vmem:[%s6487_s6 + $0x68] sm:$0xff] %vm244_vm2, %v1671_v15  ;;  %v1709_v31 = vsel %vm244_vm2, %v1671_v15, 0.0  ;;  %v1741_v13 = vmul.f32 %v1671_v15, %v1671_v15  ;;  %v1627_v53 = vpop.permute.xlu2 %1626 }
 0x1c0   : > { %5231 = vmatmul.msk.f32.gmra.mxu1 %vm291_vm1, %v6430_v20  ;;  %v1710_v44 = vadd.f32 %v1709_v31, %v1708_v16  ;;  %v1379_v18 = vpop.f32.mrf.mxu3  ;;  %v6749_v16 = vld [vmem:[%s5727_s30 + $0x101] sm:$0xff] }
 0x1c1   : > { %v2030_v56 = vpop.f32.mrf.mxu2  ;;  %v1763_v59 = vsel %vm244_vm2, %v1741_v13, 0.0  ;;  %v1411_v29 = vadd.f32 %v1379_v18, %v6397_v19  ;;  %v6767_v13 = vld [vmem:[%s5727_s30 + $0x109] sm:$0xff] }
 0x1c2   : > { %v6728_v1 = vadd.f32 %v2030_v56, %v1914_v2  ;;  %v1764_v3 = vadd.f32 %v1763_v59, %v1762_v27 }
 0x1c3   : > { %v1560_v20 = vadd.f32 %v1528_v50, %v1411_v29 }
 0x1c4   : > { %v1531_v12 = vpop.f32.mrf.mxu0 }
 0x1c5   : > { %v1917_v41 = vpop.f32.mrf.mxu1  ;;  %v1672_v6 = vmul.f32 %v1627_v53, %v1560_v20  ;;  %5198 = vmatmul.msk.f32.gmra.mxu3 %vm291_vm1, %v6677_v57 }
 0x1c6   : > { %5249 = vmatmul.msk.f32.gmra.mxu2 %vm291_vm1, %v6731_v0 }
 0x1c7   : > { %5215 = vmatmul.msk.f32.gmra.mxu0 %vm291_vm1, %v6447_v5  ;;  %1688 = vst.msk [vmem:[%s6487_s6 + $0x70] sm:$0xff] %vm244_vm2, %v1672_v6  ;;  %v1711_v19 = vsel %vm244_vm2, %v1672_v6, 0.0  ;;  %v1742_v26 = vmul.f32 %v1672_v6, %v1672_v6  ;;  %v1632_v5 = vpop.permute.xlu0 %1631 }
 0x1c8   : > { %5232 = vmatmul.msk.f32.gmra.mxu1 %vm291_vm1, %v6450_v28  ;;  %v1712_v17 = vadd.f32 %v1711_v19, %v1710_v44  ;;  %v1382_v61 = vpop.f32.mrf.mxu3  ;;  %v6785_v19 = vld [vmem:[%s5727_s30 + $0x111] sm:$0xff] }
 0x1c9   : > { %v2033_v33 = vpop.f32.mrf.mxu2  ;;  %v1765_v47 = vsel %vm244_vm2, %v1742_v26, 0.0  ;;  %v1412_v60 = vadd.f32 %v1382_v61, %v6419_v10 }
 0x1ca   : > { %v6746_v43 = vadd.f32 %v2033_v33, %v1917_v41  ;;  %v1766_v30 = vadd.f32 %v1765_v47, %v1764_v3 }
 0x1cb   : > { %v1561_v28 = vadd.f32 %v1531_v12, %v1412_v60 }
 0x1cc   : > { %v1534_v14 = vpop.f32.mrf.mxu0 }
 0x1cd   : > { %v1920_v36 = vpop.f32.mrf.mxu1  ;;  %v1673_v21 = vmul.f32 %v1632_v5, %v1561_v28  ;;  %5199 = vmatmul.msk.f32.gmra.mxu3 %vm291_vm1, %v6695_v32 }
 0x1ce   : > { %5250 = vmatmul.msk.f32.gmra.mxu2 %vm291_vm1, %v6749_v16 }
 0x1cf   : > { %5216 = vmatmul.msk.f32.gmra.mxu0 %vm291_vm1, %v6471_v42  ;;  %1689 = vst.msk [vmem:[%s6487_s6 + $0x78] sm:$0xff] %vm244_vm2, %v1673_v21  ;;  %v1713_v10 = vsel %vm244_vm2, %v1673_v21, 0.0  ;;  %v1743_v35 = vmul.f32 %v1673_v21, %v1673_v21  ;;  %v1637_v42 = vpop.permute.xlu1 %1636 }
 0x1d0   : > { %5233 = vmatmul.msk.f32.gmra.mxu1 %vm291_vm1, %v6477_v37  ;;  %v1714_v27 = vadd.f32 %v1713_v10, %v1712_v17  ;;  %v1385_v7 = vpop.f32.mrf.mxu3 }
 0x1d1   : > { %v2036_v62 = vpop.f32.mrf.mxu2  ;;  %v1767_v50 = vsel %vm244_vm2, %v1743_v35, 0.0  ;;  %v1413_v2 = vadd.f32 %v1385_v7, %v6441_v4  ;;  %v6809_v7 = vld [vmem:[%s5727_s30 + $0x118] sm:$0xff] }
 0x1d2   : > { %v6764_v15 = vadd.f32 %v2036_v62, %v1920_v36  ;;  %v1768_v31 = vadd.f32 %v1767_v50, %v1766_v30  ;;  %v1647_v36 = vpop.permute.xlu0 %1646 }
 0x1d3   : > { %v1562_v37 = vadd.f32 %v1534_v14, %v1413_v2 }
 0x1d4   : > { %v1537_v44 = vpop.f32.mrf.mxu0 }
 0x1d5   : > { %v1923_v18 = vpop.f32.mrf.mxu1  ;;  %v1674_v56 = vmul.f32 %v1637_v42, %v1562_v37  ;;  %5200 = vmatmul.msk.f32.gmra.mxu3 %vm291_vm1, %v6713_v49 }
 0x1d6   : > { %5251 = vmatmul.msk.f32.gmra.mxu2 %vm291_vm1, %v6767_v13 }
 0x1d7   : > { %5217 = vmatmul.msk.f32.gmra.mxu0 %vm291_vm1, %v6523_v24  ;;  %1690 = vst.msk [vmem:[%s6487_s6 + $0x80] sm:$0xff] %vm244_vm2, %v1674_v56  ;;  %v1715_v4 = vsel %vm244_vm2, %v1674_v56, 0.0  ;;  %v1744_v59 = vmul.f32 %v1674_v56, %v1674_v56  ;;  %v1642_v24 = vpop.permute.xlu2 %1641  ;;  %v6827_v56 = vld [vmem:[%s5727_s30 + $0x121] sm:$0xff] }
 0x1d8   : > { %5234 = vmatmul.msk.f32.gmra.mxu1 %vm291_vm1, %v6533_v40  ;;  %v1716_v29 = vadd.f32 %v1715_v4, %v1714_v27  ;;  %v1388_v3 = vpop.f32.mrf.mxu3  ;;  %v6806_v27 = vld [vmem:[%s5727_s30 + $0x117] sm:$0xff] }
 0x1d9   : > { %v2039_v53 = vpop.f32.mrf.mxu2  ;;  %v1769_v20 = vsel %vm244_vm2, %v1744_v59, 0.0  ;;  %v1414_v12 = vadd.f32 %v1388_v3, %v6460_v9  ;;  %v1652_v59 = vpop.permute.xlu1 %1651  ;;  %v3897_v3 = vld [vmem:[%s7897_s1 + $0x10] sm:$0xf] }
 0x1da   : > { %v6782_v41 = vadd.f32 %v2039_v53, %v1923_v18  ;;  %v1770_v6 = vadd.f32 %v1769_v20, %v1768_v31  ;;  %v3599_v53 = vld [vmem:[%s7897_s1 + $0x8] sm:$0xf]  ;;  %5375 = vmatpush.msk.msrb.mxu2 %vm340_vm0, %v3897_v3 }
 0x1db   : > { %v1563_v40 = vadd.f32 %v1537_v44, %v1414_v12  ;;  %5341 = vmatpush.msk.msrb.mxu0 %vm340_vm0, %v3599_v53  ;;  %v1662_v53 = vpop.permute.xlu0 %1661 }
 0x1dc   : > { %v1540_v26 = vpop.f32.mrf.mxu0 }
 0x1dd   : > { %v1926_v17 = vpop.f32.mrf.mxu1  ;;  %v1675_v61 = vmul.f32 %v1642_v24, %v1563_v40  ;;  %5201 = vmatmul.msk.f32.gmra.mxu3 %vm291_vm1, %v6731_v0  ;;  %v6842_v24 = vld [vmem:[%s5727_s30 + $0x120] sm:$0xff]  ;;  %v3748_v40 = vld [vmem:[%s7897_s1 + $0xc] sm:$0xf] }
 0x1de   : > { %5252 = vmatmul.msk.f32.gmra.mxu2 %vm291_vm1, %v6785_v19  ;;  %5358 = vmatpush.msk.msrb.mxu1 %vm340_vm0, %v3748_v40 }
 0x1df   : > { %5218 = vmatmul.msk.f32.gmra.mxu0 %vm291_vm1, %v6557_v58  ;;  %1691 = vst.msk [vmem:[%s6487_s6 + $0x88] sm:$0xff] %vm244_vm2, %v1675_v61  ;;  %v1717_v9 = vsel %vm244_vm2, %v1675_v61, 0.0  ;;  %v1745_v33 = vmul.f32 %v1675_v61, %v1675_v61 }
 0x1e0   : > { %5235 = vmatmul.msk.f32.gmra.mxu1 %vm291_vm1, %v6563_v52  ;;  %v1718_v47 = vadd.f32 %v1717_v9, %v1716_v29  ;;  %v1391_v60 = vpop.f32.mrf.mxu3  ;;  %v6803_v52 = vld [vmem:[%s5727_s30 + $0x119] sm:$0xff] }
 0x1e1   : > { %v2042_v30 = vpop.f32.mrf.mxu2  ;;  %v1771_v5 = vsel %vm244_vm2, %v1745_v33, 0.0  ;;  %v1415_v28 = vadd.f32 %v1391_v60, %v6504_v23  ;;  %v3333_v29 = vld [vmem:[%s7897_s1] sm:$0xf] }
 0x1e2   : > { %v6800_v14 = vadd.f32 %v2042_v30, %v1926_v17  ;;  %v1772_v58 = vadd.f32 %v1771_v5, %v1770_v6  ;;  %v6839_v6 = vld [vmem:[%s5727_s30 + $0x11f] sm:$0xff]  ;;  %5324 = vmatpush.msk.msrb.mxu3 %vm340_vm0, %v3333_v29 }
 0x1e3   : > { %v1564_v21 = vadd.f32 %v1540_v26, %v1415_v28 }
 0x1e4   : > { %v1543_v10 = vpop.f32.mrf.mxu0 }
 0x1e5   : > { %v1929_v35 = vpop.f32.mrf.mxu1  ;;  %v1676_v62 = vmul.f32 %v1647_v36, %v1564_v21  ;;  %5202 = vmatmul.msk.f32.gmra.mxu3 %vm291_vm1, %v6749_v16  ;;  %v6867_v36 = vld [vmem:[%s5727_s30 + $0x129] sm:$0xff] }
 0x1e6   : > { %5253 = vmatmul.msk.f32.gmra.mxu2 %vm291_vm1, %v6803_v52 }
 0x1e7   : > { %5219 = vmatmul.msk.f32.gmra.mxu0 %vm291_vm1, %v6806_v27  ;;  %1692 = vst.msk [vmem:[%s6487_s6 + $0x90] sm:$0xff] %vm244_vm2, %v1676_v62  ;;  %v1719_v23 = vsel %vm244_vm2, %v1676_v62, 0.0  ;;  %v1746_v50 = vmul.f32 %v1676_v62, %v1676_v62  ;;  %v6870_v62 = vld [vmem:[%s5727_s30 + $0x127] sm:$0xff] }
 0x1e8   : > { %5236 = vmatmul.msk.f32.gmra.mxu1 %vm291_vm1, %v6809_v7  ;;  %v1720_v2 = vadd.f32 %v1719_v23, %v1718_v47  ;;  %v1394_v31 = vpop.f32.mrf.mxu3  ;;  %v6873_v23 = vld [vmem:[%s5727_s30 + $0x128] sm:$0xff] }
 0x1e9   : > { %v2045_v42 = vpop.f32.mrf.mxu2  ;;  %v1773_v37 = vsel %vm244_vm2, %v1746_v50, 0.0  ;;  %v1416_v44 = vadd.f32 %v1394_v31, %v6551_v39  ;;  %v3097_v50 = vld [vmem:[%s7898_s2 + $0x80] sm:$0xff] }
 0x1ea   : > { %v6824_v18 = vadd.f32 %v2045_v42, %v1929_v35  ;;  %v1774_v4 = vadd.f32 %v1773_v37, %v1772_v58  ;;  %v1657_v58 = vpop.permute.xlu2 %1656  ;;  %3115 = vperm.xlu1 %5513, %v3097_v50   ;;  %v3099_v50 = vld [vmem:[%s7898_s2 + $0x90] sm:$0xff] }
 0x1eb   : > { %v1565_v39 = vadd.f32 %v1543_v10, %v1416_v44  ;;  %3125 = vperm.xlu0 %5512, %v3099_v50  }
 0x1ec   : > { %v1546_v20 = vpop.f32.mrf.mxu0 }
 0x1ed   : > { %v1932_v12 = vpop.f32.mrf.mxu1  ;;  %v1677_v26 = vmul.f32 %v1652_v59, %v1565_v39  ;;  %5203 = vmatmul.msk.f32.gmra.mxu3 %vm291_vm1, %v6767_v13  ;;  %v2650_v39 = vld [vmem:[%s5727_s30 + $0xc7] sm:$0xff] }
 0x1ee   : > { %5254 = vmatmul.msk.f32.gmra.mxu2 %vm291_vm1, %v6827_v56 }
 0x1ef   : > { %5220 = vmatmul.msk.f32.gmra.mxu0 %vm291_vm1, %v6839_v6  ;;  %1693 = vst.msk [vmem:[%s6487_s6 + $0x98] sm:$0xff] %vm244_vm2, %v1677_v26  ;;  %v1721_v17 = vsel %vm244_vm2, %v1677_v26, 0.0  ;;  %v1747_v61 = vmul.f32 %v1677_v26, %v1677_v26  ;;  %v2799_v26 = vld [vmem:[%s5727_s30 + $0xc8] sm:$0xff] }
 0x1f0   : > { %5237 = vmatmul.msk.f32.gmra.mxu1 %vm291_vm1, %v6842_v24  ;;  %v1722_v9 = vadd.f32 %v1721_v17, %v1720_v2  ;;  %v1397_v33 = vpop.f32.mrf.mxu3 }
 0x1f1   : > { %v2048_v47 = vpop.f32.mrf.mxu2  ;;  %v1775_v60 = vsel %vm244_vm2, %v1747_v61, 0.0  ;;  %v1417_v30 = vadd.f32 %v1397_v33, %v6573_v38 }
 0x1f2   : > { %v6864_v5 = vadd.f32 %v2048_v47, %v1932_v12  ;;  %v1776_v28 = vadd.f32 %v1775_v60, %v1774_v4 }
 0x1f3   : > { %v1566_v21 = vadd.f32 %v1546_v20, %v1417_v30 }
 0x1f4   : > { %v1549_v10 = vpop.f32.mrf.mxu0 }
 0x1f5   : > { %v1935_v35 = vpop.f32.mrf.mxu1  ;;  %v1678_v38 = vmul.f32 %v1657_v58, %v1566_v21  ;;  %5204 = vmatmul.msk.f32.gmra.mxu3 %vm291_vm1, %v6785_v19  ;;  %v2651_v58 = vld [vmem:[%s5727_s30 + $0xcf] sm:$0xff] }
 0x1f6   : > { %5255 = vmatmul.msk.f32.gmra.mxu2 %vm291_vm1, %v6867_v36 }
 0x1f7   : > { %5221 = vmatmul.msk.f32.gmra.mxu0 %vm291_vm1, %v6870_v62  ;;  %1694 = vst.msk [vmem:[%s6487_s6 + $0xa0] sm:$0xff] %vm244_vm2, %v1678_v38  ;;  %v1723_v2 = vsel %vm244_vm2, %v1678_v38, 0.0  ;;  %v1748_v31 = vmul.f32 %v1678_v38, %v1678_v38 }
 0x1f8   : > { %5238 = vmatmul.msk.f32.gmra.mxu1 %vm291_vm1, %v6873_v23  ;;  %v1724_v42 = vadd.f32 %v1723_v2, %v1722_v9  ;;  %v1400_v37 = vpop.f32.mrf.mxu3 }
 0x1f9   : > { %v2051_v44 = vpop.f32.mrf.mxu2  ;;  %v1777_v4 = vsel %vm244_vm2, %v1748_v31, 0.0  ;;  %v1418_v59 = vadd.f32 %v1400_v37, %v6587_v11  ;;  %v2652_v37 = vld [vmem:[%s5727_s30 + $0xd7] sm:$0xff] }
 0x1fa   : > { %v6891_v29 = vadd.f32 %v2051_v44, %v1935_v35  ;;  %v1778_v3 = vadd.f32 %v1777_v4, %v1776_v28  ;;  %v2800_v35 = vld [vmem:[%s5727_s30 + $0xd0] sm:$0xff] }
 0x1fb   : > { %v1567_v20 = vadd.f32 %v1549_v10, %v1418_v59 }
 0x1fc   : > { %v2288_v12 = vpop.f32.mrf.mxu0 }
 0x1fd   : > { %v2437_v40 = vpop.f32.mrf.mxu1  ;;  %v1679_v17 = vmul.f32 %v1662_v53, %v1567_v20  ;;  %5257 = vmatmul.msk.f32.vlgmr.msra.gmra.mxu3 %vm291_vm1, %v2650_v39  ;;  %v3100_v53 = vld [vmem:[%s7898_s2 + $0x98] sm:$0xff] }
 0x1fe   : > { %5308 = vmatmul.msk.f32.vlgmr.msra.gmra.mxu2 %vm291_vm1, %v6809_v7  ;;  %3130 = vperm.xlu1 %5513, %v3100_v53  }
 0x1ff   : > { %5274 = vmatmul.msk.f32.vlgmr.msra.gmra.mxu0 %vm291_vm1, %v2799_v26  ;;  %1695 = vst.msk [vmem:[%s6487_s6 + $0xa8] sm:$0xff] %vm244_vm2, %v1679_v17  ;;  %v1725_v11 = vsel %vm244_vm2, %v1679_v17, 0.0  ;;  %v1749_v61 = vmul.f32 %v1679_v17, %v1679_v17  ;;  %v6940_v26 = vld [vmem:[%s5727_s30 + $0x130] sm:$0xff] }
 0x200   : > { %5291 = vmatmul.msk.f32.vlgmr.msra.gmra.mxu1 %vm291_vm1, %v6623_v63  ;;  %v6904_v9 = vadd.f32 %v1725_v11, %v1724_v42  ;;  %v2139_v33 = vpop.f32.mrf.mxu3 }
 0x201   : > { %v2586_v47 = vpop.f32.mrf.mxu2  ;;  %v1779_v60 = vsel %vm244_vm2, %v1749_v61, 0.0  ;;  %v2187_v30 = vadd.f32 %v2139_v33, %v6590_v45  ;;  %v2802_v33 = vld [vmem:[%s5727_s30 + $0xe0] sm:$0xff] }
 0x202   : > { %v6908_v28 = vadd.f32 %v1779_v60, %v1778_v3  ;;  %v2801_v3 = vld [vmem:[%s5727_s30 + $0xd8] sm:$0xff] }
 0x203   : > { %v2336_v21 = vadd.f32 %v2288_v12, %v2187_v30 }
 0x204   : > { %v2291_v10 = vpop.f32.mrf.mxu0 }
 0x205   : > { %v2440_v63 = vpop.f32.mrf.mxu1  ;;  %v2485_v38 = vadd.f32 %v2437_v40, %v2336_v21  ;;  %5258 = vmatmul.msk.f32.gmra.mxu3 %vm291_vm1, %v2651_v58  ;;  %v2653_v40 = vld [vmem:[%s5727_s30 + $0xdf] sm:$0xff]  ;;  %v2654_v21 = vld [vmem:[%s5727_s30 + $0xe7] sm:$0xff] }
 0x206   : > { %5309 = vmatmul.msk.f32.gmra.mxu2 %vm291_vm1, %v6842_v24 }
 0x207   : > { %5275 = vmatmul.msk.f32.gmra.mxu0 %vm291_vm1, %v2800_v35  ;;  %v6921_v45 = vadd.f32 %v2586_v47, %v2485_v38  ;;  %v3098_v47 = vld [vmem:[%s7898_s2 + $0x88] sm:$0xff] }
 0x208   : > { %5292 = vmatmul.msk.f32.gmra.mxu1 %vm291_vm1, %v6641_v54  ;;  %v2142_v2 = vpop.f32.mrf.mxu3  ;;  %3120 = vperm.xlu2 %5514, %v3098_v47   ;;  %v2803_v38 = vld [vmem:[%s5727_s30 + $0xe8] sm:$0xff] }
 0x209   : > { %v2589_v31 = vpop.f32.mrf.mxu2  ;;  %v2188_v42 = vadd.f32 %v2142_v2, %v6603_v51  ;;  %v3102_v2 = vld [vmem:[%s7898_s2 + $0xa8] sm:$0xff] }
 0x20a   : > { %3140 = vperm.xlu0 %5512, %v3102_v2  }
 0x20b   : > { %v2337_v44 = vadd.f32 %v2291_v10, %v2188_v42  ;;  %v6957_v10 = vld [vmem:[%s5727_s30 + $0x138] sm:$0xff] }
 0x20c   : > { %v2294_v4 = vpop.f32.mrf.mxu0 }
 0x20d   : > { %v2443_v59 = vpop.f32.mrf.mxu1  ;;  %v2486_v54 = vadd.f32 %v2440_v63, %v2337_v44  ;;  %5259 = vmatmul.msk.f32.gmra.mxu3 %vm291_vm1, %v2652_v37  ;;  %v2655_v44 = vld [vmem:[%s5727_s30 + $0xef] sm:$0xff] }
 0x20e   : > { %5310 = vmatmul.msk.f32.gmra.mxu2 %vm291_vm1, %v6873_v23 }
 0x20f   : > { %5276 = vmatmul.msk.f32.gmra.mxu0 %vm291_vm1, %v2801_v3  ;;  %v6935_v51 = vadd.f32 %v2589_v31, %v2486_v54  ;;  %v2804_v54 = vld [vmem:[%s5727_s30 + $0xf0] sm:$0xff] }
 0x210   : > { %5293 = vmatmul.msk.f32.gmra.mxu1 %vm291_vm1, %v6659_v25  ;;  %v2145_v39 = vpop.f32.mrf.mxu3 }
 0x211   : > { %v2592_v20 = vpop.f32.mrf.mxu2  ;;  %v2189_v12 = vadd.f32 %v2145_v39, %v6620_v46  ;;  %v3103_v39 = vld [vmem:[%s7898_s2 + $0xb0] sm:$0xff] }
 0x212   : > { %3145 = vperm.xlu1 %5513, %v3103_v39  }
 0x213   : > { %v2338_v17 = vadd.f32 %v2294_v4, %v2189_v12  ;;  %v6974_v4 = vld [vmem:[%s5727_s30 + $0x140] sm:$0xff] }
 0x214   : > { %v2297_v11 = vpop.f32.mrf.mxu0 }
 0x215   : > { %v2446_v61 = vpop.f32.mrf.mxu1  ;;  %v2487_v25 = vadd.f32 %v2443_v59, %v2338_v17  ;;  %5260 = vmatmul.msk.f32.gmra.mxu3 %vm291_vm1, %v2653_v40  ;;  %v2656_v17 = vld [vmem:[%s5727_s30 + $0xf7] sm:$0xff] }
 0x216   : > { %5311 = vmatmul.msk.f32.gmra.mxu2 %vm291_vm1, %v6940_v26 }
 0x217   : > { %5277 = vmatmul.msk.f32.gmra.mxu0 %vm291_vm1, %v2802_v33  ;;  %v6952_v46 = vadd.f32 %v2592_v20, %v2487_v25  ;;  %v2805_v25 = vld [vmem:[%s5727_s30 + $0xf8] sm:$0xff] }
 0x218   : > { %5294 = vmatmul.msk.f32.gmra.mxu1 %vm291_vm1, %v6677_v57  ;;  %v2148_v60 = vpop.f32.mrf.mxu3 }
 0x219   : > { %v2595_v30 = vpop.f32.mrf.mxu2  ;;  %v2190_v58 = vadd.f32 %v2148_v60, %v6638_v34  ;;  %v3101_v60 = vld [vmem:[%s7898_s2 + $0xa0] sm:$0xff] }
 0x21a   : > { %3135 = vperm.xlu2 %5514, %v3101_v60  }
 0x21b   : > { %v2339_v63 = vadd.f32 %v2297_v11, %v2190_v58  ;;  %v6991_v11 = vld [vmem:[%s5727_s30 + $0x148] sm:$0xff] }
 0x21c   : > { %v2300_v35 = vpop.f32.mrf.mxu0 }
 0x21d   : > { %v2449_v50 = vpop.f32.mrf.mxu1  ;;  %v2488_v57 = vadd.f32 %v2446_v61, %v2339_v63  ;;  %5261 = vmatmul.msk.f32.gmra.mxu3 %vm291_vm1, %v2654_v21  ;;  %v2657_v63 = vld [vmem:[%s5727_s30 + $0xff] sm:$0xff] }
 0x21e   : > { %5312 = vmatmul.msk.f32.gmra.mxu2 %vm291_vm1, %v6957_v10 }
 0x21f   : > { %5278 = vmatmul.msk.f32.gmra.mxu0 %vm291_vm1, %v2803_v38  ;;  %v6969_v34 = vadd.f32 %v2595_v30, %v2488_v57  ;;  %v2806_v57 = vld [vmem:[%s5727_s30 + $0x100] sm:$0xff] }
 0x220   : > { %5295 = vmatmul.msk.f32.gmra.mxu1 %vm291_vm1, %v6695_v32  ;;  %v2151_v31 = vpop.f32.mrf.mxu3 }
 0x221   : > { %v2598_v42 = vpop.f32.mrf.mxu2  ;;  %v2191_v37 = vadd.f32 %v2151_v31, %v6656_v55  ;;  %v3105_v31 = vld [vmem:[%s7898_s2 + $0xc0] sm:$0xff] }
 0x222   : > { %3155 = vperm.xlu0 %5512, %v3105_v31   ;;  %v3108_v31 = vld [vmem:[%s7898_s2 + $0xd8] sm:$0xff] }
 0x223   : > { %v2340_v59 = vadd.f32 %v2300_v35, %v2191_v37  ;;  %v7008_v35 = vld [vmem:[%s5727_s30 + $0x150] sm:$0xff] }
 0x224   : > { %v2303_v3 = vpop.f32.mrf.mxu0 }
 0x225   : > { %v2452_v53 = vpop.f32.mrf.mxu1  ;;  %v2489_v32 = vadd.f32 %v2449_v50, %v2340_v59  ;;  %5262 = vmatmul.msk.f32.gmra.mxu3 %vm291_vm1, %v2655_v44  ;;  %v2658_v59 = vld [vmem:[%s5727_s30 + $0x107] sm:$0xff] }
 0x226   : > { %5313 = vmatmul.msk.f32.gmra.mxu2 %vm291_vm1, %v6974_v4 }
 0x227   : > { %5279 = vmatmul.msk.f32.gmra.mxu0 %vm291_vm1, %v2804_v54  ;;  %v6986_v55 = vadd.f32 %v2598_v42, %v2489_v32  ;;  %v2807_v32 = vld [vmem:[%s5727_s30 + $0x108] sm:$0xff] }
 0x228   : > { %5296 = vmatmul.msk.f32.gmra.mxu1 %vm291_vm1, %v6713_v49  ;;  %v2154_v20 = vpop.f32.mrf.mxu3 }
 0x229   : > { %v2601_v12 = vpop.f32.mrf.mxu2  ;;  %v2192_v40 = vadd.f32 %v2154_v20, %v6674_v48  ;;  %v3106_v20 = vld [vmem:[%s7898_s2 + $0xc8] sm:$0xff] }
 0x22a   : > { %3160 = vperm.xlu1 %5513, %v3106_v20   ;;  %3170 = vperm.xlu0 %5512, %v3108_v31   ;;  %v4195_v31 = vld [vmem:[%s7897_s1 + $0x18] sm:$0xf] }
 0x22b   : > { %v2341_v61 = vadd.f32 %v2303_v3, %v2192_v40  ;;  %v7025_v3 = vld [vmem:[%s5727_s30 + $0x158] sm:$0xff]  ;;  %5409 = vmatpush.msk.msra.mxu0 %vm340_vm0, %v4195_v31 }
 0x22c   : > { %v2306_v33 = vpop.f32.mrf.mxu0 }
 0x22d   : > { %v2455_v47 = vpop.f32.mrf.mxu1  ;;  %v2490_v49 = vadd.f32 %v2452_v53, %v2341_v61  ;;  %5263 = vmatmul.msk.f32.gmra.mxu3 %vm291_vm1, %v2656_v17  ;;  %v2659_v61 = vld [vmem:[%s5727_s30 + $0x10f] sm:$0xff] }
 0x22e   : > { %5314 = vmatmul.msk.f32.gmra.mxu2 %vm291_vm1, %v6991_v11 }
 0x22f   : > { %5280 = vmatmul.msk.f32.gmra.mxu0 %vm291_vm1, %v2805_v25  ;;  %v7003_v48 = vadd.f32 %v2601_v12, %v2490_v49  ;;  %v2808_v49 = vld [vmem:[%s5727_s30 + $0x110] sm:$0xff] }
 0x230   : > { %5297 = vmatmul.msk.f32.gmra.mxu1 %vm291_vm1, %v6731_v0  ;;  %v2157_v30 = vpop.f32.mrf.mxu3 }
 0x231   : > { %v2604_v58 = vpop.f32.mrf.mxu2  ;;  %v2193_v21 = vadd.f32 %v2157_v30, %v6692_v22  ;;  %v3104_v30 = vld [vmem:[%s7898_s2 + $0xb8] sm:$0xff] }
 0x232   : > { %3150 = vperm.xlu2 %5514, %v3104_v30  }
 0x233   : > { %v2342_v50 = vadd.f32 %v2306_v33, %v2193_v21  ;;  %v7042_v33 = vld [vmem:[%s5727_s30 + $0x160] sm:$0xff] }
 0x234   : > { %v2309_v38 = vpop.f32.mrf.mxu0 }
 0x235   : > { %v2458_v2 = vpop.f32.mrf.mxu1  ;;  %v2491_v0 = vadd.f32 %v2455_v47, %v2342_v50  ;;  %5264 = vmatmul.msk.f32.gmra.mxu3 %vm291_vm1, %v2657_v63  ;;  %v7058_v50 = vld [vmem:[%s5727_s30 + $0x168] sm:$0xff] }
 0x236   : > { %5315 = vmatmul.msk.f32.gmra.mxu2 %vm291_vm1, %v7008_v35 }
 0x237   : > { %5281 = vmatmul.msk.f32.gmra.mxu0 %vm291_vm1, %v2806_v57  ;;  %v7020_v22 = vadd.f32 %v2604_v58, %v2491_v0 }
 0x238   : > { %5298 = vmatmul.msk.f32.gmra.mxu1 %vm291_vm1, %v6749_v16  ;;  %v2160_v42 = vpop.f32.mrf.mxu3 }
 0x239   : > { %v2607_v37 = vpop.f32.mrf.mxu2  ;;  %v2194_v44 = vadd.f32 %v2160_v42, %v6710_v8 }
 0x23b   : > { %v2343_v53 = vadd.f32 %v2309_v38, %v2194_v44  ;;  %v7075_v44 = vld [vmem:[%s5727_s30 + $0x170] sm:$0xff] }
 0x23c   : > { %v2312_v54 = vpop.f32.mrf.mxu0 }
 0x23d   : > { %v2461_v39 = vpop.f32.mrf.mxu1  ;;  %v2492_v16 = vadd.f32 %v2458_v2, %v2343_v53  ;;  %5265 = vmatmul.msk.f32.gmra.mxu3 %vm291_vm1, %v2658_v59 }
 0x23e   : > { %5316 = vmatmul.msk.f32.gmra.mxu2 %vm291_vm1, %v7025_v3 }
 0x23f   : > { %5282 = vmatmul.msk.f32.gmra.mxu0 %vm291_vm1, %v2807_v32  ;;  %v7037_v8 = vadd.f32 %v2607_v37, %v2492_v16 }
 0x240   : > { %5299 = vmatmul.msk.f32.gmra.mxu1 %vm291_vm1, %v6767_v13  ;;  %v2163_v12 = vpop.f32.mrf.mxu3 }
 0x241   : > { %v2610_v40 = vpop.f32.mrf.mxu2  ;;  %v2195_v17 = vadd.f32 %v2163_v12, %v6728_v1  ;;  %v7092_v12 = vld [vmem:[%s5727_s30 + $0x178] sm:$0xff] }
 0x243   : > { %v2344_v47 = vadd.f32 %v2312_v54, %v2195_v17 }
 0x244   : > { %v2315_v25 = vpop.f32.mrf.mxu0 }
 0x245   : > { %v2464_v60 = vpop.f32.mrf.mxu1  ;;  %v2493_v13 = vadd.f32 %v2461_v39, %v2344_v47  ;;  %5266 = vmatmul.msk.f32.gmra.mxu3 %vm291_vm1, %v2659_v61  ;;  %v3109_v39 = vld [vmem:[%s7898_s2 + $0xe0] sm:$0xff] }
 0x246   : > { %5317 = vmatmul.msk.f32.gmra.mxu2 %vm291_vm1, %v7042_v33  ;;  %3175 = vperm.xlu1 %5513, %v3109_v39  }
 0x247   : > { %5283 = vmatmul.msk.f32.gmra.mxu0 %vm291_vm1, %v2808_v49  ;;  %v7054_v1 = vadd.f32 %v2610_v40, %v2493_v13  ;;  %v7113_v13 = vld [vmem:[%s5727_s30 + $0x12f] sm:$0xff] }
 0x248   : > { %5300 = vmatmul.msk.f32.gmra.mxu1 %vm291_vm1, %v6785_v19  ;;  %v2166_v58 = vpop.f32.mrf.mxu3 }
 0x249   : > { %v2613_v21 = vpop.f32.mrf.mxu2  ;;  %v2196_v63 = vadd.f32 %v2166_v58, %v6746_v43  ;;  %v7116_v58 = vld [vmem:[%s5727_s30 + $0x180] sm:$0xff] }
 0x24b   : > { %v2345_v38 = vadd.f32 %v2315_v25, %v2196_v63 }
 0x24c   : > { %v2318_v2 = vpop.f32.mrf.mxu0 }
 0x24d   : > { %v2467_v57 = vpop.f32.mrf.mxu1  ;;  %v2494_v0 = vadd.f32 %v2464_v60, %v2345_v38  ;;  %5267 = vmatmul.msk.f32.gmra.mxu3 %vm291_vm1, %v6806_v27 }
 0x24e   : > { %5318 = vmatmul.msk.f32.gmra.mxu2 %vm291_vm1, %v7058_v50 }
 0x24f   : > { %5284 = vmatmul.msk.f32.gmra.mxu0 %vm291_vm1, %v6809_v7  ;;  %v7071_v43 = vadd.f32 %v2613_v21, %v2494_v0 }
 0x250   : > { %5301 = vmatmul.msk.f32.gmra.mxu1 %vm291_vm1, %v6803_v52  ;;  %v2169_v19 = vpop.f32.mrf.mxu3 }
 0x251   : > { %v2616_v42 = vpop.f32.mrf.mxu2  ;;  %v2197_v37 = vadd.f32 %v2169_v19, %v6764_v15 }
 0x253   : > { %v2346_v59 = vadd.f32 %v2318_v2, %v2197_v37  ;;  %v7119_v2 = vld [vmem:[%s5727_s30 + $0x131] sm:$0xff] }
 0x254   : > { %v2321_v53 = vpop.f32.mrf.mxu0 }
 0x255   : > { %v2470_v54 = vpop.f32.mrf.mxu1  ;;  %v2495_v7 = vadd.f32 %v2467_v57, %v2346_v59  ;;  %5268 = vmatmul.msk.f32.gmra.mxu3 %vm291_vm1, %v6839_v6  ;;  %v3111_v57 = vld [vmem:[%s7898_s2 + $0xf0] sm:$0xff] }
 0x256   : > { %5319 = vmatmul.msk.f32.gmra.mxu2 %vm291_vm1, %v7075_v44  ;;  %3185 = vperm.xlu0 %5512, %v3111_v57   ;;  %v7144_v59 = vld [vmem:[%s5727_s30 + $0x137] sm:$0xff] }
 0x257   : > { %5285 = vmatmul.msk.f32.gmra.mxu0 %vm291_vm1, %v6842_v24  ;;  %v7088_v15 = vadd.f32 %v2616_v42, %v2495_v7  ;;  %v3107_v24 = vld [vmem:[%s7898_s2 + $0xd0] sm:$0xff] }
 0x258   : > { %5302 = vmatmul.msk.f32.gmra.mxu1 %vm291_vm1, %v6827_v56  ;;  %v2172_v32 = vpop.f32.mrf.mxu3  ;;  %3165 = vperm.xlu2 %5514, %v3107_v24  }
 0x259   : > { %v2619_v20 = vpop.f32.mrf.mxu2  ;;  %v2198_v16 = vadd.f32 %v2172_v32, %v6782_v41  ;;  %v4046_v41 = vld [vmem:[%s7897_s1 + $0x14] sm:$0xf]  ;;  %v7150_v32 = vld [vmem:[%s5727_s30 + $0x139] sm:$0xff] }
 0x25a   : > { %5392 = vmatpush.msk.msra.mxu3 %vm340_vm0, %v4046_v41  ;;  %v7174_v41 = vld [vmem:[%s5727_s30 + $0x190] sm:$0xff] }
 0x25b   : > { %v2347_v40 = vadd.f32 %v2321_v53, %v2198_v16  ;;  %v7147_v53 = vld [vmem:[%s5727_s30 + $0x188] sm:$0xff]  ;;  %v3112_v16 = vld [vmem:[%s7898_s2 + $0xf8] sm:$0xff] }
 0x25c   : > { %v2324_v17 = vpop.f32.mrf.mxu0  ;;  %3190 = vperm.xlu1 %5513, %v3112_v16  }
 0x25d   : > { %v2473_v61 = vpop.f32.mrf.mxu1  ;;  %v2496_v47 = vadd.f32 %v2470_v54, %v2347_v40  ;;  %5269 = vmatmul.msk.f32.gmra.mxu3 %vm291_vm1, %v6870_v62 }
 0x25e   : > { %5320 = vmatmul.msk.f32.gmra.mxu2 %vm291_vm1, %v7092_v12 }
 0x25f   : > { %5286 = vmatmul.msk.f32.gmra.mxu0 %vm291_vm1, %v6873_v23  ;;  %v7108_v25 = vadd.f32 %v2619_v20, %v2496_v47  ;;  %v4493_v23 = vld [vmem:[%s7897_s1 + $0x20] sm:$0xf]  ;;  %v4344_v20 = vld [vmem:[%s7897_s1 + $0x1c] sm:$0xf] }
 0x260   : > { %5303 = vmatmul.msk.f32.gmra.mxu1 %vm291_vm1, %v6867_v36  ;;  %v2175_v60 = vpop.f32.mrf.mxu3  ;;  %5443 = vmatpush.msk.msra.mxu2 %vm340_vm0, %v4493_v23  ;;  %v7171_v47 = vld [vmem:[%s5727_s30 + $0x13f] sm:$0xff] }
 0x261   : > { %v2622_v49 = vpop.f32.mrf.mxu2  ;;  %v2199_v30 = vadd.f32 %v2175_v60, %v6800_v14  ;;  %5426 = vmatpush.msk.msra.mxu1 %vm340_vm0, %v4344_v20 }
 0x263   : > { %v2348_v21 = vadd.f32 %v2324_v17, %v2199_v30 }
 0x264   : > { %v2327_v63 = vpop.f32.mrf.mxu0 }
 0x265   : > { %v2476_v38 = vpop.f32.mrf.mxu1  ;;  %v2497_v14 = vadd.f32 %v2473_v61, %v2348_v21  ;;  %5270 = vmatmul.msk.f32.gmra.mxu3 %vm291_vm1, %v7113_v13  ;;  %v7177_v21 = vld [vmem:[%s5727_s30 + $0x141] sm:$0xff] }
 0x266   : > { %5321 = vmatmul.msk.f32.gmra.mxu2 %vm291_vm1, %v7116_v58 }
 0x267   : > { %5287 = vmatmul.msk.f32.gmra.mxu0 %vm291_vm1, %v6940_v26  ;;  %v7139_v0 = vadd.f32 %v2622_v49, %v2497_v14 }
 0x268   : > { %5304 = vmatmul.msk.f32.gmra.mxu1 %vm291_vm1, %v7119_v2  ;;  %v2178_v19 = vpop.f32.mrf.mxu3 }
 0x269   : > { %v2625_v42 = vpop.f32.mrf.mxu2  ;;  %v2200_v37 = vadd.f32 %v2178_v19, %v6824_v18 }
 0x26b   : > { %v2349_v54 = vadd.f32 %v2327_v63, %v2200_v37  ;;  %v3110_v63 = vld [vmem:[%s7898_s2 + $0xe8] sm:$0xff] }
 0x26c   : > { %v2330_v39 = vpop.f32.mrf.mxu0  ;;  %3180 = vperm.xlu2 %5514, %v3110_v63  }
 0x26d   : > { %v2479_v7 = vpop.f32.mrf.mxu1  ;;  %v2498_v18 = vadd.f32 %v2476_v38, %v2349_v54  ;;  %5271 = vmatmul.msk.f32.gmra.mxu3 %vm291_vm1, %v7144_v59 }
 0x26e   : > { %5322 = vmatmul.msk.f32.gmra.mxu2 %vm291_vm1, %v7147_v53 }
 0x26f   : > { %5288 = vmatmul.msk.f32.gmra.mxu0 %vm291_vm1, %v6957_v10  ;;  %v7167_v40 = vadd.f32 %v2625_v42, %v2498_v18  ;;  %v3116_v18 = vpop.permute.xlu1 %3115 }
 0x270   : > { %5305 = vmatmul.msk.f32.gmra.mxu1 %vm291_vm1, %v7150_v32  ;;  %v2181_v17 = vpop.f32.mrf.mxu3 }
 0x271   : > { %v2628_v61 = vpop.f32.mrf.mxu2  ;;  %v2201_v24 = vadd.f32 %v2181_v17, %v6864_v5 }
 0x273   : > { %v2350_v60 = vadd.f32 %v2330_v39, %v2201_v24 }
 0x274   : > { %v2333_v49 = vpop.f32.mrf.mxu0 }
 0x275   : > { %v2482_v30 = vpop.f32.mrf.mxu1  ;;  %v2499_v38 = vadd.f32 %v2479_v7, %v2350_v60  ;;  %5272 = vmatmul.msk.f32.gmra.mxu3 %vm291_vm1, %v7171_v47 }
 0x276   : > { %5323 = vmatmul.msk.f32.gmra.mxu2 %vm291_vm1, %v7174_v41 }
 0x277   : > { %5289 = vmatmul.msk.f32.gmra.mxu0 %vm291_vm1, %v6974_v4  ;;  %v7190_v5 = vadd.f32 %v2628_v61, %v2499_v38 }
 0x278   : > { %5306 = vmatmul.msk.f32.gmra.mxu1 %vm291_vm1, %v7177_v21  ;;  %v2184_v23 = vpop.f32.mrf.mxu3 }
 0x279   : > { %v2631_v57 = vpop.f32.mrf.mxu2  ;;  %v2202_v14 = vadd.f32 %v2184_v23, %v6891_v29 }
 0x27b   : > { %v2351_v31 = vadd.f32 %v2333_v49, %v2202_v14  ;;  %v3121_v49 = vpop.permute.xlu2 %3120 }
 0x27c   : > { %v2884_v19 = vpop.f32.mrf.mxu0 }
 0x27d   : > { %v3033_v42 = vpop.f32.mrf.mxu1  ;;  %v2500_v37 = vadd.f32 %v2482_v30, %v2351_v31  ;;  %5325 = vmatmul.msk.f32.vlgmr.msrb.gmra.mxu3 %vm291_vm1, %v6806_v27 }
 0x27e   : > { %5376 = vmatmul.msk.f32.vlgmr.msrb.gmra.mxu2 %vm291_vm1, %v6940_v26 }
 0x27f   : > { %5342 = vmatmul.msk.f32.vlgmr.msrb.gmra.mxu0 %vm291_vm1, %v6803_v52  ;;  %v7201_v54 = vadd.f32 %v2631_v57, %v2500_v37  ;;  %v7237_v37 = vld [vmem:[%s5727_s30 + $0x147] sm:$0xff] }
 0x280   : > { %5359 = vmatmul.msk.f32.vlgmr.msrb.gmra.mxu1 %vm291_vm1, %v7113_v13  ;;  %v2735_v29 = vpop.f32.mrf.mxu3 }
 0x281   : > { %v7203_v39 = vpop.f32.mrf.mxu2  ;;  %v2783_v7 = vadd.f32 %v2735_v29, %v6921_v45 }
 0x283   : > { %v2932_v20 = vadd.f32 %v2884_v19, %v2783_v7  ;;  %v3126_v7 = vpop.permute.xlu0 %3125 }
 0x284   : > { %v2887_v16 = vpop.f32.mrf.mxu0 }
 0x285   : > { %v3036_v27 = vpop.f32.mrf.mxu1  ;;  %v3081_v17 = vadd.f32 %v3033_v42, %v2932_v20  ;;  %5326 = vmatmul.msk.f32.gmra.mxu3 %vm291_vm1, %v6839_v6 }
 0x286   : > { %5377 = vmatmul.msk.f32.gmra.mxu2 %vm291_vm1, %v6957_v10 }
 0x287   : > { %5343 = vmatmul.msk.f32.gmra.mxu0 %vm291_vm1, %v6827_v56  ;;  %v3193_v52 = vmul.f32 %v3116_v18, %v3081_v17 }
 0x288   : > { %5360 = vmatmul.msk.f32.gmra.mxu1 %vm291_vm1, %v7144_v59  ;;  %v2738_v26 = vpop.f32.mrf.mxu3 }
 0x289   : > { %v7214_v45 = vpop.f32.mrf.mxu2  ;;  %3209 = vst.msk [vmem:[%s6487_s6 + $0xb0] sm:$0xff] %vm244_vm2, %v3193_v52  ;;  %v2784_v61 = vadd.f32 %v2738_v26, %v6935_v51  ;;  %v3263_v56 = vmul.f32 %v3193_v52, %v3193_v52  ;;  %v3225_v38 = vsel %vm244_vm2, %v3193_v52, 0.0 }
 0x28b   : > { %v2933_v24 = vadd.f32 %v2887_v16, %v2784_v61 }
 0x28c   : > { %v2890_v6 = vpop.f32.mrf.mxu0 }
 0x28d   : > { %v3039_v60 = vpop.f32.mrf.mxu1  ;;  %v3082_v10 = vadd.f32 %v3036_v27, %v2933_v24  ;;  %5327 = vmatmul.msk.f32.gmra.mxu3 %vm291_vm1, %v6870_v62 }
 0x28e   : > { %5378 = vmatmul.msk.f32.gmra.mxu2 %vm291_vm1, %v6974_v4 }
 0x28f   : > { %5344 = vmatmul.msk.f32.gmra.mxu0 %vm291_vm1, %v6867_v36  ;;  %v3194_v51 = vmul.f32 %v3121_v49, %v3082_v10  ;;  %v3279_v36 = vsel %vm244_vm2, %v3263_v56, 0.0  ;;  %v3131_v49 = vpop.permute.xlu1 %3130 }
 0x290   : > { %5361 = vmatmul.msk.f32.gmra.mxu1 %vm291_vm1, %v7171_v47  ;;  %v2741_v30 = vpop.f32.mrf.mxu3 }
 0x291   : > { %v7227_v63 = vpop.f32.mrf.mxu2  ;;  %3210 = vst.msk [vmem:[%s6487_s6 + $0xb8] sm:$0xff] %vm244_vm2, %v3194_v51  ;;  %v3226_v62 = vsel %vm244_vm2, %v3194_v51, 0.0  ;;  %v3264_v23 = vmul.f32 %v3194_v51, %v3194_v51  ;;  %v2785_v4 = vadd.f32 %v2741_v30, %v6952_v46 }
 0x292   : > { %v3227_v57 = vadd.f32 %v3226_v62, %v3225_v38 }
 0x293   : > { %v3280_v14 = vsel %vm244_vm2, %v3264_v23, 0.0  ;;  %v2934_v31 = vadd.f32 %v2890_v6, %v2785_v4  ;;  %v7255_v6 = vld [vmem:[%s5727_s30 + $0x14f] sm:$0xff] }
 0x294   : > { %v2893_v19 = vpop.f32.mrf.mxu0  ;;  %v3281_v29 = vadd.f32 %v3280_v14, %v3279_v36  ;;  %v7273_v36 = vld [vmem:[%s5727_s30 + $0x157] sm:$0xff] }
 0x295   : > { %v3042_v42 = vpop.f32.mrf.mxu1  ;;  %v3083_v20 = vadd.f32 %v3039_v60, %v2934_v31  ;;  %5328 = vmatmul.msk.f32.gmra.mxu3 %vm291_vm1, %v7113_v13  ;;  %v3136_v31 = vpop.permute.xlu2 %3135 }
 0x296   : > { %5379 = vmatmul.msk.f32.gmra.mxu2 %vm291_vm1, %v6991_v11 }
 0x297   : > { %5345 = vmatmul.msk.f32.gmra.mxu0 %vm291_vm1, %v7119_v2  ;;  %v3195_v46 = vmul.f32 %v3126_v7, %v3083_v20 }
 0x298   : > { %5362 = vmatmul.msk.f32.gmra.mxu1 %vm291_vm1, %v7237_v37  ;;  %v2744_v16 = vpop.f32.mrf.mxu3 }
 0x299   : > { %v7247_v27 = vpop.f32.mrf.mxu2  ;;  %3211 = vst.msk [vmem:[%s6487_s6 + $0xc0] sm:$0xff] %vm244_vm2, %v3195_v46  ;;  %v3228_v18 = vsel %vm244_vm2, %v3195_v46, 0.0  ;;  %v3265_v17 = vmul.f32 %v3195_v46, %v3195_v46  ;;  %v2786_v13 = vadd.f32 %v2744_v16, %v6969_v34 }
 0x29a   : > { %v3229_v52 = vadd.f32 %v3228_v18, %v3227_v57 }
 0x29b   : > { %v3282_v11 = vsel %vm244_vm2, %v3265_v17, 0.0  ;;  %v2935_v26 = vadd.f32 %v2893_v19, %v2786_v13  ;;  %v7291_v13 = vld [vmem:[%s5727_s30 + $0x149] sm:$0xff] }
 0x29c   : > { %v2896_v61 = vpop.f32.mrf.mxu0  ;;  %v3283_v60 = vadd.f32 %v3282_v11, %v3281_v29 }
 0x29d   : > { %v3045_v24 = vpop.f32.mrf.mxu1  ;;  %v3084_v10 = vadd.f32 %v3042_v42, %v2935_v26  ;;  %5329 = vmatmul.msk.f32.gmra.mxu3 %vm291_vm1, %v7144_v59  ;;  %v3141_v26 = vpop.permute.xlu0 %3140 }
 0x29e   : > { %5380 = vmatmul.msk.f32.gmra.mxu2 %vm291_vm1, %v7008_v35 }
 0x29f   : > { %5346 = vmatmul.msk.f32.gmra.mxu0 %vm291_vm1, %v7150_v32  ;;  %v3196_v34 = vmul.f32 %v3131_v49, %v3084_v10 }
 0x2a0   : > { %5363 = vmatmul.msk.f32.gmra.mxu1 %vm291_vm1, %v7255_v6  ;;  %v2747_v56 = vpop.f32.mrf.mxu3 }
 0x2a1   : > { %v7265_v51 = vpop.f32.mrf.mxu2  ;;  %3212 = vst.msk [vmem:[%s6487_s6 + $0xc8] sm:$0xff] %vm244_vm2, %v3196_v34  ;;  %v3230_v30 = vsel %vm244_vm2, %v3196_v34, 0.0  ;;  %v3266_v38 = vmul.f32 %v3196_v34, %v3196_v34  ;;  %v2787_v59 = vadd.f32 %v2747_v56, %v6986_v55 }
 0x2a2   : > { %v3231_v62 = vadd.f32 %v3230_v30, %v3229_v52  ;;  %v7294_v52 = vld [vmem:[%s5727_s30 + $0x15f] sm:$0xff] }
 0x2a3   : > { %v3284_v35 = vsel %vm244_vm2, %v3266_v38, 0.0  ;;  %v2936_v23 = vadd.f32 %v2896_v61, %v2787_v59 }
 0x2a4   : > { %v2899_v4 = vpop.f32.mrf.mxu0  ;;  %v3285_v14 = vadd.f32 %v3284_v35, %v3283_v60  ;;  %v7315_v35 = vld [vmem:[%s5727_s30 + $0x167] sm:$0xff] }
 0x2a5   : > { %v3048_v57 = vpop.f32.mrf.mxu1  ;;  %v3085_v19 = vadd.f32 %v3045_v24, %v2936_v23  ;;  %5330 = vmatmul.msk.f32.gmra.mxu3 %vm291_vm1, %v7171_v47 }
 0x2a6   : > { %5381 = vmatmul.msk.f32.gmra.mxu2 %vm291_vm1, %v7025_v3 }
 0x2a7   : > { %5347 = vmatmul.msk.f32.gmra.mxu0 %vm291_vm1, %v7177_v21  ;;  %v3197_v55 = vmul.f32 %v3136_v31, %v3085_v19 }
 0x2a8   : > { %5364 = vmatmul.msk.f32.gmra.mxu1 %vm291_vm1, %v7273_v36  ;;  %v2750_v42 = vpop.f32.mrf.mxu3 }
 0x2a9   : > { %v7283_v29 = vpop.f32.mrf.mxu2  ;;  %3213 = vst.msk [vmem:[%s6487_s6 + $0xd0] sm:$0xff] %vm244_vm2, %v3197_v55  ;;  %v3232_v7 = vsel %vm244_vm2, %v3197_v55, 0.0  ;;  %v3267_v47 = vmul.f32 %v3197_v55, %v3197_v55  ;;  %v2788_v20 = vadd.f32 %v2750_v42, %v7003_v48 }
 0x2aa   : > { %v3233_v46 = vadd.f32 %v3232_v7, %v3231_v62  ;;  %v7312_v62 = vld [vmem:[%s5727_s30 + $0x151] sm:$0xff] }
 0x2ab   : > { %v3286_v3 = vsel %vm244_vm2, %v3267_v47, 0.0  ;;  %v2937_v16 = vadd.f32 %v2899_v4, %v2788_v20  ;;  %v3146_v4 = vpop.permute.xlu1 %3145 }
 0x2ac   : > { %v2902_v18 = vpop.f32.mrf.mxu0  ;;  %v3287_v11 = vadd.f32 %v3286_v3, %v3285_v14  ;;  %v7333_v3 = vld [vmem:[%s5727_s30 + $0x159] sm:$0xff] }
 0x2ad   : > { %v3051_v17 = vpop.f32.mrf.mxu1  ;;  %v3086_v61 = vadd.f32 %v3048_v57, %v2937_v16  ;;  %5331 = vmatmul.msk.f32.gmra.mxu3 %vm291_vm1, %v7237_v37  ;;  %v7336_v16 = vld [vmem:[%s5727_s30 + $0x16f] sm:$0xff] }
 0x2ae   : > { %5382 = vmatmul.msk.f32.gmra.mxu2 %vm291_vm1, %v7042_v33 }
 0x2af   : > { %5348 = vmatmul.msk.f32.gmra.mxu0 %vm291_vm1, %v7291_v13  ;;  %v3198_v48 = vmul.f32 %v3141_v26, %v3086_v61 }
 0x2b0   : > { %5365 = vmatmul.msk.f32.gmra.mxu1 %vm291_vm1, %v7294_v52  ;;  %v2753_v24 = vpop.f32.mrf.mxu3 }
 0x2b1   : > { %v7304_v60 = vpop.f32.mrf.mxu2  ;;  %3214 = vst.msk [vmem:[%s6487_s6 + $0xd8] sm:$0xff] %vm244_vm2, %v3198_v48  ;;  %v3234_v49 = vsel %vm244_vm2, %v3198_v48, 0.0  ;;  %v3268_v10 = vmul.f32 %v3198_v48, %v3198_v48  ;;  %v2789_v34 = vadd.f32 %v2753_v24, %v7020_v22 }
 0x2b2   : > { %v3235_v56 = vadd.f32 %v3234_v49, %v3233_v46 }
 0x2b3   : > { %v3288_v33 = vsel %vm244_vm2, %v3268_v10, 0.0  ;;  %v2938_v30 = vadd.f32 %v2902_v18, %v2789_v34 }
 0x2b4   : > { %v2905_v38 = vpop.f32.mrf.mxu0  ;;  %v3289_v23 = vadd.f32 %v3288_v33, %v3287_v11 }
 0x2b5   : > { %v3054_v59 = vpop.f32.mrf.mxu1  ;;  %v3087_v57 = vadd.f32 %v3051_v17, %v2938_v30  ;;  %5332 = vmatmul.msk.f32.gmra.mxu3 %vm291_vm1, %v7255_v6  ;;  %v3151_v17 = vpop.permute.xlu2 %3150  ;;  %v7354_v30 = vld [vmem:[%s5727_s30 + $0x161] sm:$0xff] }
 0x2b6   : > { %5383 = vmatmul.msk.f32.gmra.mxu2 %vm291_vm1, %v7058_v50 }
 0x2b7   : > { %5349 = vmatmul.msk.f32.gmra.mxu0 %vm291_vm1, %v7312_v62  ;;  %v3199_v22 = vmul.f32 %v3146_v4, %v3087_v57 }
 0x2b8   : > { %5366 = vmatmul.msk.f32.gmra.mxu1 %vm291_vm1, %v7315_v35  ;;  %v2756_v14 = vpop.f32.mrf.mxu3 }
 0x2b9   : > { %v7325_v31 = vpop.f32.mrf.mxu2  ;;  %3215 = vst.msk [vmem:[%s6487_s6 + $0xe0] sm:$0xff] %vm244_vm2, %v3199_v22  ;;  %v3236_v19 = vsel %vm244_vm2, %v3199_v22, 0.0  ;;  %v3269_v55 = vmul.f32 %v3199_v22, %v3199_v22  ;;  %v2790_v42 = vadd.f32 %v2756_v14, %v7037_v8 }
 0x2ba   : > { %v3237_v7 = vadd.f32 %v3236_v19, %v3235_v56 }
 0x2bb   : > { %v3290_v50 = vsel %vm244_vm2, %v3269_v55, 0.0  ;;  %v2939_v47 = vadd.f32 %v2905_v38, %v2790_v42  ;;  %v7357_v38 = vld [vmem:[%s5727_s30 + $0x177] sm:$0xff] }
 0x2bc   : > { %v2908_v20 = vpop.f32.mrf.mxu0  ;;  %v3291_v18 = vadd.f32 %v3290_v50, %v3289_v23  ;;  %v3156_v23 = vpop.permute.xlu0 %3155 }
 0x2bd   : > { %v3057_v46 = vpop.f32.mrf.mxu1  ;;  %v3088_v11 = vadd.f32 %v3054_v59, %v2939_v47  ;;  %5333 = vmatmul.msk.f32.gmra.mxu3 %vm291_vm1, %v7273_v36 }
 0x2be   : > { %5384 = vmatmul.msk.f32.gmra.mxu2 %vm291_vm1, %v7075_v44 }
 0x2bf   : > { %5350 = vmatmul.msk.f32.gmra.mxu0 %vm291_vm1, %v7333_v3  ;;  %v3200_v8 = vmul.f32 %v3151_v17, %v3088_v11  ;;  %v3161_v17 = vpop.permute.xlu1 %3160 }
 0x2c0   : > { %5367 = vmatmul.msk.f32.gmra.mxu1 %vm291_vm1, %v7336_v16  ;;  %v2759_v26 = vpop.f32.mrf.mxu3 }
 0x2c1   : > { %v7346_v61 = vpop.f32.mrf.mxu2  ;;  %3216 = vst.msk [vmem:[%s6487_s6 + $0xe8] sm:$0xff] %vm244_vm2, %v3200_v8  ;;  %v3238_v48 = vsel %vm244_vm2, %v3200_v8, 0.0  ;;  %v3270_v24 = vmul.f32 %v3200_v8, %v3200_v8  ;;  %v2791_v49 = vadd.f32 %v2759_v26, %v7054_v1 }
 0x2c2   : > { %v3239_v10 = vadd.f32 %v3238_v48, %v3237_v7 }
 0x2c3   : > { %v3292_v44 = vsel %vm244_vm2, %v3270_v24, 0.0  ;;  %v2940_v34 = vadd.f32 %v2908_v20, %v2791_v49  ;;  %v7375_v20 = vld [vmem:[%s5727_s30 + $0x169] sm:$0xff] }
 0x2c4   : > { %v2911_v56 = vpop.f32.mrf.mxu0  ;;  %v3293_v59 = vadd.f32 %v3292_v44, %v3291_v18 }
 0x2c5   : > { %v3060_v33 = vpop.f32.mrf.mxu1  ;;  %v3089_v4 = vadd.f32 %v3057_v46, %v2940_v34  ;;  %5334 = vmatmul.msk.f32.gmra.mxu3 %vm291_vm1, %v7294_v52  ;;  %v7378_v46 = vld [vmem:[%s5727_s30 + $0x17f] sm:$0xff] }
 0x2c6   : > { %5385 = vmatmul.msk.f32.gmra.mxu2 %vm291_vm1, %v7092_v12 }
 0x2c7   : > { %5351 = vmatmul.msk.f32.gmra.mxu0 %vm291_vm1, %v7354_v30  ;;  %v3201_v1 = vmul.f32 %v3156_v23, %v3089_v4  ;;  %v7402_v23 = vld [vmem:[%s5727_s30 + $0x187] sm:$0xff] }
 0x2c8   : > { %5368 = vmatmul.msk.f32.gmra.mxu1 %vm291_vm1, %v7357_v38  ;;  %v2762_v57 = vpop.f32.mrf.mxu3 }
 0x2c9   : > { %v7367_v22 = vpop.f32.mrf.mxu2  ;;  %3217 = vst.msk [vmem:[%s6487_s6 + $0xf0] sm:$0xff] %vm244_vm2, %v3201_v1  ;;  %v3240_v14 = vsel %vm244_vm2, %v3201_v1, 0.0  ;;  %v3271_v19 = vmul.f32 %v3201_v1, %v3201_v1  ;;  %v2792_v55 = vadd.f32 %v2762_v57, %v7071_v43  ;;  %v3166_v1 = vpop.permute.xlu2 %3165 }
 0x2ca   : > { %v3241_v42 = vadd.f32 %v3240_v14, %v3239_v10 }
 0x2cb   : > { %v3294_v12 = vsel %vm244_vm2, %v3271_v19, 0.0  ;;  %v2941_v7 = vadd.f32 %v2911_v56, %v2792_v55 }
 0x2cc   : > { %v2914_v50 = vpop.f32.mrf.mxu0  ;;  %v3295_v18 = vadd.f32 %v3294_v12, %v3293_v59  ;;  %v7399_v59 = vld [vmem:[%s5727_s30 + $0x171] sm:$0xff] }
 0x2cd   : > { %v3063_v47 = vpop.f32.mrf.mxu1  ;;  %v3090_v11 = vadd.f32 %v3060_v33, %v2941_v7  ;;  %5335 = vmatmul.msk.f32.gmra.mxu3 %vm291_vm1, %v7315_v35 }
 0x2ce   : > { %5386 = vmatmul.msk.f32.gmra.mxu2 %vm291_vm1, %v7116_v58  ;;  %v4627_v58 = vld [vmem:[%s7898_s2 + $0x108] sm:$0xff] }
 0x2cf   : > { %5352 = vmatmul.msk.f32.gmra.mxu0 %vm291_vm1, %v7375_v20  ;;  %v3202_v43 = vmul.f32 %v3161_v17, %v3090_v11  ;;  %4649 = vperm.xlu0 %5512, %v4627_v58  }
 0x2d0   : > { %5369 = vmatmul.msk.f32.gmra.mxu1 %vm291_vm1, %v7378_v46  ;;  %v2765_v8 = vpop.f32.mrf.mxu3 }
 0x2d1   : > { %v7388_v26 = vpop.f32.mrf.mxu2  ;;  %3218 = vst.msk [vmem:[%s6487_s6 + $0xf8] sm:$0xff] %vm244_vm2, %v3202_v43  ;;  %v3242_v48 = vsel %vm244_vm2, %v3202_v43, 0.0  ;;  %v3272_v24 = vmul.f32 %v3202_v43, %v3202_v43  ;;  %v2793_v49 = vadd.f32 %v2765_v8, %v7088_v15  ;;  %v4628_v15 = vld [vmem:[%s7898_s2 + $0x110] sm:$0xff]  ;;  %v7426_v43 = vld [vmem:[%s5727_s30 + $0x179] sm:$0xff] }
 0x2d2   : > { %v3243_v10 = vadd.f32 %v3242_v48, %v3241_v42  ;;  %4654 = vperm.xlu1 %5513, %v4628_v15   ;;  %v7429_v8 = vld [vmem:[%s5727_s30 + $0x18f] sm:$0xff] }
 0x2d3   : > { %v3296_v44 = vsel %vm244_vm2, %v3272_v24, 0.0  ;;  %v2942_v34 = vadd.f32 %v2914_v50, %v2793_v49  ;;  %v3171_v24 = vpop.permute.xlu0 %3170 }
 0x2d4   : > { %v2917_v56 = vpop.f32.mrf.mxu0  ;;  %v3297_v4 = vadd.f32 %v3296_v44, %v3295_v18 }
 0x2d5   : > { %v3066_v33 = vpop.f32.mrf.mxu1  ;;  %v3091_v57 = vadd.f32 %v3063_v47, %v2942_v34  ;;  %5336 = vmatmul.msk.f32.gmra.mxu3 %vm291_vm1, %v7336_v16 }
 0x2d6   : > { %5387 = vmatmul.msk.f32.gmra.mxu2 %vm291_vm1, %v7147_v53  ;;  %v4630_v53 = vld [vmem:[%s7898_s2 + $0x120] sm:$0xff] }
 0x2d7   : > { %5353 = vmatmul.msk.f32.gmra.mxu0 %vm291_vm1, %v7399_v59  ;;  %v3203_v14 = vmul.f32 %v3166_v1, %v3091_v57  ;;  %4664 = vperm.xlu0 %5512, %v4630_v53   ;;  %v3176_v53 = vpop.permute.xlu1 %3175 }
 0x2d8   : > { %5370 = vmatmul.msk.f32.gmra.mxu1 %vm291_vm1, %v7402_v23  ;;  %v2768_v19 = vpop.f32.mrf.mxu3 }
 0x2d9   : > { %v7415_v55 = vpop.f32.mrf.mxu2  ;;  %3219 = vst.msk [vmem:[%s6487_s6 + $0x100] sm:$0xff] %vm244_vm2, %v3203_v14  ;;  %v3244_v42 = vsel %vm244_vm2, %v3203_v14, 0.0  ;;  %v3273_v12 = vmul.f32 %v3203_v14, %v3203_v14  ;;  %v2794_v7 = vadd.f32 %v2768_v19, %v7108_v25  ;;  %v4631_v25 = vld [vmem:[%s7898_s2 + $0x128] sm:$0xff] }
 0x2da   : > { %v3245_v50 = vadd.f32 %v3244_v42, %v3243_v10  ;;  %4669 = vperm.xlu1 %5513, %v4631_v25   ;;  %v7456_v42 = vld [vmem:[%s5727_s30 + $0x181] sm:$0xff] }
 0x2db   : > { %v3298_v47 = vsel %vm244_vm2, %v3273_v12, 0.0  ;;  %v2943_v18 = vadd.f32 %v2917_v56, %v2794_v7  ;;  %v7459_v12 = vld [vmem:[%s5727_s30 + $0x197] sm:$0xff] }
 0x2dc   : > { %v2920_v17 = vpop.f32.mrf.mxu0  ;;  %v3299_v48 = vadd.f32 %v3298_v47, %v3297_v4  ;;  %v7452_v4 = vld [vmem:[%s5727_s30 + $0x198] sm:$0xff]  ;;  %v4626_v47 = vld [vmem:[%s7898_s2 + $0x100] sm:$0xff] }
 0x2dd   : > { %v3069_v11 = vpop.f32.mrf.mxu1  ;;  %v3092_v49 = vadd.f32 %v3066_v33, %v2943_v18  ;;  %5337 = vmatmul.msk.f32.gmra.mxu3 %vm291_vm1, %v7357_v38  ;;  %4644 = vperm.xlu2 %5514, %v4626_v47  }
 0x2de   : > { %5388 = vmatmul.msk.f32.gmra.mxu2 %vm291_vm1, %v7174_v41  ;;  %v4633_v41 = vld [vmem:[%s7898_s2 + $0x138] sm:$0xff] }
 0x2df   : > { %5354 = vmatmul.msk.f32.gmra.mxu0 %vm291_vm1, %v7426_v43  ;;  %v3204_v58 = vmul.f32 %v3171_v24, %v3092_v49  ;;  %4679 = vperm.xlu0 %5512, %v4633_v41   ;;  %v4636_v49 = vld [vmem:[%s7898_s2 + $0x150] sm:$0xff] }
 0x2e0   : > { %5371 = vmatmul.msk.f32.gmra.mxu1 %vm291_vm1, %v7429_v8  ;;  %v2771_v10 = vpop.f32.mrf.mxu3 }
 0x2e1   : > { %v7442_v44 = vpop.f32.mrf.mxu2  ;;  %3220 = vst.msk [vmem:[%s6487_s6 + $0x108] sm:$0xff] %vm244_vm2, %v3204_v58  ;;  %v3246_v34 = vsel %vm244_vm2, %v3204_v58, 0.0  ;;  %v3274_v56 = vmul.f32 %v3204_v58, %v3204_v58  ;;  %v2795_v33 = vadd.f32 %v2771_v10, %v7139_v0  ;;  %v4634_v0 = vld [vmem:[%s7898_s2 + $0x140] sm:$0xff] }
 0x2e2   : > { %7944 = vst [vmem:[#allocation11_spill] sm:$0xff] %v7442_v44  ;;  %v3247_v15 = vadd.f32 %v3246_v34, %v3245_v50  ;;  %4684 = vperm.xlu1 %5513, %v4634_v0   ;;  %v7485_v10 = vld [vmem:[%s5727_s30 + $0x1a0] sm:$0xff] }
 0x2e3   : > { %v3300_v1 = vsel %vm244_vm2, %v3274_v56, 0.0  ;;  %v2944_v57 = vadd.f32 %v2920_v17, %v2795_v33 }
 0x2e4   : > { %v2923_v14 = vpop.f32.mrf.mxu0  ;;  %v3301_v7 = vadd.f32 %v3300_v1, %v3299_v48  ;;  %v7489_v1 = vld [vmem:[%s5727_s30 + $0x189] sm:$0xff] }
 0x2e5   : > { %v3072_v19 = vpop.f32.mrf.mxu1  ;;  %v3093_v50 = vadd.f32 %v3069_v11, %v2944_v57  ;;  %5338 = vmatmul.msk.f32.gmra.mxu3 %vm291_vm1, %v7378_v46  ;;  %v7492_v57 = vld [vmem:[%s5727_s30 + $0x19f] sm:$0xff] }
 0x2e6   : > { %5389 = vmatmul.msk.f32.gmra.mxu2 %vm291_vm1, %v7452_v4 }
 0x2e7   : > { %5355 = vmatmul.msk.f32.gmra.mxu0 %vm291_vm1, %v7456_v42  ;;  %v3205_v18 = vmul.f32 %v3176_v53, %v3093_v50  ;;  %4694 = vperm.xlu0 %5512, %v4636_v49   ;;  %v3181_v53 = vpop.permute.xlu2 %3180 }
 0x2e8   : > { %5372 = vmatmul.msk.f32.gmra.mxu1 %vm291_vm1, %v7459_v12  ;;  %v2774_v17 = vpop.f32.mrf.mxu3 }
 0x2e9   : > { %v7475_v11 = vpop.f32.mrf.mxu2  ;;  %3221 = vst.msk [vmem:[%s6487_s6 + $0x110] sm:$0xff] %vm244_vm2, %v3205_v18  ;;  %v3248_v25 = vsel %vm244_vm2, %v3205_v18, 0.0  ;;  %v3275_v48 = vmul.f32 %v3205_v18, %v3205_v18  ;;  %v2796_v24 = vadd.f32 %v2774_v17, %v7167_v40  ;;  %v4637_v40 = vld [vmem:[%s7898_s2 + $0x158] sm:$0xff] }
 0x2ea   : > { %7945 = vst [vmem:[#allocation8_spill] sm:$0xff] %v7475_v11  ;;  %v3249_v58 = vadd.f32 %v3248_v25, %v3247_v15  ;;  %4699 = vperm.xlu1 %5513, %v4637_v40   ;;  %v4639_v25 = vld [vmem:[%s7898_s2 + $0x168] sm:$0xff] }
 0x2eb   : > { %v3302_v34 = vsel %vm244_vm2, %v3275_v48, 0.0  ;;  %v2945_v56 = vadd.f32 %v2923_v14, %v2796_v24  ;;  %v4629_v14 = vld [vmem:[%s7898_s2 + $0x118] sm:$0xff]  ;;  %v7518_v24 = vld [vmem:[%s5727_s30 + $0x1a8] sm:$0xff] }
 0x2ec   : > { %v2926_v33 = vpop.f32.mrf.mxu0  ;;  %v3303_v0 = vadd.f32 %v3302_v34, %v3301_v7  ;;  %4659 = vperm.xlu2 %5514, %v4629_v14  }
 0x2ed   : > { %v3075_v41 = vpop.f32.mrf.mxu1  ;;  %v3094_v15 = vadd.f32 %v3072_v19, %v2945_v56  ;;  %5339 = vmatmul.msk.f32.gmra.mxu3 %vm291_vm1, %v7402_v23 }
 0x2ee   : > { %5390 = vmatmul.msk.f32.gmra.mxu2 %vm291_vm1, %v7485_v10 }
 0x2ef   : > { %5356 = vmatmul.msk.f32.gmra.mxu0 %vm291_vm1, %v7489_v1  ;;  %v3206_v7 = vmul.f32 %v3181_v53, %v3094_v15  ;;  %4709 = vperm.xlu0 %5512, %v4639_v25   ;;  %v7522_v53 = vld [vmem:[%s5727_s30 + $0x191] sm:$0xff]  ;;  %v7525_v15 = vld [vmem:[%s5727_s30 + $0x1a7] sm:$0xff]  ;;  %v1727_v25 = vrot.slane %v6904_v9, 4 }
 0x2f0   : > { %5373 = vmatmul.msk.f32.gmra.mxu1 %vm291_vm1, %v7492_v57  ;;  %v2777_v19 = vpop.f32.mrf.mxu3 }
 0x2f1   : > { %v7508_v50 = vpop.f32.mrf.mxu2  ;;  %3222 = vst.msk [vmem:[%s6487_s6 + $0x118] sm:$0xff] %vm244_vm2, %v3206_v7  ;;  %v3250_v47 = vsel %vm244_vm2, %v3206_v7, 0.0  ;;  %v3276_v18 = vmul.f32 %v3206_v7, %v3206_v7  ;;  %v2797_v17 = vadd.f32 %v2777_v19, %v7190_v5  ;;  %v4640_v5 = vld [vmem:[%s7898_s2 + $0x170] sm:$0xff]  ;;  %v3186_v7 = vpop.permute.xlu0 %3185 }
 0x2f2   : > { %7946 = vst [vmem:[#allocation9_spill] sm:$0xff] %v7508_v50  ;;  %v3251_v48 = vadd.f32 %v3250_v47, %v3249_v58  ;;  %4714 = vperm.xlu1 %5513, %v4640_v5  }
 0x2f3   : > { %v3304_v49 = vsel %vm244_vm2, %v3276_v18, 0.0  ;;  %v2946_v34 = vadd.f32 %v2926_v33, %v2797_v17  ;;  %v4632_v33 = vld [vmem:[%s7898_s2 + $0x130] sm:$0xff] }
 0x2f4   : > { %v2929_v56 = vpop.f32.mrf.mxu0  ;;  %v3305_v14 = vadd.f32 %v3304_v49, %v3303_v0  ;;  %4674 = vperm.xlu2 %5514, %v4632_v33  }
 0x2f5   : > { %v3078_v40 = vpop.f32.mrf.mxu1  ;;  %v3095_v58 = vadd.f32 %v3075_v41, %v2946_v34  ;;  %5340 = vmatmul.msk.f32.gmra.mxu3 %vm291_vm1, %v7429_v8 }
 0x2f6   : > { %5391 = vmatmul.msk.f32.gmra.mxu2 %vm291_vm1, %v7518_v24 }
 0x2f7   : > { %5357 = vmatmul.msk.f32.gmra.mxu0 %vm291_vm1, %v7522_v53  ;;  %v3207_v0 = vmul.f32 %v3186_v7, %v3095_v58  ;;  %v4328_v7 = vld [vmem:[%s5727_s30 + $0x148] sm:$0xff]  ;;  %v1781_v58 = vrot.slane %v6908_v28, 4 }
 0x2f8   : > { %5374 = vmatmul.msk.f32.gmra.mxu1 %vm291_vm1, %v7525_v15  ;;  %v2780_v41 = vpop.f32.mrf.mxu3 }
 0x2f9   : > { %v7541_v19 = vpop.f32.mrf.mxu2  ;;  %3223 = vst.msk [vmem:[%s6487_s6 + $0x120] sm:$0xff] %vm244_vm2, %v3207_v0  ;;  %v3252_v47 = vsel %vm244_vm2, %v3207_v0, 0.0  ;;  %v3277_v18 = vmul.f32 %v3207_v0, %v3207_v0  ;;  %v2798_v17 = vadd.f32 %v2780_v41, %v7201_v54  ;;  %v4635_v54 = vld [vmem:[%s7898_s2 + $0x148] sm:$0xff] }
 0x2fa   : > { %7947 = vst [vmem:[#allocation13_spill] sm:$0xff] %v7541_v19  ;;  %v3253_v49 = vadd.f32 %v3252_v47, %v3251_v48  ;;  %v3191_v19 = vpop.permute.xlu1 %3190  ;;  %v1728_v48 = vadd.f32 %v1727_v25, %v6904_v9 }
 0x2fb   : > { %v3306_v34 = vsel %vm244_vm2, %v3277_v18, 0.0  ;;  %v2947_v5 = vadd.f32 %v2929_v56, %v2798_v17 }
 0x2fc   : > { %v3668_v50 = vpop.f32.mrf.mxu0  ;;  %v3307_v33 = vadd.f32 %v3306_v34, %v3305_v14  ;;  %4689 = vperm.xlu2 %5514, %v4635_v54   ;;  %v1729_v9 = vrot.slane %v1728_v48, 2 }
 0x2fd   : > { %v3817_v11 = vpop.f32.mrf.mxu1  ;;  %v3096_v44 = vadd.f32 %v3078_v40, %v2947_v5  ;;  %5393 = vmatmul.msk.f32.vlgmr.msra.gmra.mxu3 %vm291_vm1, %v7119_v2  ;;  %v1782_v40 = vadd.f32 %v1781_v58, %v6908_v28 }
 0x2fe   : > { %5444 = vmatmul.msk.f32.vlgmr.msra.gmra.mxu2 %vm291_vm1, %v7291_v13 }
 0x2ff   : > { %5410 = vmatmul.msk.f32.vlgmr.msra.gmra.mxu0 %vm291_vm1, %v7237_v37  ;;  %v3208_v56 = vmul.f32 %v3191_v19, %v3096_v44  ;;  %v4329_v44 = vld [vmem:[%s5727_s30 + $0x150] sm:$0xff]  ;;  %v1783_v19 = vrot.slane %v1782_v40, 2 }
 0x300   : > { %5427 = vmatmul.msk.f32.vlgmr.msra.gmra.mxu1 %vm291_vm1, %v4328_v7  ;;  %v3535_v2 = vpop.f32.mrf.mxu3 }
 0x301   : > { %v3966_v14 = vpop.f32.mrf.mxu2  ;;  %3224 = vst.msk [vmem:[%s6487_s6 + $0x128] sm:$0xff] %vm244_vm2, %v3208_v56  ;;  %v3254_v0 = vsel %vm244_vm2, %v3208_v56, 0.0  ;;  %v3278_v41 = vmul.f32 %v3208_v56, %v3208_v56  ;;  %v3536_v47 = vadd.f32 %v3535_v2, %v7203_v39  ;;  %v4638_v39 = vld [vmem:[%s7898_s2 + $0x160] sm:$0xff] }
 0x302   : > { %v3255_v18 = vadd.f32 %v3254_v0, %v3253_v49  ;;  %v1730_v49 = vadd.f32 %v1729_v9, %v1728_v48 }
 0x303   : > { %v3308_v37 = vsel %vm244_vm2, %v3278_v41, 0.0  ;;  %v3716_v17 = vadd.f32 %v3668_v50, %v3536_v47 }
 0x304   : > { %v3671_v25 = vpop.f32.mrf.mxu0  ;;  %v3256_v5 = vrot.slane %v3255_v18, 4  ;;  %v3309_v28 = vadd.f32 %v3308_v37, %v3307_v33  ;;  %4704 = vperm.xlu2 %5514, %v4638_v39   ;;  %v1731_v41 = vrot.slane %v1730_v49, 1 }
 0x305   : > { %v3820_v34 = vpop.f32.mrf.mxu1  ;;  %v3865_v7 = vadd.f32 %v3817_v11, %v3716_v17  ;;  %5394 = vmatmul.msk.f32.gmra.mxu3 %vm291_vm1, %v7150_v32  ;;  %v1784_v32 = vadd.f32 %v1783_v19, %v1782_v40 }
 0x306   : > { %5445 = vmatmul.msk.f32.gmra.mxu2 %vm291_vm1, %v7312_v62  ;;  %v3257_v58 = vadd.f32 %v3256_v5, %v3255_v18  ;;  %v3310_v50 = vrot.slane %v3309_v28, 4  ;;  %v1732_v40 = vadd.f32 %v1731_v41, %v1730_v49  ;;  %v4331_v49 = vld [vmem:[%s5727_s30 + $0x160] sm:$0xff] }
 0x307   : > { %5411 = vmatmul.msk.f32.gmra.mxu0 %vm291_vm1, %v7255_v6  ;;  %v7579_v11 = vadd.f32 %v3966_v14, %v3865_v7  ;;  %v4330_v6 = vld [vmem:[%s5727_s30 + $0x158] sm:$0xff] }
 0x308   : > { %5428 = vmatmul.msk.f32.gmra.mxu1 %vm291_vm1, %v4329_v44  ;;  %v3258_v33 = vrot.slane %v3257_v58, 2  ;;  %v3311_v54 = vadd.f32 %v3310_v50, %v3309_v28  ;;  %v3538_v56 = vpop.f32.mrf.mxu3  ;;  %v1785_v44 = vrot.slane %v1784_v32, 1 }
 0x309   : > { %v3969_v2 = vpop.f32.mrf.mxu2  ;;  %v3539_v0 = vadd.f32 %v3538_v56, %v7214_v45  ;;  %v4641_v45 = vld [vmem:[%s7898_s2 + $0x178] sm:$0xff] }
 0x30a   : > { %v3259_v48 = vadd.f32 %v3258_v33, %v3257_v58  ;;  %v3312_v47 = vrot.slane %v3311_v54, 2  ;;  %v1786_v39 = vadd.f32 %v1785_v44, %v1784_v32 }
 0x30b   : > { %v3717_v9 = vadd.f32 %v3671_v25, %v3539_v0 }
 0x30c   : > { %v3674_v18 = vpop.f32.mrf.mxu0  ;;  %v3260_v17 = vrot.slane %v3259_v48, 1  ;;  %v3313_v5 = vadd.f32 %v3312_v47, %v3311_v54  ;;  %4719 = vperm.xlu2 %5514, %v4641_v45  }
 0x30d   : > { %v3823_v37 = vpop.f32.mrf.mxu1  ;;  %v3866_v14 = vadd.f32 %v3820_v34, %v3717_v9  ;;  %5395 = vmatmul.msk.f32.gmra.mxu3 %vm291_vm1, %v7177_v21 }
 0x30e   : > { %5446 = vmatmul.msk.f32.gmra.mxu2 %vm291_vm1, %v7333_v3  ;;  %v3261_v25 = vadd.f32 %v3260_v17, %v3259_v48  ;;  %v3314_v19 = vrot.slane %v3313_v5, 1 }
 0x30f   : > { %5412 = vmatmul.msk.f32.gmra.mxu0 %vm291_vm1, %v7273_v36  ;;  %v7593_v34 = vadd.f32 %v3969_v2, %v3866_v14  ;;  %v4333_v14 = vld [vmem:[%s5727_s30 + $0x170] sm:$0xff] }
 0x310   : > { %5429 = vmatmul.msk.f32.gmra.mxu1 %vm291_vm1, %v4330_v6  ;;  %v3541_v21 = vpop.f32.mrf.mxu3  ;;  %v7595_v7 = vadd.f32 %v3261_v25, %v1732_v40  ;;  %v3315_v58 = vadd.f32 %v3314_v19, %v3313_v5 }
 0x311   : > { %v3972_v28 = vpop.f32.mrf.mxu2  ;;  %v3542_v50 = vadd.f32 %v3541_v21, %v7227_v63 }
 0x312   : > { %v7598_v33 = vadd.f32 %v3315_v58, %v1786_v39 }
 0x313   : > { %v3718_v36 = vadd.f32 %v3674_v18, %v3542_v50  ;;  %v4332_v18 = vld [vmem:[%s5727_s30 + $0x168] sm:$0xff] }
 0x314   : > { %v3677_v54 = vpop.f32.mrf.mxu0 }
 0x315   : > { %v3826_v56 = vpop.f32.mrf.mxu1  ;;  %v3867_v0 = vadd.f32 %v3823_v37, %v3718_v36  ;;  %5396 = vmatmul.msk.f32.gmra.mxu3 %vm291_vm1, %v7291_v13 }
 0x316   : > { %5447 = vmatmul.msk.f32.gmra.mxu2 %vm291_vm1, %v7354_v30 }
 0x317   : > { %5413 = vmatmul.msk.f32.gmra.mxu0 %vm291_vm1, %v7294_v52  ;;  %v7608_v63 = vadd.f32 %v3972_v28, %v3867_v0  ;;  %v4334_v28 = vld [vmem:[%s5727_s30 + $0x178] sm:$0xff] }
 0x318   : > { %5430 = vmatmul.msk.f32.gmra.mxu1 %vm291_vm1, %v4331_v49  ;;  %v3544_v32 = vpop.f32.mrf.mxu3 }
 0x319   : > { %v3975_v2 = vpop.f32.mrf.mxu2  ;;  %v3545_v41 = vadd.f32 %v3544_v32, %v7247_v27 }
 0x31b   : > { %v3719_v48 = vadd.f32 %v3677_v54, %v3545_v41 }
 0x31c   : > { %v3680_v47 = vpop.f32.mrf.mxu0 }
 0x31d   : > { %v3829_v9 = vpop.f32.mrf.mxu1  ;;  %v3868_v13 = vadd.f32 %v3826_v56, %v3719_v48  ;;  %5397 = vmatmul.msk.f32.gmra.mxu3 %vm291_vm1, %v7312_v62  ;;  %v4335_v56 = vld [vmem:[%s5727_s30 + $0x180] sm:$0xff]  ;;  %v4336_v48 = vld [vmem:[%s5727_s30 + $0x188] sm:$0xff] }
 0x31e   : > { %5448 = vmatmul.msk.f32.gmra.mxu2 %vm291_vm1, %v7375_v20 }
 0x31f   : > { %5414 = vmatmul.msk.f32.gmra.mxu0 %vm291_vm1, %v7315_v35  ;;  %v7619_v52 = vadd.f32 %v3975_v2, %v3868_v13 }
 0x320   : > { %5431 = vmatmul.msk.f32.gmra.mxu1 %vm291_vm1, %v4332_v18  ;;  %v3547_v27 = vpop.f32.mrf.mxu3 }
 0x321   : > { %v3978_v37 = vpop.f32.mrf.mxu2  ;;  %v3548_v6 = vadd.f32 %v3547_v27, %v7265_v51 }
 0x323   : > { %v3720_v17 = vadd.f32 %v3680_v47, %v3548_v6 }
 0x324   : > { %v3683_v5 = vpop.f32.mrf.mxu0 }
 0x325   : > { %v3832_v44 = vpop.f32.mrf.mxu1  ;;  %v3869_v62 = vadd.f32 %v3829_v9, %v3720_v17  ;;  %5398 = vmatmul.msk.f32.gmra.mxu3 %vm291_vm1, %v7333_v3 }
 0x326   : > { %5449 = vmatmul.msk.f32.gmra.mxu2 %vm291_vm1, %v7399_v59 }
 0x327   : > { %5415 = vmatmul.msk.f32.gmra.mxu0 %vm291_vm1, %v7336_v16  ;;  %v7630_v35 = vadd.f32 %v3978_v37, %v3869_v62  ;;  %v4337_v37 = vld [vmem:[%s5727_s30 + $0x190] sm:$0xff] }
 0x328   : > { %5432 = vmatmul.msk.f32.gmra.mxu1 %vm291_vm1, %v4333_v14  ;;  %v3550_v51 = vpop.f32.mrf.mxu3 }
 0x329   : > { %v3981_v45 = vpop.f32.mrf.mxu2  ;;  %v3551_v40 = vadd.f32 %v3550_v51, %v7283_v29 }
 0x32b   : > { %v3721_v25 = vadd.f32 %v3683_v5, %v3551_v40  ;;  %v4487_v5 = vld [vmem:[%s5727_s30 + $0x199] sm:$0xff]  ;;  %v4488_v40 = vld [vmem:[%s5727_s30 + $0x1a1] sm:$0xff] }
 0x32c   : > { %v3686_v19 = vpop.f32.mrf.mxu0 }
 0x32d   : > { %v3835_v21 = vpop.f32.mrf.mxu1  ;;  %v3870_v3 = vadd.f32 %v3832_v44, %v3721_v25  ;;  %5399 = vmatmul.msk.f32.gmra.mxu3 %vm291_vm1, %v7354_v30 }
 0x32e   : > { %5450 = vmatmul.msk.f32.gmra.mxu2 %vm291_vm1, %v7426_v43 }
 0x32f   : > { %5416 = vmatmul.msk.f32.gmra.mxu0 %vm291_vm1, %v7357_v38  ;;  %v7641_v16 = vadd.f32 %v3981_v45, %v3870_v3  ;;  %v4489_v3 = vld [vmem:[%s5727_s30 + $0x1a9] sm:$0xff] }
 0x330   : > { %5433 = vmatmul.msk.f32.gmra.mxu1 %vm291_vm1, %v4334_v28  ;;  %v3553_v29 = vpop.f32.mrf.mxu3 }
 0x331   : > { %v3984_v39 = vpop.f32.mrf.mxu2  ;;  %v3554_v58 = vadd.f32 %v3553_v29, %v7304_v60 }
 0x333   : > { %v3722_v50 = vadd.f32 %v3686_v19, %v3554_v58 }
 0x334   : > { %v3689_v36 = vpop.f32.mrf.mxu0 }
 0x335   : > { %v3838_v54 = vpop.f32.mrf.mxu1  ;;  %v3871_v30 = vadd.f32 %v3835_v21, %v3722_v50  ;;  %5400 = vmatmul.msk.f32.gmra.mxu3 %vm291_vm1, %v7375_v20  ;;  %v7948_v50 = vld [vmem:[#allocation11_spill] sm:$0xff] }
 0x336   : > { %5451 = vmatmul.msk.f32.gmra.mxu2 %vm291_vm1, %v7456_v42 }
 0x337   : > { %5417 = vmatmul.msk.f32.gmra.mxu0 %vm291_vm1, %v7378_v46  ;;  %v7652_v38 = vadd.f32 %v3984_v39, %v3871_v30 }
 0x338   : > { %5434 = vmatmul.msk.f32.gmra.mxu1 %vm291_vm1, %v4335_v56  ;;  %v3556_v60 = vpop.f32.mrf.mxu3 }
 0x339   : > { %v3987_v49 = vpop.f32.mrf.mxu2  ;;  %v3557_v0 = vadd.f32 %v3556_v60, %v7325_v31 }
 0x33b   : > { %v3723_v32 = vadd.f32 %v3689_v36, %v3557_v0 }
 0x33c   : > { %v3692_v2 = vpop.f32.mrf.mxu0 }
 0x33d   : > { %v3841_v41 = vpop.f32.mrf.mxu1  ;;  %v3872_v20 = vadd.f32 %v3838_v54, %v3723_v32  ;;  %5401 = vmatmul.msk.f32.gmra.mxu3 %vm291_vm1, %v7399_v59  ;;  %v4490_v54 = vld [vmem:[%s5727_s30 + $0x1b1] sm:$0xff] }
 0x33e   : > { %5452 = vmatmul.msk.f32.gmra.mxu2 %vm291_vm1, %v7489_v1 }
 0x33f   : > { %5418 = vmatmul.msk.f32.gmra.mxu0 %vm291_vm1, %v7402_v23  ;;  %v7663_v46 = vadd.f32 %v3987_v49, %v3872_v20  ;;  %v4341_v49 = vld [vmem:[%s5727_s30 + $0x1b0] sm:$0xff] }
 0x340   : > { %5435 = vmatmul.msk.f32.gmra.mxu1 %vm291_vm1, %v4336_v48  ;;  %v3559_v31 = vpop.f32.mrf.mxu3  ;;  %v4491_v48 = vld [vmem:[%s5727_s30 + $0x1b9] sm:$0xff] }
 0x341   : > { %v3990_v47 = vpop.f32.mrf.mxu2  ;;  %v3560_v9 = vadd.f32 %v3559_v31, %v7346_v61 }
 0x343   : > { %v3724_v18 = vadd.f32 %v3692_v2, %v3560_v9  ;;  %v7949_v2 = vld [vmem:[#allocation8_spill] sm:$0xff]  ;;  %v4193_v9 = vld [vmem:[%s5727_s30 + $0x1b7] sm:$0xff] }
 0x344   : > { %v3695_v13 = vpop.f32.mrf.mxu0 }
 0x345   : > { %v3844_v27 = vpop.f32.mrf.mxu1  ;;  %v3873_v59 = vadd.f32 %v3841_v41, %v3724_v18  ;;  %5402 = vmatmul.msk.f32.gmra.mxu3 %vm291_vm1, %v7426_v43  ;;  %v4342_v18 = vld [vmem:[%s5727_s30 + $0x1b8] sm:$0xff] }
 0x346   : > { %5453 = vmatmul.msk.f32.gmra.mxu2 %vm291_vm1, %v7522_v53 }
 0x347   : > { %5419 = vmatmul.msk.f32.gmra.mxu0 %vm291_vm1, %v7429_v8  ;;  %v7674_v23 = vadd.f32 %v3990_v47, %v3873_v59 }
 0x348   : > { %5436 = vmatmul.msk.f32.gmra.mxu1 %vm291_vm1, %v4337_v37  ;;  %v3562_v6 = vpop.f32.mrf.mxu3 }
 0x349   : > { %v3993_v61 = vpop.f32.mrf.mxu2  ;;  %v3563_v17 = vadd.f32 %v3562_v6, %v7367_v22  ;;  %v7950_v6 = vld [vmem:[#allocation9_spill] sm:$0xff] }
 0x34b   : > { %v3725_v44 = vadd.f32 %v3695_v13, %v3563_v17  ;;  %v4492_v17 = vld [vmem:[%s5727_s30 + $0x1c1] sm:$0xff] }
 0x34c   : > { %v3698_v14 = vpop.f32.mrf.mxu0 }
 0x34d   : > { %v3847_v62 = vpop.f32.mrf.mxu1  ;;  %v3874_v43 = vadd.f32 %v3844_v27, %v3725_v44  ;;  %5403 = vmatmul.msk.f32.gmra.mxu3 %vm291_vm1, %v7456_v42 }
 0x34e   : > { %5454 = vmatmul.msk.f32.gmra.mxu2 %vm291_vm1, %v4487_v5 }
 0x34f   : > { %5420 = vmatmul.msk.f32.gmra.mxu0 %vm291_vm1, %v7459_v12  ;;  %v7685_v8 = vadd.f32 %v3993_v61, %v3874_v43  ;;  %v4343_v43 = vld [vmem:[%s5727_s30 + $0x1c0] sm:$0xff] }
 0x350   : > { %5437 = vmatmul.msk.f32.gmra.mxu1 %vm291_vm1, %v7452_v4  ;;  %v3565_v51 = vpop.f32.mrf.mxu3 }
 0x351   : > { %v3996_v22 = vpop.f32.mrf.mxu2  ;;  %v3566_v45 = vadd.f32 %v3565_v51, %v7388_v26 }
 0x353   : > { %v3726_v25 = vadd.f32 %v3698_v14, %v3566_v45 }
 0x354   : > { %v3701_v19 = vpop.f32.mrf.mxu0 }
 0x355   : > { %v3850_v21 = vpop.f32.mrf.mxu1  ;;  %v3875_v42 = vadd.f32 %v3847_v62, %v3726_v25  ;;  %5404 = vmatmul.msk.f32.gmra.mxu3 %vm291_vm1, %v7489_v1  ;;  %v4194_v62 = vld [vmem:[%s5727_s30 + $0x1bf] sm:$0xff]  ;;  %v7951_v25 = vld [vmem:[#allocation13_spill] sm:$0xff] }
 0x356   : > { %5455 = vmatmul.msk.f32.gmra.mxu2 %vm291_vm1, %v4488_v40 }
 0x357   : > { %5421 = vmatmul.msk.f32.gmra.mxu0 %vm291_vm1, %v7492_v57  ;;  %v7696_v4 = vadd.f32 %v3996_v22, %v3875_v42 }
 0x358   : > { %5438 = vmatmul.msk.f32.gmra.mxu1 %vm291_vm1, %v7485_v10  ;;  %v3568_v12 = vpop.f32.mrf.mxu3 }
 0x359   : > { %v3999_v26 = vpop.f32.mrf.mxu2  ;;  %v3569_v28 = vadd.f32 %v3568_v12, %v7415_v55 }
 0x35b   : > { %v3727_v29 = vadd.f32 %v3701_v19, %v3569_v28 }
 0x35c   : > { %v3704_v39 = vpop.f32.mrf.mxu0 }
 0x35d   : > { %v3853_v1 = vpop.f32.mrf.mxu1  ;;  %v3876_v58 = vadd.f32 %v3850_v21, %v3727_v29  ;;  %5405 = vmatmul.msk.f32.gmra.mxu3 %vm291_vm1, %v7522_v53  ;;  %v4192_v53 = vld [vmem:[%s5727_s30 + $0x1af] sm:$0xff]  ;;  %s7823_s30 = sand.u32 1, %s5601_s19  }
 0x35e   : > { %5456 = vmatmul.msk.f32.gmra.mxu2 %vm291_vm1, %v4489_v3  ;;  %s227_s15 = scalar_lea.vmem [#allocation2], %s7823_s30  ;;  %s233_s25 = scalar_lea.vmem [#allocation4], %s7823_s30 }
 0x35f   : > { %5422 = vmatmul.msk.f32.gmra.mxu0 %vm291_vm1, %v7525_v15  ;;  %v7707_v10 = vadd.f32 %v3999_v26, %v3876_v58  ;;  %s7834_s16 = sshll.u32 %s227_s15, 4  ;;  %s7839_s26 = sshll.u32 %s233_s25, 4  ;;  %s4873_s16 = int_to_ptr.vmem [resolvable:$true] %s7834_s16  ;;  %s4886_s26 = int_to_ptr.vmem [resolvable:$true] %s7839_s26 }
 0x360   : > { %5439 = vmatmul.msk.f32.gmra.mxu1 %vm291_vm1, %v7518_v24  ;;  %v3571_v55 = vpop.f32.mrf.mxu3  ;;  %s4855_s22 = scalar_lea.sflag [#allocation3], %s7823_s30 }
 0x361   : > { %v4002_v57 = vpop.f32.mrf.mxu2  ;;  %v3572_v36 = vadd.f32 %v3571_v55, %v7948_v50  ;;  %v4645_v50 = vpop.permute.xlu2 %4644 }
 0x363   : > { %v3728_v56 = vadd.f32 %v3704_v39, %v3572_v36 }
 0x364   : > { %v3707_v30 = vpop.f32.mrf.mxu0 }
 0x365   : > { %v3856_v60 = vpop.f32.mrf.mxu1  ;;  %v3877_v0 = vadd.f32 %v3853_v1, %v3728_v56  ;;  %5406 = vmatmul.msk.f32.gmra.mxu3 %vm291_vm1, %v4487_v5 }
 0x366   : > { %5457 = vmatmul.msk.f32.gmra.mxu2 %vm291_vm1, %v4490_v54 }
 0x367   : > { %5423 = vmatmul.msk.f32.gmra.mxu0 %vm291_vm1, %v4192_v53  ;;  %v7717_v24 = vadd.f32 %v4002_v57, %v3877_v0 }
 0x368   : > { %5440 = vmatmul.msk.f32.gmra.mxu1 %vm291_vm1, %v4341_v49  ;;  %v3574_v15 = vpop.f32.mrf.mxu3 }
 0x369   : > { %v4005_v32 = vpop.f32.mrf.mxu2  ;;  %v3575_v41 = vadd.f32 %v3574_v15, %v7949_v2 }
 0x36b   : > { %v3729_v20 = vadd.f32 %v3707_v30, %v3575_v41 }
 0x36c   : > { %v3710_v31 = vpop.f32.mrf.mxu0 }
 0x36d   : > { %v3859_v47 = vpop.f32.mrf.mxu1  ;;  %v3878_v13 = vadd.f32 %v3856_v60, %v3729_v20  ;;  %5407 = vmatmul.msk.f32.gmra.mxu3 %vm291_vm1, %v4488_v40 }
 0x36e   : > { %5458 = vmatmul.msk.f32.gmra.mxu2 %vm291_vm1, %v4491_v48 }
 0x36f   : > { %5424 = vmatmul.msk.f32.gmra.mxu0 %vm291_vm1, %v4193_v9  ;;  %v7727_v27 = vadd.f32 %v4005_v32, %v3878_v13  ;;  %v4650_v32 = vpop.permute.xlu0 %4649 }
 0x370   : > { %5441 = vmatmul.msk.f32.gmra.mxu1 %vm291_vm1, %v4342_v18  ;;  %v3577_v37 = vpop.f32.mrf.mxu3 }
 0x371   : > { %v4008_v59 = vpop.f32.mrf.mxu2  ;;  %v3578_v61 = vadd.f32 %v3577_v37, %v7950_v6 }
 0x373   : > { %v3730_v5 = vadd.f32 %v3710_v31, %v3578_v61 }
 0x374   : > { %v3713_v44 = vpop.f32.mrf.mxu0 }
 0x375   : > { %v3862_v14 = vpop.f32.mrf.mxu1  ;;  %v3879_v51 = vadd.f32 %v3859_v47, %v3730_v5  ;;  %5408 = vmatmul.msk.f32.gmra.mxu3 %vm291_vm1, %v4489_v3 }
 0x376   : > { %5459 = vmatmul.msk.f32.gmra.mxu2 %vm291_vm1, %v4492_v17 }
 0x377   : > { %5425 = vmatmul.msk.f32.gmra.mxu0 %vm291_vm1, %v4194_v62  ;;  %v7737_v22 = vadd.f32 %v4008_v59, %v3879_v51 }
 0x378   : > { %5442 = vmatmul.msk.f32.gmra.mxu1 %vm291_vm1, %v4343_v43  ;;  %v3580_v45 = vpop.f32.mrf.mxu3 }
 0x379   : > { %v4011_v40 = vpop.f32.mrf.mxu2  ;;  %v3581_v19 = vadd.f32 %v3580_v45, %v7951_v25 }
 0x37b   : > { %v3731_v21 = vadd.f32 %v3713_v44, %v3581_v19  ;;  %v4655_v44 = vpop.permute.xlu1 %4654 }
 0x37c   : > { %v4264_v42 = vpop.f32.mrf.mxu0 }
 0x37d   : > { %v4413_v12 = vpop.f32.mrf.mxu1  ;;  %v3880_v26 = vadd.f32 %v3862_v14, %v3731_v21 }
 0x37f   : > { %v7740_v28 = vadd.f32 %v4011_v40, %v3880_v26 }
 0x380   : > { %v4115_v3 = vpop.f32.mrf.mxu3 }
 0x381   : > { %v4562_v29 = vpop.f32.mrf.mxu2  ;;  %v4163_v39 = vadd.f32 %v4115_v3, %v7579_v11 }
 0x383   : > { %v4312_v1 = vadd.f32 %v4264_v42, %v4163_v39 }
 0x384   : > { %v4267_v58 = vpop.f32.mrf.mxu0 }
 0x385   : > { %v4416_v55 = vpop.f32.mrf.mxu1  ;;  %v4461_v57 = vadd.f32 %v4413_v12, %v4312_v1 }
 0x387   : > { %v4610_v36 = vadd.f32 %v4562_v29, %v4461_v57  ;;  %v4660_v29 = vpop.permute.xlu2 %4659 }
 0x388   : > { %v4118_v54 = vpop.f32.mrf.mxu3 }
 0x389   : > { %v4565_v56 = vpop.f32.mrf.mxu2  ;;  %v4722_v30 = vmul.f32 %v4645_v50, %v4610_v36  ;;  %v4164_v60 = vadd.f32 %v4118_v54, %v7593_v34 }
 0x38b   : > { %4738 = vst.msk [vmem:[%s6487_s6 + $0x130] sm:$0xff] %vm244_vm2, %v4722_v30  ;;  %v4313_v53 = vadd.f32 %v4267_v58, %v4164_v60  ;;  %v4792_v48 = vmul.f32 %v4722_v30, %v4722_v30  ;;  %v4754_v47 = vsel %vm244_vm2, %v4722_v30, 0.0 }
 0x38c   : > { %v4270_v49 = vpop.f32.mrf.mxu0 }
 0x38d   : > { %v4419_v0 = vpop.f32.mrf.mxu1  ;;  %v4462_v15 = vadd.f32 %v4416_v55, %v4313_v53  ;;  %v4808_v6 = vsel %vm244_vm2, %v4792_v48, 0.0 }
 0x38f   : > { %v4611_v11 = vadd.f32 %v4565_v56, %v4462_v15 }
 0x390   : > { %v4121_v2 = vpop.f32.mrf.mxu3 }
 0x391   : > { %v4568_v41 = vpop.f32.mrf.mxu2  ;;  %v4723_v20 = vmul.f32 %v4650_v32, %v4611_v11  ;;  %v4165_v31 = vadd.f32 %v4121_v2, %v7608_v63 }
 0x393   : > { %4739 = vst.msk [vmem:[%s6487_s6 + $0x138] sm:$0xff] %vm244_vm2, %v4723_v20  ;;  %v4755_v34 = vsel %vm244_vm2, %v4723_v20, 0.0  ;;  %v4793_v9 = vmul.f32 %v4723_v20, %v4723_v20  ;;  %v4314_v18 = vadd.f32 %v4270_v49, %v4165_v31 }
 0x394   : > { %v4273_v13 = vpop.f32.mrf.mxu0  ;;  %v4756_v59 = vadd.f32 %v4755_v34, %v4754_v47 }
 0x395   : > { %v4422_v37 = vpop.f32.mrf.mxu1  ;;  %v4809_v61 = vsel %vm244_vm2, %v4793_v9, 0.0  ;;  %v4463_v17 = vadd.f32 %v4419_v0, %v4314_v18  ;;  %v4665_v0 = vpop.permute.xlu0 %4664 }
 0x396   : > { %v4810_v5 = vadd.f32 %v4809_v61, %v4808_v6 }
 0x397   : > { %v4612_v63 = vadd.f32 %v4568_v41, %v4463_v17 }
 0x398   : > { %v4124_v14 = vpop.f32.mrf.mxu3 }
 0x399   : > { %v4571_v62 = vpop.f32.mrf.mxu2  ;;  %v4724_v43 = vmul.f32 %v4655_v44, %v4612_v63  ;;  %v4166_v51 = vadd.f32 %v4124_v14, %v7619_v52 }
 0x39b   : > { %4740 = vst.msk [vmem:[%s6487_s6 + $0x140] sm:$0xff] %vm244_vm2, %v4724_v43  ;;  %v4757_v45 = vsel %vm244_vm2, %v4724_v43, 0.0  ;;  %v4794_v40 = vmul.f32 %v4724_v43, %v4724_v43  ;;  %v4315_v25 = vadd.f32 %v4273_v13, %v4166_v51 }
 0x39c   : > { %v4276_v19 = vpop.f32.mrf.mxu0  ;;  %v4758_v42 = vadd.f32 %v4757_v45, %v4756_v59 }
 0x39d   : > { %v4425_v21 = vpop.f32.mrf.mxu1  ;;  %v4811_v12 = vsel %vm244_vm2, %v4794_v40, 0.0  ;;  %v4464_v26 = vadd.f32 %v4422_v37, %v4315_v25  ;;  %v4670_v37 = vpop.permute.xlu1 %4669 }
 0x39e   : > { %v4812_v3 = vadd.f32 %v4811_v12, %v4810_v5  ;;  %v4675_v25 = vpop.permute.xlu2 %4674 }
 0x39f   : > { %v4613_v39 = vadd.f32 %v4571_v62, %v4464_v26 }
 0x3a0   : > { %v4127_v1 = vpop.f32.mrf.mxu3 }
 0x3a1   : > { %v4574_v58 = vpop.f32.mrf.mxu2  ;;  %v4725_v55 = vmul.f32 %v4660_v29, %v4613_v39  ;;  %v4167_v52 = vadd.f32 %v4127_v1, %v7630_v35 }
 0x3a3   : > { %4741 = vst.msk [vmem:[%s6487_s6 + $0x148] sm:$0xff] %vm244_vm2, %v4725_v55  ;;  %v4759_v57 = vsel %vm244_vm2, %v4725_v55, 0.0  ;;  %v4795_v50 = vmul.f32 %v4725_v55, %v4725_v55  ;;  %v4316_v36 = vadd.f32 %v4276_v19, %v4167_v52 }
 0x3a4   : > { %v4279_v54 = vpop.f32.mrf.mxu0  ;;  %v4760_v30 = vadd.f32 %v4759_v57, %v4758_v42 }
 0x3a5   : > { %v4428_v56 = vpop.f32.mrf.mxu1  ;;  %v4813_v60 = vsel %vm244_vm2, %v4795_v50, 0.0  ;;  %v4465_v53 = vadd.f32 %v4425_v21, %v4316_v36  ;;  %v4680_v50 = vpop.permute.xlu0 %4679 }
 0x3a6   : > { %v4814_v49 = vadd.f32 %v4813_v60, %v4812_v3 }
 0x3a7   : > { %v4614_v15 = vadd.f32 %v4574_v58, %v4465_v53 }
 0x3a8   : > { %v4130_v32 = vpop.f32.mrf.mxu3 }
 0x3a9   : > { %v4577_v11 = vpop.f32.mrf.mxu2  ;;  %v4726_v2 = vmul.f32 %v4665_v0, %v4614_v15  ;;  %v4168_v35 = vadd.f32 %v4130_v32, %v7641_v16 }
 0x3ab   : > { %4742 = vst.msk [vmem:[%s6487_s6 + $0x150] sm:$0xff] %vm244_vm2, %v4726_v2  ;;  %v4761_v41 = vsel %vm244_vm2, %v4726_v2, 0.0  ;;  %v4796_v48 = vmul.f32 %v4726_v2, %v4726_v2  ;;  %v4317_v20 = vadd.f32 %v4279_v54, %v4168_v35 }
 0x3ac   : > { %v4282_v31 = vpop.f32.mrf.mxu0  ;;  %v4762_v34 = vadd.f32 %v4761_v41, %v4760_v30  ;;  %v4685_v41 = vpop.permute.xlu1 %4684 }
 0x3ad   : > { %v4431_v47 = vpop.f32.mrf.mxu1  ;;  %v4815_v9 = vsel %vm244_vm2, %v4796_v48, 0.0  ;;  %v4466_v18 = vadd.f32 %v4428_v56, %v4317_v20 }
 0x3ae   : > { %v4816_v13 = vadd.f32 %v4815_v9, %v4814_v49 }
 0x3af   : > { %v4615_v59 = vadd.f32 %v4577_v11, %v4466_v18 }
 0x3b0   : > { %v4133_v6 = vpop.f32.mrf.mxu3 }
 0x3b1   : > { %v4580_v61 = vpop.f32.mrf.mxu2  ;;  %v4727_v17 = vmul.f32 %v4670_v37, %v4615_v59  ;;  %v4169_v16 = vadd.f32 %v4133_v6, %v7652_v38 }
 0x3b3   : > { %4743 = vst.msk [vmem:[%s6487_s6 + $0x158] sm:$0xff] %vm244_vm2, %v4727_v17  ;;  %v4763_v5 = vsel %vm244_vm2, %v4727_v17, 0.0  ;;  %v4797_v44 = vmul.f32 %v4727_v17, %v4727_v17  ;;  %v4318_v63 = vadd.f32 %v4282_v31, %v4169_v16  ;;  %v4690_v16 = vpop.permute.xlu2 %4689 }
 0x3b4   : > { %v4285_v14 = vpop.f32.mrf.mxu0  ;;  %v4764_v43 = vadd.f32 %v4763_v5, %v4762_v34 }
 0x3b5   : > { %v4434_v62 = vpop.f32.mrf.mxu1  ;;  %v4817_v51 = vsel %vm244_vm2, %v4797_v44, 0.0  ;;  %v4467_v45 = vadd.f32 %v4431_v47, %v4318_v63 }
 0x3b6   : > { %v4818_v40 = vadd.f32 %v4817_v51, %v4816_v13 }
 0x3b7   : > { %v4616_v19 = vadd.f32 %v4580_v61, %v4467_v45 }
 0x3b8   : > { %v4136_v21 = vpop.f32.mrf.mxu3 }
 0x3b9   : > { %v4583_v42 = vpop.f32.mrf.mxu2  ;;  %v4728_v12 = vmul.f32 %v4675_v25, %v4616_v19  ;;  %v4170_v38 = vadd.f32 %v4136_v21, %v7663_v46 }
 0x3bb   : > { %4744 = vst.msk [vmem:[%s6487_s6 + $0x160] sm:$0xff] %vm244_vm2, %v4728_v12  ;;  %v4765_v26 = vsel %vm244_vm2, %v4728_v12, 0.0  ;;  %v4798_v3 = vmul.f32 %v4728_v12, %v4728_v12  ;;  %v4319_v29 = vadd.f32 %v4285_v14, %v4170_v38  ;;  %v4695_v12 = vpop.permute.xlu0 %4694 }
 0x3bc   : > { %v4288_v39 = vpop.f32.mrf.mxu0  ;;  %v4766_v58 = vadd.f32 %v4765_v26, %v4764_v43 }
 0x3bd   : > { %v4437_v1 = vpop.f32.mrf.mxu1  ;;  %v4819_v55 = vsel %vm244_vm2, %v4798_v3, 0.0  ;;  %v4468_v52 = vadd.f32 %v4434_v62, %v4319_v29 }
 0x3be   : > { %v4820_v57 = vadd.f32 %v4819_v55, %v4818_v40 }
 0x3bf   : > { %v4617_v36 = vadd.f32 %v4583_v42, %v4468_v52 }
 0x3c0   : > { %v4139_v54 = vpop.f32.mrf.mxu3 }
 0x3c1   : > { %v4586_v56 = vpop.f32.mrf.mxu2  ;;  %v4729_v30 = vmul.f32 %v4680_v50, %v4617_v36  ;;  %v4171_v46 = vadd.f32 %v4139_v54, %v7674_v23 }
 0x3c3   : > { %4745 = vst.msk [vmem:[%s6487_s6 + $0x168] sm:$0xff] %vm244_vm2, %v4729_v30  ;;  %v4767_v60 = vsel %vm244_vm2, %v4729_v30, 0.0  ;;  %v4799_v53 = vmul.f32 %v4729_v30, %v4729_v30  ;;  %v4320_v49 = vadd.f32 %v4288_v39, %v4171_v46 }
 0x3c4   : > { %v4291_v0 = vpop.f32.mrf.mxu0  ;;  %v4768_v32 = vadd.f32 %v4767_v60, %v4766_v58 }
 0x3c5   : > { %v4440_v15 = vpop.f32.mrf.mxu1  ;;  %v4821_v11 = vsel %vm244_vm2, %v4799_v53, 0.0  ;;  %v4469_v2 = vadd.f32 %v4437_v1, %v4320_v49 }
 0x3c6   : > { %v4822_v35 = vadd.f32 %v4821_v11, %v4820_v57 }
 0x3c7   : > { %v4618_v48 = vadd.f32 %v4586_v56, %v4469_v2  ;;  %v4700_v56 = vpop.permute.xlu1 %4699 }
 0x3c8   : > { %v4142_v20 = vpop.f32.mrf.mxu3 }
 0x3c9   : > { %v4589_v31 = vpop.f32.mrf.mxu2  ;;  %v4730_v47 = vmul.f32 %v4685_v41, %v4618_v48  ;;  %v4172_v23 = vadd.f32 %v4142_v20, %v7685_v8  ;;  %v4705_v20 = vpop.permute.xlu2 %4704 }
 0x3cb   : > { %4746 = vst.msk [vmem:[%s6487_s6 + $0x170] sm:$0xff] %vm244_vm2, %v4730_v47  ;;  %v4769_v34 = vsel %vm244_vm2, %v4730_v47, 0.0  ;;  %v4800_v9 = vmul.f32 %v4730_v47, %v4730_v47  ;;  %v4321_v18 = vadd.f32 %v4291_v0, %v4172_v23 }
 0x3cc   : > { %v4294_v13 = vpop.f32.mrf.mxu0  ;;  %v4770_v59 = vadd.f32 %v4769_v34, %v4768_v32 }
 0x3cd   : > { %v4443_v37 = vpop.f32.mrf.mxu1  ;;  %v4823_v6 = vsel %vm244_vm2, %v4800_v9, 0.0  ;;  %v4470_v61 = vadd.f32 %v4440_v15, %v4321_v18 }
 0x3ce   : > { %v4824_v17 = vadd.f32 %v4823_v6, %v4822_v35 }
 0x3cf   : > { %v4619_v5 = vadd.f32 %v4589_v31, %v4470_v61 }
 0x3d0   : > { %v4145_v44 = vpop.f32.mrf.mxu3 }
 0x3d1   : > { %v4592_v63 = vpop.f32.mrf.mxu2  ;;  %v4731_v14 = vmul.f32 %v4690_v16, %v4619_v5  ;;  %v4173_v8 = vadd.f32 %v4145_v44, %v7696_v4  ;;  %v4710_v16 = vpop.permute.xlu0 %4709 }
 0x3d3   : > { %4747 = vst.msk [vmem:[%s6487_s6 + $0x178] sm:$0xff] %vm244_vm2, %v4731_v14  ;;  %v4771_v62 = vsel %vm244_vm2, %v4731_v14, 0.0  ;;  %v4801_v43 = vmul.f32 %v4731_v14, %v4731_v14  ;;  %v4322_v51 = vadd.f32 %v4294_v13, %v4173_v8 }
 0x3d4   : > { %v4297_v45 = vpop.f32.mrf.mxu0  ;;  %v4772_v25 = vadd.f32 %v4771_v62, %v4770_v59 }
 0x3d5   : > { %v4446_v40 = vpop.f32.mrf.mxu1  ;;  %v4825_v19 = vsel %vm244_vm2, %v4801_v43, 0.0  ;;  %v4471_v21 = vadd.f32 %v4443_v37, %v4322_v51 }
 0x3d6   : > { %v4826_v42 = vadd.f32 %v4825_v19, %v4824_v17 }
 0x3d7   : > { %v4620_v38 = vadd.f32 %v4592_v63, %v4471_v21  ;;  %v4715_v21 = vpop.permute.xlu1 %4714 }
 0x3d8   : > { %v4148_v26 = vpop.f32.mrf.mxu3 }
 0x3d9   : > { %v4595_v3 = vpop.f32.mrf.mxu2  ;;  %v4732_v29 = vmul.f32 %v4695_v12, %v4620_v38  ;;  %v4174_v4 = vadd.f32 %v4148_v26, %v7707_v10 }
 0x3db   : > { %4748 = vst.msk [vmem:[%s6487_s6 + $0x180] sm:$0xff] %vm244_vm2, %v4732_v29  ;;  %v4773_v39 = vsel %vm244_vm2, %v4732_v29, 0.0  ;;  %v4802_v1 = vmul.f32 %v4732_v29, %v4732_v29  ;;  %v4323_v58 = vadd.f32 %v4297_v45, %v4174_v4 }
 0x3dc   : > { %v4300_v55 = vpop.f32.mrf.mxu0  ;;  %v4774_v52 = vadd.f32 %v4773_v39, %v4772_v25 }
 0x3dd   : > { %v4449_v57 = vpop.f32.mrf.mxu1  ;;  %v4827_v50 = vsel %vm244_vm2, %v4802_v1, 0.0  ;;  %v4472_v36 = vadd.f32 %v4446_v40, %v4323_v58 }
 0x3de   : > { %v4828_v54 = vadd.f32 %v4827_v50, %v4826_v42 }
 0x3df   : > { %v4621_v30 = vadd.f32 %v4595_v3, %v4472_v36  ;;  %v4720_v36 = vpop.permute.xlu2 %4719 }
 0x3e0   : > { %v4151_v46 = vpop.f32.mrf.mxu3 }
 0x3e1   : > { %v4598_v60 = vpop.f32.mrf.mxu2  ;;  %v4733_v53 = vmul.f32 %v4700_v56, %v4621_v30  ;;  %v4175_v10 = vadd.f32 %v4151_v46, %v7717_v24 }
 0x3e3   : > { %4749 = vst.msk [vmem:[%s6487_s6 + $0x188] sm:$0xff] %vm244_vm2, %v4733_v53  ;;  %v4775_v49 = vsel %vm244_vm2, %v4733_v53, 0.0  ;;  %v4803_v0 = vmul.f32 %v4733_v53, %v4733_v53  ;;  %v4324_v15 = vadd.f32 %v4300_v55, %v4175_v10 }
 0x3e4   : > { %v4776_v32 = vadd.f32 %v4775_v49, %v4774_v52  ;;  %v4303_v11 = vpop.f32.mrf.mxu0 }
 0x3e5   : > { %v4829_v2 = vsel %vm244_vm2, %v4803_v0, 0.0  ;;  %v4473_v35 = vadd.f32 %v4449_v57, %v4324_v15  ;;  %v4452_v48 = vpop.f32.mrf.mxu1 }
 0x3e6   : > { %v4830_v41 = vadd.f32 %v4829_v2, %v4828_v54 }
 0x3e7   : > { %v4622_v31 = vadd.f32 %v4598_v60, %v4473_v35 }
 0x3e8   : > { %v4154_v47 = vpop.f32.mrf.mxu3 }
 0x3e9   : > { %v4601_v23 = vpop.f32.mrf.mxu2  ;;  %v4734_v34 = vmul.f32 %v4705_v20, %v4622_v31  ;;  %v4176_v24 = vadd.f32 %v4154_v47, %v7727_v27 }
 0x3eb   : > { %4750 = vst.msk [vmem:[%s6487_s6 + $0x190] sm:$0xff] %vm244_vm2, %v4734_v34  ;;  %v4777_v9 = vsel %vm244_vm2, %v4734_v34, 0.0  ;;  %v4804_v18 = vmul.f32 %v4734_v34, %v4734_v34  ;;  %v4325_v13 = vadd.f32 %v4303_v11, %v4176_v24 }
 0x3ec   : > { %v4778_v37 = vadd.f32 %v4777_v9, %v4776_v32  ;;  %v4306_v17 = vpop.f32.mrf.mxu0 }
 0x3ed   : > { %v4831_v59 = vsel %vm244_vm2, %v4804_v18, 0.0  ;;  %v4474_v6 = vadd.f32 %v4452_v48, %v4325_v13  ;;  %v4455_v63 = vpop.f32.mrf.mxu1 }
 0x3ee   : > { %v4832_v61 = vadd.f32 %v4831_v59, %v4830_v41 }
 0x3ef   : > { %v4623_v5 = vadd.f32 %v4601_v23, %v4474_v6 }
 0x3f0   : > { %v4157_v44 = vpop.f32.mrf.mxu3 }
 0x3f1   : > { %v4735_v14 = vmul.f32 %v4710_v16, %v4623_v5  ;;  %v4177_v27 = vadd.f32 %v4157_v44, %v7737_v22  ;;  %v4604_v8 = vpop.f32.mrf.mxu2 }
 0x3f3   : > { %4751 = vst.msk [vmem:[%s6487_s6 + $0x198] sm:$0xff] %vm244_vm2, %v4735_v14  ;;  %v4779_v62 = vsel %vm244_vm2, %v4735_v14, 0.0  ;;  %v4805_v43 = vmul.f32 %v4735_v14, %v4735_v14  ;;  %v4326_v51 = vadd.f32 %v4306_v17, %v4177_v27 }
 0x3f4   : > { %v4780_v45 = vadd.f32 %v4779_v62, %v4778_v37  ;;  %v4309_v38 = vpop.f32.mrf.mxu0 }
 0x3f5   : > { %v4833_v40 = vsel %vm244_vm2, %v4805_v43, 0.0  ;;  %v4475_v25 = vadd.f32 %v4455_v63, %v4326_v51  ;;  %v4458_v3 = vpop.f32.mrf.mxu1 }
 0x3f6   : > { %v4834_v19 = vadd.f32 %v4833_v40, %v4832_v61 }
 0x3f7   : > { %v4624_v42 = vadd.f32 %v4604_v8, %v4475_v25 }
 0x3f8   : > { %v4160_v12 = vpop.f32.mrf.mxu3 }
 0x3f9   : > { %v4736_v26 = vmul.f32 %v4715_v21, %v4624_v42  ;;  %v4178_v22 = vadd.f32 %v4160_v12, %v7740_v28  ;;  %v4607_v58 = vpop.f32.mrf.mxu2 }
 0x3fb   : > { %4752 = vst.msk [vmem:[%s6487_s6 + $0x1a0] sm:$0xff] %vm244_vm2, %v4736_v26  ;;  %v4781_v29 = vsel %vm244_vm2, %v4736_v26, 0.0  ;;  %v4806_v4 = vmul.f32 %v4736_v26, %v4736_v26  ;;  %v4327_v39 = vadd.f32 %v4309_v38, %v4178_v22 }
 0x3fc   : > { %v4782_v1 = vadd.f32 %v4781_v29, %v4780_v45 }
 0x3fd   : > { %v4835_v55 = vsel %vm244_vm2, %v4806_v4, 0.0  ;;  %v4476_v52 = vadd.f32 %v4458_v3, %v4327_v39 }
 0x3fe   : > { %v4836_v57 = vadd.f32 %v4835_v55, %v4834_v19 }
 0x3ff   : > { %v4625_v50 = vadd.f32 %v4607_v58, %v4476_v52 }
 0x401   : > { %v4737_v54 = vmul.f32 %v4720_v36, %v4625_v50 }
 0x403   : > { %4753 = vst.msk [vmem:[%s6487_s6 + $0x1a8] sm:$0xff] %vm244_vm2, %v4737_v54  ;;  %v4783_v28 = vsel %vm244_vm2, %v4737_v54, 0.0  ;;  %v4807_v56 = vmul.f32 %v4737_v54, %v4737_v54  ;;  %s5535_s6 = scalar_lea.hbm %s7900_s4, 2 }
 0x404   : > { %v4784_v30 = vadd.f32 %v4783_v28, %v4782_v1  ;;  %p5537_p1 = scmp.lt.s32.totalorder %s5535_s6, %s5531_s7 }
 0x405   : > { %v4837_v46 = vsel %vm244_vm2, %v4807_v56, 0.0 }
 0x406   : > { %v4785_v60 = vrot.slane %v4784_v30, 4  ;;  %v4838_v53 = vadd.f32 %v4837_v46, %v4836_v57  ;;  %p5538_p2 = por %p5537_p1, %p5536_p0 }
 0x408   : > { %v4786_v10 = vadd.f32 %v4785_v60, %v4784_v30  ;;  %v4839_v49 = vrot.slane %v4838_v53, 4  ;;  %p5539_p3 = pnand %p5538_p2, %p5534_p13 }
 0x40a   : > { %v4787_v0 = vrot.slane %v4786_v10, 2  ;;  %v4840_v15 = vadd.f32 %v4839_v49, %v4838_v53 }
 0x40c   : > { %v4788_v32 = vadd.f32 %v4787_v0, %v4786_v10  ;;  %v4841_v11 = vrot.slane %v4840_v15, 2 }
 0x40e   : > { %v4789_v2 = vrot.slane %v4788_v32, 1  ;;  %v4842_v35 = vadd.f32 %v4841_v11, %v4840_v15 }
 0x410   : > { %v4790_v41 = vadd.f32 %v4789_v2, %v4788_v32  ;;  %v4843_v48 = vrot.slane %v4842_v35, 1 }
 0x412   : > { %v4791_v20 = vadd.f32 %v4790_v41, %v7595_v7  ;;  %v4844_v31 = vadd.f32 %v4843_v48, %v4842_v35 }
 0x414   : > { %4847 = vst.msk [vmem:[%s227_s15] sm:$0x1] %vm4846_vm3, %v4791_v20  ;;  %v4845_v47 = vadd.f32 %v4844_v31, %v7598_v33 }
 0x415   : > { %5542 = shalt.err (!%p5539_p3)
}
 0x416   : > { %5466 = dma.vmem_to_hbm [thread:$0]  (%p5681_p5), %s4873_s16, 16, %s4875_s17, %s4855_s22   ;;  %4848 = vst.msk [vmem:[%s233_s25] sm:$0x1] %vm4846_vm3, %v4845_v47 }
 0x417   : > { %s4859_s12 = scalar_lea.sflag [#allocation5], %s7823_s30  ;;  %s5557_s14 = sshra.s32 %s4888_s13, 4  ;;  %s5558_s14 = int_to_ptr.hbm [resolvable:$true] %s5557_s14 }
 0x418   : > { %s5559_s15 = scalar_lea.hbm %s5558_s14, 1  ;;  %s5563_s8 = scalar_lea.hbm %s7901_s5, 2 }
 0x419   : > { %p5560_p4 = scmp.ne.s32.totalorder %s5558_s14, %s5559_s15  ;;  %p5564_p9 = scmp.lt.s32.totalorder %s5558_s14, %s7901_s5 }
 0x41a   : > { %p5565_p10 = scmp.lt.s32.totalorder %s5563_s8, %s5559_s15 }
 0x41b   : > { %p5561_p7 = pnand %p5560_p4, %p5681_p5 }
 0x41c   : > { %p5566_p11 = por %p5565_p10, %p5564_p9 }
 0x41d   : > { %p5562_p8 = pneg %p5561_p7 }
 0x41f   : > { %p5567_p12 = pnand %p5566_p11, %p5562_p8 }
 0x421   : > { %5570 = shalt.err (!%p5567_p12)
}
 0x422   : > { %5467 = dma.vmem_to_hbm [thread:$0]  (%p5681_p5), %s4886_s26, 16, %s4888_s13, %s4859_s12  }
 0x423 PF: > { %p5477_p13 = scmp.ge.s32.totalorder %s5609_s21, 2  ;;  %s4907_s30 = sand.u32 1, %s5597_s18  }
 0x424   : > { %s4908_s16 = scalar_lea.sflag [#allocation3], %s4907_s30 }
 0x425   : > { %p5471_p0 = pnand %p5477_p13, %p5685_p6 }
 0x427   : > { %p5472_p1 = pneg %p5471_p0 }
 0x429   : > { %5588 = dma.done.wait (%p5472_p1), %s4908_s16, 16  }
 0x42a   : > { %5590 = vsyncadd (%p5472_p1), %s4908_s16, 4294967280  ;;  %s4917_s17 = scalar_lea.sflag [#allocation5], %s4907_s30 }
 0x42b   : > { %5592 = dma.done.wait (%p5472_p1), %s4917_s17, 16  }
 0x42c   : > { %5594 = vsyncadd (%p5472_p1), %s4917_s17, 4294967280  ;;  %p19_p5 = scmp.ge.s32.totalorder %s5668_s24, 4   ;;  %s7952_s18 = smov %s5601_s19 }
 0x42d   : > { %s7953_s19 = smov %s5605_s20  ;;  %s7954_s20 = smov %s5679_s27 }
 0x42e   : > { %s7955_s21 = smov %s5668_s24  ;;  %21 = sbr.rel (!%p19_p5) target bundleno = 5 (0x5), region = 96 }
 0x433   :  { %4922 = vsyncpa [#allocation3], 1 }
 0x434   :  { %4924 = vsyncpa [#allocation3 + $0x1], 1 }
 0x435   :  { %4925 = vsyncpa [#allocation5], 1 }
 0x436   :  { %4927 = vsyncpa [#allocation5 + $0x1], 1 }

</bundles_post_ra>
